<compile_context>
chip_gen: v7x
topology: tpu7x:2x2x1
jax: 0.10.0
libtpu: 0.0.40
codegen_flags: <defaults>
</compile_context>

<pallas_src>
import functools

import numpy as np

import jax
import jax.numpy as jnp
from jax.experimental import pallas as pl
from jax.experimental.pallas import tpu as pltpu

_ONES_ROWS = 8  # constant-1 rows at the top of the rolled slab (bias column)


def _round_up(x, m):
    return (x + m - 1) // m * m


def _conv_meta(nc, gc):
    """(cout, cin) for the 15 convs of the RRDB (3 RDBs x 5 convs)."""
    meta = []
    for _ in range(3):
        for c in range(5):
            meta.append((nc if c == 4 else gc, nc + c * gc))
    return meta


def _weight_row_offsets(nc, gc):
    """Row offset of each (conv, kw) block inside the packed weight slab."""
    offs, row = [], 0
    for cout, _ in _conv_meta(nc, gc):
        per_kw = []
        for _ in range(3):
            per_kw.append(row)
            row += cout
        offs.append(per_kw)
    return offs, row


# ----------------------------------------------------------------------------
# Fused RRDB kernel
# ----------------------------------------------------------------------------
def _make_rrdb_kernel(nc, gc, wp, flat):
    """Every feature map is a (C, flat) f32 tile: channels on sublanes,
    flattened zero-padded spatial plane (row stride wp) on lanes."""
    shift_up = wp            # kh=0 copy: rolled[p] = y[p - wp]  (row above)
    shift_dn = flat - wp     # kh=2 copy: rolled[p] = y[p + wp]  (row below)
    w_offs, _ = _weight_row_offsets(nc, gc)

    def write_block(r_ref, base, y):
        """Append the 3 kh-rolled copies of channel block `y` to the slab.
        Row layout (matches the packed weights): base + kh*cb + channel."""
        cb = y.shape[0]
        r_ref[base + 0 * cb: base + 1 * cb, :] = pltpu.roll(y, shift_up, 1)
        r_ref[base + 1 * cb: base + 2 * cb, :] = y
        r_ref[base + 2 * cb: base + 3 * cb, :] = pltpu.roll(y, shift_dn, 1)

    def kernel(x_ref, w_ref, m_ref, o_ref, r_ref):
        ring = m_ref[...]                       # (1, flat): 1 inside HxW
        # Constant-1 rows -> bias is folded into the kw=1 matmul (column 0).
        r_ref[0:_ONES_ROWS, :] = jnp.ones((_ONES_ROWS, flat), jnp.float32)

        x_in = x_ref[0]                         # (nc, flat), zero padding ring
        x_cur = x_in                            # current RDB input
        for r in range(3):
            write_block(r_ref, _ONES_ROWS, x_cur)   # dense-block channel 0
            cin = nc
            for c in range(5):
                conv_idx = r * 5 + c
                cout = nc if c == 4 else gc
                k = _ONES_ROWS + 3 * cin        # multiple of 8 -> aligned
                s = r_ref[0:k, :]               # (k, flat) stationary operand
                # 3 matmuls (one per kw column of the 3x3 kernel); the +/-1
                # column shifts are realized by rolling the partial results.
                parts = []
                for kw in range(3):
                    row0 = w_offs[conv_idx][kw]
                    wmat = w_ref[row0:row0 + cout, 0:k]   # (cout, k)
                    parts.append(jnp.dot(wmat, s,
                                         preferred_element_type=jnp.float32))
                acc = (pltpu.roll(parts[0], 1, 1)         # kw=0: need p-1
                       + parts[1]                         # kw=1 (has bias)
                       + pltpu.roll(parts[2], flat - 1, 1))  # kw=2: need p+1
                # conv_block = Conv2d + LeakyReLU(0.2)  (all 5 convs, per spec)
                acc = jnp.where(acc >= 0.0, acc, 0.2 * acc)
                y = acc * ring                  # keep the padding ring zero
                if c < 4:
                    write_block(r_ref, _ONES_ROWS + 3 * cin, y)  # "torch.cat"
                    cin += gc
                else:
                    x_cur = y * 0.2 + x_cur     # RDB residual
        # Outer RRDB residual fused into the epilogue; lane-dense store.
        o_ref[0] = (x_cur * 0.2 + x_in).astype(o_ref.dtype)

    return kernel


# ----------------------------------------------------------------------------
# Weight packing (host-side, numpy) — one tight 2D slab for all 15 convs
# ----------------------------------------------------------------------------
def pack_rrdb_params(params, nc, gc):
    """Pack the 15 (W, b) pairs into one (total_rows, kcols) f32 slab whose
    row/column layout matches the rolled slab (kh-major / channel-minor per
    dense-block channel block, bias in column 0 of the kw=1 block)."""
    kcols = _round_up(_ONES_ROWS + 3 * (nc + 4 * gc), 128)
    offs, total_rows = _weight_row_offsets(nc, gc)
    w_all = np.zeros((total_rows, kcols), np.float32)
    conv_idx = 0
    for rdb in params:
        for c, (w_oihw, b) in enumerate(rdb):
            w_np = np.asarray(w_oihw, np.float32)      # (cout, cin, 3, 3)
            b_np = np.asarray(b, np.float32)
            cout = w_np.shape[0]
            blocks = [nc] + [gc] * c                   # dense concat order
            for kw in range(3):
                row0 = offs[conv_idx][kw]
                mat = np.zeros((cout, kcols), np.float32)
                if kw == 1:
                    mat[:, 0] = b_np                   # bias column
                col, c0 = _ONES_ROWS, 0
                for cb in blocks:
                    wb = w_np[:, c0:c0 + cb, :, kw]    # (cout, cb, 3)
                    mat[:, col:col + 3 * cb] = (
                        np.transpose(wb, (0, 2, 1)).reshape(cout, 3 * cb))
                    col += 3 * cb
                    c0 += cb
                w_all[row0:row0 + cout, :] = mat
            conv_idx += 1
    return jnp.asarray(w_all)


# ----------------------------------------------------------------------------
# Wrapper: layout plumbing + pallas_call
# ----------------------------------------------------------------------------
def rrdb_forward(x_nchw, w_all, nc, gc):
    """RRDB forward.  NCHW in / NCHW out.  One fused pallas_call, grid=(N,)."""
    n, nc_in, h, w = x_nchw.shape
    assert nc_in == nc
    assert nc % 8 == 0 and gc % 8 == 0, "channel counts must be multiples of 8"

    hp, wp = h + 2, w + 2
    flat = _round_up(hp * wp, 128)            # lane-dense padded plane
    kcols = _round_up(_ONES_ROWS + 3 * (nc + 4 * gc), 128)
    _, w_rows = _weight_row_offsets(nc, gc)
    assert w_all.shape == (w_rows, kcols)
    r_rows = _ONES_ROWS + 3 * (nc + 4 * gc)   # rolled slab rows (mult of 8)

    # ---- boundary layout plumbing (tiny tensors, once per call, pure XLA) --
    xp = jnp.pad(x_nchw, ((0, 0), (0, 0), (1, 1), (1, 1)))   # zero pad ring
    x_flat = jnp.pad(xp.reshape(n, nc, hp * wp),
                     ((0, 0), (0, 0), (0, flat - hp * wp)))

    # Interior mask (1 inside H x W, 0 on the ring and the flat tail).
    pos = jnp.arange(flat, dtype=jnp.int32)
    row, col = pos // wp, pos % wp
    ring_mask = (((row >= 1) & (row <= h) & (col >= 1) & (col <= w)
                  & (pos < hp * wp)).astype(jnp.float32).reshape(1, flat))

    # Explicit scoped-VMEM budget (generous; tiny at these toy shapes).
    vmem_need = (r_rows * flat * 4                 # rolled-feature slab
                 + 2 * 2 * nc * flat * 4           # in/out, double-buffered
                 + 2 * w_rows * kcols * 4          # packed weights
                 + 2 * flat * 4)                   # mask
    vmem_limit = int(max(2 * vmem_need, 8 * 1024 * 1024))

    kernel = _make_rrdb_kernel(nc, gc, wp, flat)

    out_flat = pl.pallas_call(
        kernel,
        out_shape=jax.ShapeDtypeStruct((n, nc, flat), x_nchw.dtype),
        grid=(n,),
        in_specs=[
            pl.BlockSpec((1, nc, flat), lambda i: (i, 0, 0)),
            pl.BlockSpec((w_rows, kcols), lambda i: (0, 0)),
            pl.BlockSpec((1, flat), lambda i: (0, 0)),
        ],
        out_specs=pl.BlockSpec((1, nc, flat), lambda i: (i, 0, 0)),
        scratch_shapes=[pltpu.VMEM((r_rows, flat), jnp.float32)],
        compiler_params=pltpu.CompilerParams(
            dimension_semantics=("parallel",),     # batch shards across TCs
            vmem_limit_bytes=vmem_limit),
    )(x_flat, w_all, ring_mask)

    # Un-pad back to NCHW (tiny wrapper-side layout plumbing).
    out = out_flat[:, :, :hp * wp].reshape(n, nc, hp, wp)[:, :, 1:1 + h, 1:1 + w]
    return out


# ----------------------------------------------------------------------------
# Parameters (deterministic, PyTorch Conv2d-style init, OIHW layout)
# ----------------------------------------------------------------------------
def _make_conv_params(key, cin, cout):
    kw_key, kb_key = jax.random.split(key)
    bound = 1.0 / (cin * 9) ** 0.5
    w = jax.random.uniform(kw_key, (cout, cin, 3, 3), jnp.float32, -bound, bound)
    b = jax.random.uniform(kb_key, (cout,), jnp.float32, -bound, bound)
    return w, b


def make_rrdb_params(key, nc, gc):
    params = []
    for kr in jax.random.split(key, 3):
        keys = jax.random.split(kr, 5)
        cins = [nc + i * gc for i in range(5)]
        couts = [gc] * 4 + [nc]
        params.append([_make_conv_params(k, ci, co)
                       for k, ci, co in zip(keys, cins, couts)])
    return params


# ----------------------------------------------------------------------------
# Pure-JAX reference (mirrors the PyTorch module exactly, incl. LeakyReLU
# after conv5, since conv5 is also a conv_block in this spec)
# ----------------------------------------------------------------------------
def _conv_lrelu_ref(x, w_oihw, b):
    y = jax.lax.conv_general_dilated(
        x, w_oihw, window_strides=(1, 1), padding=((1, 1), (1, 1)),
        dimension_numbers=("NCHW", "OIHW", "NCHW"),
        precision=jax.lax.Precision.HIGHEST)
    y = y + b[None, :, None, None]
    return jnp.where(y >= 0.0, y, 0.2 * y)


def rrdb_reference(x, params):
    out = x
    for rdb in params:
        feats = [out]
        for c, (wc, bc) in enumerate(rdb):
            y = _conv_lrelu_ref(jnp.concatenate(feats, axis=1), wc, bc)
            if c < 4:
                feats.append(y)
            else:
                out = y * 0.2 + out          # RDB residual
    return out * 0.2 + x                     # RRDB residual


# ----------------------------------------------------------------------------
# Main
# ----------------------------------------------------------------------------
if __name__ == "__main__":
    nc, gc = 8, 8
    n, h, w = 2, 16, 16

    key = jax.random.PRNGKey(0)
    k_x, k_p = jax.random.split(key)
    x = jax.random.normal(k_x, (n, nc, h, w), jnp.float32)   # NCHW input
    params = make_rrdb_params(k_p, nc, gc)

    w_all = pack_rrdb_params(params, nc, gc)                 # host-side pack
    fwd = jax.jit(functools.partial(rrdb_forward, w_all=w_all, nc=nc, gc=gc))
    out = jax.block_until_ready(fwd(x))

    assert out.shape == (n, nc, h, w), out.shape
    assert bool(jnp.all(jnp.isfinite(out)))

    # Numerical check of the fused kernel against the pure-JAX reference.
    ref = rrdb_reference(x, params)
    err = float(jnp.max(jnp.abs(out - ref)))
    assert err < 1e-3, f"max abs error vs reference: {err}"

    print("KERNEL_OK")
</pallas_src>

<mosaic_0001>
module attributes {stable_mosaic.version = 11 : i64} {
  func.func @kernel(%arg0: i32, %arg1: memref<1x8x384xf32, #tpu.memory_space<vmem>>, %arg2: memref<360x128xf32, #tpu.memory_space<vmem>>, %arg3: memref<1x384xf32, #tpu.memory_space<vmem>>, %arg4: memref<1x8x384xf32, #tpu.memory_space<vmem>>, %arg5: memref<128x384xf32, #tpu.memory_space<vmem>>) attributes {dimension_semantics = [#tpu.dimension_semantics<parallel>], iteration_bounds = array<i64: 2>, scalar_prefetch = 0 : i64, scratch_operands = 1 : i64, tpu.core_type = #tpu.core_type<tc>, window_params = [{transform_indices = @transform_0, window_bounds = array<i64: 1, 8, 384>}, {pipeline_mode = #tpu.pipeline_mode<synchronous>, transform_indices = @transform_1, window_bounds = array<i64: 360, 128>}, {pipeline_mode = #tpu.pipeline_mode<synchronous>, transform_indices = @transform_2, window_bounds = array<i64: 1, 384>}, {transform_indices = @transform_3, window_bounds = array<i64: 1, 8, 384>}]} {
    %c0 = arith.constant 0 : index
    %c0_0 = arith.constant 0 : index
    %0 = vector.load %arg3[%c0, %c0_0] : memref<1x384xf32, #tpu.memory_space<vmem>>, vector<1x384xf32>
    %cst = arith.constant 1.000000e+00 : f32
    %1 = vector.broadcast %cst : f32 to vector<8x384xf32>
    %c0_1 = arith.constant 0 : index
    %c0_2 = arith.constant 0 : index
    %2 = vector.load %arg5[%c0_1, %c0_2] : memref<128x384xf32, #tpu.memory_space<vmem>>, vector<8x384xf32>
    tpu.vector_store %arg5[%c0_1, %c0_2], %1 {strides = array<i32>} : memref<128x384xf32, #tpu.memory_space<vmem>>, vector<8x384xf32>,
    %c0_3 = arith.constant 0 : index
    %c0_4 = arith.constant 0 : index
    %c0_5 = arith.constant 0 : index
    %3 = vector.load %arg1[%c0_3, %c0_4, %c0_5] : memref<1x8x384xf32, #tpu.memory_space<vmem>>, vector<1x8x384xf32>
    %4 = vector.shape_cast %3 : vector<1x8x384xf32> to vector<8x384xf32>
    %c18_i32 = arith.constant 18 : i32
    %5 = tpu.dynamic_rotate %4 by %c18_i32 dim 1 : vector<8x384xf32>, i32 -> vector<8x384xf32>
    %c8 = arith.constant 8 : index
    %c0_6 = arith.constant 0 : index
    %6 = vector.load %arg5[%c8, %c0_6] : memref<128x384xf32, #tpu.memory_space<vmem>>, vector<8x384xf32>
    tpu.vector_store %arg5[%c8, %c0_6], %5 {strides = array<i32>} : memref<128x384xf32, #tpu.memory_space<vmem>>, vector<8x384xf32>,
    %c16 = arith.constant 16 : index
    %c0_7 = arith.constant 0 : index
    %7 = vector.load %arg5[%c16, %c0_7] : memref<128x384xf32, #tpu.memory_space<vmem>>, vector<8x384xf32>
    tpu.vector_store %arg5[%c16, %c0_7], %4 {strides = array<i32>} : memref<128x384xf32, #tpu.memory_space<vmem>>, vector<8x384xf32>,
    %c366_i32 = arith.constant 366 : i32
    %8 = tpu.dynamic_rotate %4 by %c366_i32 dim 1 : vector<8x384xf32>, i32 -> vector<8x384xf32>
    %c24 = arith.constant 24 : index
    %c0_8 = arith.constant 0 : index
    %9 = vector.load %arg5[%c24, %c0_8] : memref<128x384xf32, #tpu.memory_space<vmem>>, vector<8x384xf32>
    tpu.vector_store %arg5[%c24, %c0_8], %8 {strides = array<i32>} : memref<128x384xf32, #tpu.memory_space<vmem>>, vector<8x384xf32>,
    %c0_9 = arith.constant 0 : index
    %c0_10 = arith.constant 0 : index
    %10 = vector.load %arg5[%c0_9, %c0_10] : memref<128x384xf32, #tpu.memory_space<vmem>>, vector<32x384xf32>
    %c0_11 = arith.constant 0 : index
    %c0_12 = arith.constant 0 : index
    %11 = vector.load %arg2[%c0_11, %c0_12] : memref<360x128xf32, #tpu.memory_space<vmem>>, vector<8x32xf32>
    %cst_13 = arith.constant dense<0.000000e+00> : vector<8x384xf32>
    %12 = tpu.matmul %11, %10, %cst_13 {dimension_numbers = #tpu.dot_dimension_numbers<[1], [0], [0], [1], [0, 0, 1, 1], [], []>} : vector<8x32xf32>, vector<32x384xf32>, vector<8x384xf32> -> vector<8x384xf32>
    %c8_14 = arith.constant 8 : index
    %c0_15 = arith.constant 0 : index
    %13 = vector.load %arg2[%c8_14, %c0_15] : memref<360x128xf32, #tpu.memory_space<vmem>>, vector<8x32xf32>
    %cst_16 = arith.constant dense<0.000000e+00> : vector<8x384xf32>
    %14 = tpu.matmul %13, %10, %cst_16 {dimension_numbers = #tpu.dot_dimension_numbers<[1], [0], [0], [1], [0, 0, 1, 1], [], []>} : vector<8x32xf32>, vector<32x384xf32>, vector<8x384xf32> -> vector<8x384xf32>
    %c16_17 = arith.constant 16 : index
    %c0_18 = arith.constant 0 : index
    %15 = vector.load %arg2[%c16_17, %c0_18] : memref<360x128xf32, #tpu.memory_space<vmem>>, vector<8x32xf32>
    %cst_19 = arith.constant dense<0.000000e+00> : vector<8x384xf32>
    %16 = tpu.matmul %15, %10, %cst_19 {dimension_numbers = #tpu.dot_dimension_numbers<[1], [0], [0], [1], [0, 0, 1, 1], [], []>} : vector<8x32xf32>, vector<32x384xf32>, vector<8x384xf32> -> vector<8x384xf32>
    %c1_i32 = arith.constant 1 : i32
    %17 = tpu.dynamic_rotate %12 by %c1_i32 dim 1 : vector<8x384xf32>, i32 -> vector<8x384xf32>
    %18 = arith.addf %17, %14 : vector<8x384xf32>
    %c383_i32 = arith.constant 383 : i32
    %19 = tpu.dynamic_rotate %16 by %c383_i32 dim 1 : vector<8x384xf32>, i32 -> vector<8x384xf32>
    %20 = arith.addf %18, %19 : vector<8x384xf32>
    %cst_20 = arith.constant 0.000000e+00 : f32
    %21 = vector.broadcast %cst_20 : f32 to vector<8x384xf32>
    %22 = arith.cmpf oge, %20, %21 : vector<8x384xf32>
    %cst_21 = arith.constant 2.000000e-01 : f32
    %23 = vector.broadcast %cst_21 : f32 to vector<8x384xf32>
    %24 = arith.mulf %23, %20 : vector<8x384xf32>
    %25 = arith.select %22, %20, %24 : vector<8x384xi1>, vector<8x384xf32>
    %26 = vector.broadcast %0 : vector<1x384xf32> to vector<8x384xf32>
    %27 = arith.mulf %25, %26 : vector<8x384xf32>
    %c18_i32_22 = arith.constant 18 : i32
    %28 = tpu.dynamic_rotate %27 by %c18_i32_22 dim 1 : vector<8x384xf32>, i32 -> vector<8x384xf32>
    %c32 = arith.constant 32 : index
    %c0_23 = arith.constant 0 : index
    %29 = vector.load %arg5[%c32, %c0_23] : memref<128x384xf32, #tpu.memory_space<vmem>>, vector<8x384xf32>
    tpu.vector_store %arg5[%c32, %c0_23], %28 {strides = array<i32>} : memref<128x384xf32, #tpu.memory_space<vmem>>, vector<8x384xf32>,
    %c40 = arith.constant 40 : index
    %c0_24 = arith.constant 0 : index
    %30 = vector.load %arg5[%c40, %c0_24] : memref<128x384xf32, #tpu.memory_space<vmem>>, vector<8x384xf32>
    tpu.vector_store %arg5[%c40, %c0_24], %27 {strides = array<i32>} : memref<128x384xf32, #tpu.memory_space<vmem>>, vector<8x384xf32>,
    %c366_i32_25 = arith.constant 366 : i32
    %31 = tpu.dynamic_rotate %27 by %c366_i32_25 dim 1 : vector<8x384xf32>, i32 -> vector<8x384xf32>
    %c48 = arith.constant 48 : index
    %c0_26 = arith.constant 0 : index
    %32 = vector.load %arg5[%c48, %c0_26] : memref<128x384xf32, #tpu.memory_space<vmem>>, vector<8x384xf32>
    tpu.vector_store %arg5[%c48, %c0_26], %31 {strides = array<i32>} : memref<128x384xf32, #tpu.memory_space<vmem>>, vector<8x384xf32>,
    %c0_27 = arith.constant 0 : index
    %c0_28 = arith.constant 0 : index
    %33 = vector.load %arg5[%c0_27, %c0_28] : memref<128x384xf32, #tpu.memory_space<vmem>>, vector<56x384xf32>
    %c24_29 = arith.constant 24 : index
    %c0_30 = arith.constant 0 : index
    %34 = vector.load %arg2[%c24_29, %c0_30] : memref<360x128xf32, #tpu.memory_space<vmem>>, vector<8x56xf32>
    %cst_31 = arith.constant dense<0.000000e+00> : vector<8x384xf32>
    %35 = tpu.matmul %34, %33, %cst_31 {dimension_numbers = #tpu.dot_dimension_numbers<[1], [0], [0], [1], [0, 0, 1, 1], [], []>} : vector<8x56xf32>, vector<56x384xf32>, vector<8x384xf32> -> vector<8x384xf32>
    %c32_32 = arith.constant 32 : index
    %c0_33 = arith.constant 0 : index
    %36 = vector.load %arg2[%c32_32, %c0_33] : memref<360x128xf32, #tpu.memory_space<vmem>>, vector<8x56xf32>
    %cst_34 = arith.constant dense<0.000000e+00> : vector<8x384xf32>
    %37 = tpu.matmul %36, %33, %cst_34 {dimension_numbers = #tpu.dot_dimension_numbers<[1], [0], [0], [1], [0, 0, 1, 1], [], []>} : vector<8x56xf32>, vector<56x384xf32>, vector<8x384xf32> -> vector<8x384xf32>
    %c40_35 = arith.constant 40 : index
    %c0_36 = arith.constant 0 : index
    %38 = vector.load %arg2[%c40_35, %c0_36] : memref<360x128xf32, #tpu.memory_space<vmem>>, vector<8x56xf32>
    %cst_37 = arith.constant dense<0.000000e+00> : vector<8x384xf32>
    %39 = tpu.matmul %38, %33, %cst_37 {dimension_numbers = #tpu.dot_dimension_numbers<[1], [0], [0], [1], [0, 0, 1, 1], [], []>} : vector<8x56xf32>, vector<56x384xf32>, vector<8x384xf32> -> vector<8x384xf32>
    %c1_i32_38 = arith.constant 1 : i32
    %40 = tpu.dynamic_rotate %35 by %c1_i32_38 dim 1 : vector<8x384xf32>, i32 -> vector<8x384xf32>
    %41 = arith.addf %40, %37 : vector<8x384xf32>
    %c383_i32_39 = arith.constant 383 : i32
    %42 = tpu.dynamic_rotate %39 by %c383_i32_39 dim 1 : vector<8x384xf32>, i32 -> vector<8x384xf32>
    %43 = arith.addf %41, %42 : vector<8x384xf32>
    %cst_40 = arith.constant 0.000000e+00 : f32
    %44 = vector.broadcast %cst_40 : f32 to vector<8x384xf32>
    %45 = arith.cmpf oge, %43, %44 : vector<8x384xf32>
    %cst_41 = arith.constant 2.000000e-01 : f32
    %46 = vector.broadcast %cst_41 : f32 to vector<8x384xf32>
    %47 = arith.mulf %46, %43 : vector<8x384xf32>
    %48 = arith.select %45, %43, %47 : vector<8x384xi1>, vector<8x384xf32>
    %49 = vector.broadcast %0 : vector<1x384xf32> to vector<8x384xf32>
    %50 = arith.mulf %48, %49 : vector<8x384xf32>
    %c18_i32_42 = arith.constant 18 : i32
    %51 = tpu.dynamic_rotate %50 by %c18_i32_42 dim 1 : vector<8x384xf32>, i32 -> vector<8x384xf32>
    %c56 = arith.constant 56 : index
    %c0_43 = arith.constant 0 : index
    %52 = vector.load %arg5[%c56, %c0_43] : memref<128x384xf32, #tpu.memory_space<vmem>>, vector<8x384xf32>
    tpu.vector_store %arg5[%c56, %c0_43], %51 {strides = array<i32>} : memref<128x384xf32, #tpu.memory_space<vmem>>, vector<8x384xf32>,
    %c64 = arith.constant 64 : index
    %c0_44 = arith.constant 0 : index
    %53 = vector.load %arg5[%c64, %c0_44] : memref<128x384xf32, #tpu.memory_space<vmem>>, vector<8x384xf32>
    tpu.vector_store %arg5[%c64, %c0_44], %50 {strides = array<i32>} : memref<128x384xf32, #tpu.memory_space<vmem>>, vector<8x384xf32>,
    %c366_i32_45 = arith.constant 366 : i32
    %54 = tpu.dynamic_rotate %50 by %c366_i32_45 dim 1 : vector<8x384xf32>, i32 -> vector<8x384xf32>
    %c72 = arith.constant 72 : index
    %c0_46 = arith.constant 0 : index
    %55 = vector.load %arg5[%c72, %c0_46] : memref<128x384xf32, #tpu.memory_space<vmem>>, vector<8x384xf32>
    tpu.vector_store %arg5[%c72, %c0_46], %54 {strides = array<i32>} : memref<128x384xf32, #tpu.memory_space<vmem>>, vector<8x384xf32>,
    %c0_47 = arith.constant 0 : index
    %c0_48 = arith.constant 0 : index
    %56 = vector.load %arg5[%c0_47, %c0_48] : memref<128x384xf32, #tpu.memory_space<vmem>>, vector<80x384xf32>
    %c48_49 = arith.constant 48 : index
    %c0_50 = arith.constant 0 : index
    %57 = vector.load %arg2[%c48_49, %c0_50] : memref<360x128xf32, #tpu.memory_space<vmem>>, vector<8x80xf32>
    %cst_51 = arith.constant dense<0.000000e+00> : vector<8x384xf32>
    %58 = tpu.matmul %57, %56, %cst_51 {dimension_numbers = #tpu.dot_dimension_numbers<[1], [0], [0], [1], [0, 0, 1, 1], [], []>} : vector<8x80xf32>, vector<80x384xf32>, vector<8x384xf32> -> vector<8x384xf32>
    %c56_52 = arith.constant 56 : index
    %c0_53 = arith.constant 0 : index
    %59 = vector.load %arg2[%c56_52, %c0_53] : memref<360x128xf32, #tpu.memory_space<vmem>>, vector<8x80xf32>
    %cst_54 = arith.constant dense<0.000000e+00> : vector<8x384xf32>
    %60 = tpu.matmul %59, %56, %cst_54 {dimension_numbers = #tpu.dot_dimension_numbers<[1], [0], [0], [1], [0, 0, 1, 1], [], []>} : vector<8x80xf32>, vector<80x384xf32>, vector<8x384xf32> -> vector<8x384xf32>
    %c64_55 = arith.constant 64 : index
    %c0_56 = arith.constant 0 : index
    %61 = vector.load %arg2[%c64_55, %c0_56] : memref<360x128xf32, #tpu.memory_space<vmem>>, vector<8x80xf32>
    %cst_57 = arith.constant dense<0.000000e+00> : vector<8x384xf32>
    %62 = tpu.matmul %61, %56, %cst_57 {dimension_numbers = #tpu.dot_dimension_numbers<[1], [0], [0], [1], [0, 0, 1, 1], [], []>} : vector<8x80xf32>, vector<80x384xf32>, vector<8x384xf32> -> vector<8x384xf32>
    %c1_i32_58 = arith.constant 1 : i32
    %63 = tpu.dynamic_rotate %58 by %c1_i32_58 dim 1 : vector<8x384xf32>, i32 -> vector<8x384xf32>
    %64 = arith.addf %63, %60 : vector<8x384xf32>
    %c383_i32_59 = arith.constant 383 : i32
    %65 = tpu.dynamic_rotate %62 by %c383_i32_59 dim 1 : vector<8x384xf32>, i32 -> vector<8x384xf32>
    %66 = arith.addf %64, %65 : vector<8x384xf32>
    %cst_60 = arith.constant 0.000000e+00 : f32
    %67 = vector.broadcast %cst_60 : f32 to vector<8x384xf32>
    %68 = arith.cmpf oge, %66, %67 : vector<8x384xf32>
    %cst_61 = arith.constant 2.000000e-01 : f32
    %69 = vector.broadcast %cst_61 : f32 to vector<8x384xf32>
    %70 = arith.mulf %69, %66 : vector<8x384xf32>
    %71 = arith.select %68, %66, %70 : vector<8x384xi1>, vector<8x384xf32>
    %72 = vector.broadcast %0 : vector<1x384xf32> to vector<8x384xf32>
    %73 = arith.mulf %71, %72 : vector<8x384xf32>
    %c18_i32_62 = arith.constant 18 : i32
    %74 = tpu.dynamic_rotate %73 by %c18_i32_62 dim 1 : vector<8x384xf32>, i32 -> vector<8x384xf32>
    %c80 = arith.constant 80 : index
    %c0_63 = arith.constant 0 : index
    %75 = vector.load %arg5[%c80, %c0_63] : memref<128x384xf32, #tpu.memory_space<vmem>>, vector<8x384xf32>
    tpu.vector_store %arg5[%c80, %c0_63], %74 {strides = array<i32>} : memref<128x384xf32, #tpu.memory_space<vmem>>, vector<8x384xf32>,
    %c88 = arith.constant 88 : index
    %c0_64 = arith.constant 0 : index
    %76 = vector.load %arg5[%c88, %c0_64] : memref<128x384xf32, #tpu.memory_space<vmem>>, vector<8x384xf32>
    tpu.vector_store %arg5[%c88, %c0_64], %73 {strides = array<i32>} : memref<128x384xf32, #tpu.memory_space<vmem>>, vector<8x384xf32>,
    %c366_i32_65 = arith.constant 366 : i32
    %77 = tpu.dynamic_rotate %73 by %c366_i32_65 dim 1 : vector<8x384xf32>, i32 -> vector<8x384xf32>
    %c96 = arith.constant 96 : index
    %c0_66 = arith.constant 0 : index
    %78 = vector.load %arg5[%c96, %c0_66] : memref<128x384xf32, #tpu.memory_space<vmem>>, vector<8x384xf32>
    tpu.vector_store %arg5[%c96, %c0_66], %77 {strides = array<i32>} : memref<128x384xf32, #tpu.memory_space<vmem>>, vector<8x384xf32>,
    %c0_67 = arith.constant 0 : index
    %c0_68 = arith.constant 0 : index
    %79 = vector.load %arg5[%c0_67, %c0_68] : memref<128x384xf32, #tpu.memory_space<vmem>>, vector<104x384xf32>
    %c72_69 = arith.constant 72 : index
    %c0_70 = arith.constant 0 : index
    %80 = vector.load %arg2[%c72_69, %c0_70] : memref<360x128xf32, #tpu.memory_space<vmem>>, vector<8x104xf32>
    %cst_71 = arith.constant dense<0.000000e+00> : vector<8x384xf32>
    %81 = tpu.matmul %80, %79, %cst_71 {dimension_numbers = #tpu.dot_dimension_numbers<[1], [0], [0], [1], [0, 0, 1, 1], [], []>} : vector<8x104xf32>, vector<104x384xf32>, vector<8x384xf32> -> vector<8x384xf32>
    %c80_72 = arith.constant 80 : index
    %c0_73 = arith.constant 0 : index
    %82 = vector.load %arg2[%c80_72, %c0_73] : memref<360x128xf32, #tpu.memory_space<vmem>>, vector<8x104xf32>
    %cst_74 = arith.constant dense<0.000000e+00> : vector<8x384xf32>
    %83 = tpu.matmul %82, %79, %cst_74 {dimension_numbers = #tpu.dot_dimension_numbers<[1], [0], [0], [1], [0, 0, 1, 1], [], []>} : vector<8x104xf32>, vector<104x384xf32>, vector<8x384xf32> -> vector<8x384xf32>
    %c88_75 = arith.constant 88 : index
    %c0_76 = arith.constant 0 : index
    %84 = vector.load %arg2[%c88_75, %c0_76] : memref<360x128xf32, #tpu.memory_space<vmem>>, vector<8x104xf32>
    %cst_77 = arith.constant dense<0.000000e+00> : vector<8x384xf32>
    %85 = tpu.matmul %84, %79, %cst_77 {dimension_numbers = #tpu.dot_dimension_numbers<[1], [0], [0], [1], [0, 0, 1, 1], [], []>} : vector<8x104xf32>, vector<104x384xf32>, vector<8x384xf32> -> vector<8x384xf32>
    %c1_i32_78 = arith.constant 1 : i32
    %86 = tpu.dynamic_rotate %81 by %c1_i32_78 dim 1 : vector<8x384xf32>, i32 -> vector<8x384xf32>
    %87 = arith.addf %86, %83 : vector<8x384xf32>
    %c383_i32_79 = arith.constant 383 : i32
    %88 = tpu.dynamic_rotate %85 by %c383_i32_79 dim 1 : vector<8x384xf32>, i32 -> vector<8x384xf32>
    %89 = arith.addf %87, %88 : vector<8x384xf32>
    %cst_80 = arith.constant 0.000000e+00 : f32
    %90 = vector.broadcast %cst_80 : f32 to vector<8x384xf32>
    %91 = arith.cmpf oge, %89, %90 : vector<8x384xf32>
    %cst_81 = arith.constant 2.000000e-01 : f32
    %92 = vector.broadcast %cst_81 : f32 to vector<8x384xf32>
    %93 = arith.mulf %92, %89 : vector<8x384xf32>
    %94 = arith.select %91, %89, %93 : vector<8x384xi1>, vector<8x384xf32>
    %95 = vector.broadcast %0 : vector<1x384xf32> to vector<8x384xf32>
    %96 = arith.mulf %94, %95 : vector<8x384xf32>
    %c18_i32_82 = arith.constant 18 : i32
    %97 = tpu.dynamic_rotate %96 by %c18_i32_82 dim 1 : vector<8x384xf32>, i32 -> vector<8x384xf32>
    %c104 = arith.constant 104 : index
    %c0_83 = arith.constant 0 : index
    %98 = vector.load %arg5[%c104, %c0_83] : memref<128x384xf32, #tpu.memory_space<vmem>>, vector<8x384xf32>
    tpu.vector_store %arg5[%c104, %c0_83], %97 {strides = array<i32>} : memref<128x384xf32, #tpu.memory_space<vmem>>, vector<8x384xf32>,
    %c112 = arith.constant 112 : index
    %c0_84 = arith.constant 0 : index
    %99 = vector.load %arg5[%c112, %c0_84] : memref<128x384xf32, #tpu.memory_space<vmem>>, vector<8x384xf32>
    tpu.vector_store %arg5[%c112, %c0_84], %96 {strides = array<i32>} : memref<128x384xf32, #tpu.memory_space<vmem>>, vector<8x384xf32>,
    %c366_i32_85 = arith.constant 366 : i32
    %100 = tpu.dynamic_rotate %96 by %c366_i32_85 dim 1 : vector<8x384xf32>, i32 -> vector<8x384xf32>
    %c120 = arith.constant 120 : index
    %c0_86 = arith.constant 0 : index
    %101 = vector.load %arg5[%c120, %c0_86] : memref<128x384xf32, #tpu.memory_space<vmem>>, vector<8x384xf32>
    tpu.vector_store %arg5[%c120, %c0_86], %100 {strides = array<i32>} : memref<128x384xf32, #tpu.memory_space<vmem>>, vector<8x384xf32>,
    %c0_87 = arith.constant 0 : index
    %c0_88 = arith.constant 0 : index
    %102 = vector.load %arg5[%c0_87, %c0_88] : memref<128x384xf32, #tpu.memory_space<vmem>>, vector<128x384xf32>
    %c96_89 = arith.constant 96 : index
    %c0_90 = arith.constant 0 : index
    %103 = vector.load %arg2[%c96_89, %c0_90] : memref<360x128xf32, #tpu.memory_space<vmem>>, vector<8x128xf32>
    %cst_91 = arith.constant dense<0.000000e+00> : vector<8x384xf32>
    %104 = tpu.matmul %103, %102, %cst_91 {dimension_numbers = #tpu.dot_dimension_numbers<[1], [0], [0], [1], [0, 0, 1, 1], [], []>} : vector<8x128xf32>, vector<128x384xf32>, vector<8x384xf32> -> vector<8x384xf32>
    %c104_92 = arith.constant 104 : index
    %c0_93 = arith.constant 0 : index
    %105 = vector.load %arg2[%c104_92, %c0_93] : memref<360x128xf32, #tpu.memory_space<vmem>>, vector<8x128xf32>
    %cst_94 = arith.constant dense<0.000000e+00> : vector<8x384xf32>
    %106 = tpu.matmul %105, %102, %cst_94 {dimension_numbers = #tpu.dot_dimension_numbers<[1], [0], [0], [1], [0, 0, 1, 1], [], []>} : vector<8x128xf32>, vector<128x384xf32>, vector<8x384xf32> -> vector<8x384xf32>
    %c112_95 = arith.constant 112 : index
    %c0_96 = arith.constant 0 : index
    %107 = vector.load %arg2[%c112_95, %c0_96] : memref<360x128xf32, #tpu.memory_space<vmem>>, vector<8x128xf32>
    %cst_97 = arith.constant dense<0.000000e+00> : vector<8x384xf32>
    %108 = tpu.matmul %107, %102, %cst_97 {dimension_numbers = #tpu.dot_dimension_numbers<[1], [0], [0], [1], [0, 0, 1, 1], [], []>} : vector<8x128xf32>, vector<128x384xf32>, vector<8x384xf32> -> vector<8x384xf32>
    %c1_i32_98 = arith.constant 1 : i32
    %109 = tpu.dynamic_rotate %104 by %c1_i32_98 dim 1 : vector<8x384xf32>, i32 -> vector<8x384xf32>
    %110 = arith.addf %109, %106 : vector<8x384xf32>
    %c383_i32_99 = arith.constant 383 : i32
    %111 = tpu.dynamic_rotate %108 by %c383_i32_99 dim 1 : vector<8x384xf32>, i32 -> vector<8x384xf32>
    %112 = arith.addf %110, %111 : vector<8x384xf32>
    %cst_100 = arith.constant 0.000000e+00 : f32
    %113 = vector.broadcast %cst_100 : f32 to vector<8x384xf32>
    %114 = arith.cmpf oge, %112, %113 : vector<8x384xf32>
    %cst_101 = arith.constant 2.000000e-01 : f32
    %115 = vector.broadcast %cst_101 : f32 to vector<8x384xf32>
    %116 = arith.mulf %115, %112 : vector<8x384xf32>
    %117 = arith.select %114, %112, %116 : vector<8x384xi1>, vector<8x384xf32>
    %118 = vector.broadcast %0 : vector<1x384xf32> to vector<8x384xf32>
    %119 = arith.mulf %117, %118 : vector<8x384xf32>
    %cst_102 = arith.constant 2.000000e-01 : f32
    %120 = vector.broadcast %cst_102 : f32 to vector<8x384xf32>
    %121 = arith.mulf %119, %120 : vector<8x384xf32>
    %122 = arith.addf %121, %4 : vector<8x384xf32>
    %c18_i32_103 = arith.constant 18 : i32
    %123 = tpu.dynamic_rotate %122 by %c18_i32_103 dim 1 : vector<8x384xf32>, i32 -> vector<8x384xf32>
    %c8_104 = arith.constant 8 : index
    %c0_105 = arith.constant 0 : index
    %124 = vector.load %arg5[%c8_104, %c0_105] : memref<128x384xf32, #tpu.memory_space<vmem>>, vector<8x384xf32>
    tpu.vector_store %arg5[%c8_104, %c0_105], %123 {strides = array<i32>} : memref<128x384xf32, #tpu.memory_space<vmem>>, vector<8x384xf32>,
    %c16_106 = arith.constant 16 : index
    %c0_107 = arith.constant 0 : index
    %125 = vector.load %arg5[%c16_106, %c0_107] : memref<128x384xf32, #tpu.memory_space<vmem>>, vector<8x384xf32>
    tpu.vector_store %arg5[%c16_106, %c0_107], %122 {strides = array<i32>} : memref<128x384xf32, #tpu.memory_space<vmem>>, vector<8x384xf32>,
    %c366_i32_108 = arith.constant 366 : i32
    %126 = tpu.dynamic_rotate %122 by %c366_i32_108 dim 1 : vector<8x384xf32>, i32 -> vector<8x384xf32>
    %c24_109 = arith.constant 24 : index
    %c0_110 = arith.constant 0 : index
    %127 = vector.load %arg5[%c24_109, %c0_110] : memref<128x384xf32, #tpu.memory_space<vmem>>, vector<8x384xf32>
    tpu.vector_store %arg5[%c24_109, %c0_110], %126 {strides = array<i32>} : memref<128x384xf32, #tpu.memory_space<vmem>>, vector<8x384xf32>,
    %c0_111 = arith.constant 0 : index
    %c0_112 = arith.constant 0 : index
    %128 = vector.load %arg5[%c0_111, %c0_112] : memref<128x384xf32, #tpu.memory_space<vmem>>, vector<32x384xf32>
    %c120_113 = arith.constant 120 : index
    %c0_114 = arith.constant 0 : index
    %129 = vector.load %arg2[%c120_113, %c0_114] : memref<360x128xf32, #tpu.memory_space<vmem>>, vector<8x32xf32>
    %cst_115 = arith.constant dense<0.000000e+00> : vector<8x384xf32>
    %130 = tpu.matmul %129, %128, %cst_115 {dimension_numbers = #tpu.dot_dimension_numbers<[1], [0], [0], [1], [0, 0, 1, 1], [], []>} : vector<8x32xf32>, vector<32x384xf32>, vector<8x384xf32> -> vector<8x384xf32>
    %c128 = arith.constant 128 : index
    %c0_116 = arith.constant 0 : index
    %131 = vector.load %arg2[%c128, %c0_116] : memref<360x128xf32, #tpu.memory_space<vmem>>, vector<8x32xf32>
    %cst_117 = arith.constant dense<0.000000e+00> : vector<8x384xf32>
    %132 = tpu.matmul %131, %128, %cst_117 {dimension_numbers = #tpu.dot_dimension_numbers<[1], [0], [0], [1], [0, 0, 1, 1], [], []>} : vector<8x32xf32>, vector<32x384xf32>, vector<8x384xf32> -> vector<8x384xf32>
    %c136 = arith.constant 136 : index
    %c0_118 = arith.constant 0 : index
    %133 = vector.load %arg2[%c136, %c0_118] : memref<360x128xf32, #tpu.memory_space<vmem>>, vector<8x32xf32>
    %cst_119 = arith.constant dense<0.000000e+00> : vector<8x384xf32>
    %134 = tpu.matmul %133, %128, %cst_119 {dimension_numbers = #tpu.dot_dimension_numbers<[1], [0], [0], [1], [0, 0, 1, 1], [], []>} : vector<8x32xf32>, vector<32x384xf32>, vector<8x384xf32> -> vector<8x384xf32>
    %c1_i32_120 = arith.constant 1 : i32
    %135 = tpu.dynamic_rotate %130 by %c1_i32_120 dim 1 : vector<8x384xf32>, i32 -> vector<8x384xf32>
    %136 = arith.addf %135, %132 : vector<8x384xf32>
    %c383_i32_121 = arith.constant 383 : i32
    %137 = tpu.dynamic_rotate %134 by %c383_i32_121 dim 1 : vector<8x384xf32>, i32 -> vector<8x384xf32>
    %138 = arith.addf %136, %137 : vector<8x384xf32>
    %cst_122 = arith.constant 0.000000e+00 : f32
    %139 = vector.broadcast %cst_122 : f32 to vector<8x384xf32>
    %140 = arith.cmpf oge, %138, %139 : vector<8x384xf32>
    %cst_123 = arith.constant 2.000000e-01 : f32
    %141 = vector.broadcast %cst_123 : f32 to vector<8x384xf32>
    %142 = arith.mulf %141, %138 : vector<8x384xf32>
    %143 = arith.select %140, %138, %142 : vector<8x384xi1>, vector<8x384xf32>
    %144 = vector.broadcast %0 : vector<1x384xf32> to vector<8x384xf32>
    %145 = arith.mulf %143, %144 : vector<8x384xf32>
    %c18_i32_124 = arith.constant 18 : i32
    %146 = tpu.dynamic_rotate %145 by %c18_i32_124 dim 1 : vector<8x384xf32>, i32 -> vector<8x384xf32>
    %c32_125 = arith.constant 32 : index
    %c0_126 = arith.constant 0 : index
    %147 = vector.load %arg5[%c32_125, %c0_126] : memref<128x384xf32, #tpu.memory_space<vmem>>, vector<8x384xf32>
    tpu.vector_store %arg5[%c32_125, %c0_126], %146 {strides = array<i32>} : memref<128x384xf32, #tpu.memory_space<vmem>>, vector<8x384xf32>,
    %c40_127 = arith.constant 40 : index
    %c0_128 = arith.constant 0 : index
    %148 = vector.load %arg5[%c40_127, %c0_128] : memref<128x384xf32, #tpu.memory_space<vmem>>, vector<8x384xf32>
    tpu.vector_store %arg5[%c40_127, %c0_128], %145 {strides = array<i32>} : memref<128x384xf32, #tpu.memory_space<vmem>>, vector<8x384xf32>,
    %c366_i32_129 = arith.constant 366 : i32
    %149 = tpu.dynamic_rotate %145 by %c366_i32_129 dim 1 : vector<8x384xf32>, i32 -> vector<8x384xf32>
    %c48_130 = arith.constant 48 : index
    %c0_131 = arith.constant 0 : index
    %150 = vector.load %arg5[%c48_130, %c0_131] : memref<128x384xf32, #tpu.memory_space<vmem>>, vector<8x384xf32>
    tpu.vector_store %arg5[%c48_130, %c0_131], %149 {strides = array<i32>} : memref<128x384xf32, #tpu.memory_space<vmem>>, vector<8x384xf32>,
    %c0_132 = arith.constant 0 : index
    %c0_133 = arith.constant 0 : index
    %151 = vector.load %arg5[%c0_132, %c0_133] : memref<128x384xf32, #tpu.memory_space<vmem>>, vector<56x384xf32>
    %c144 = arith.constant 144 : index
    %c0_134 = arith.constant 0 : index
    %152 = vector.load %arg2[%c144, %c0_134] : memref<360x128xf32, #tpu.memory_space<vmem>>, vector<8x56xf32>
    %cst_135 = arith.constant dense<0.000000e+00> : vector<8x384xf32>
    %153 = tpu.matmul %152, %151, %cst_135 {dimension_numbers = #tpu.dot_dimension_numbers<[1], [0], [0], [1], [0, 0, 1, 1], [], []>} : vector<8x56xf32>, vector<56x384xf32>, vector<8x384xf32> -> vector<8x384xf32>
    %c152 = arith.constant 152 : index
    %c0_136 = arith.constant 0 : index
    %154 = vector.load %arg2[%c152, %c0_136] : memref<360x128xf32, #tpu.memory_space<vmem>>, vector<8x56xf32>
    %cst_137 = arith.constant dense<0.000000e+00> : vector<8x384xf32>
    %155 = tpu.matmul %154, %151, %cst_137 {dimension_numbers = #tpu.dot_dimension_numbers<[1], [0], [0], [1], [0, 0, 1, 1], [], []>} : vector<8x56xf32>, vector<56x384xf32>, vector<8x384xf32> -> vector<8x384xf32>
    %c160 = arith.constant 160 : index
    %c0_138 = arith.constant 0 : index
    %156 = vector.load %arg2[%c160, %c0_138] : memref<360x128xf32, #tpu.memory_space<vmem>>, vector<8x56xf32>
    %cst_139 = arith.constant dense<0.000000e+00> : vector<8x384xf32>
    %157 = tpu.matmul %156, %151, %cst_139 {dimension_numbers = #tpu.dot_dimension_numbers<[1], [0], [0], [1], [0, 0, 1, 1], [], []>} : vector<8x56xf32>, vector<56x384xf32>, vector<8x384xf32> -> vector<8x384xf32>
    %c1_i32_140 = arith.constant 1 : i32
    %158 = tpu.dynamic_rotate %153 by %c1_i32_140 dim 1 : vector<8x384xf32>, i32 -> vector<8x384xf32>
    %159 = arith.addf %158, %155 : vector<8x384xf32>
    %c383_i32_141 = arith.constant 383 : i32
    %160 = tpu.dynamic_rotate %157 by %c383_i32_141 dim 1 : vector<8x384xf32>, i32 -> vector<8x384xf32>
    %161 = arith.addf %159, %160 : vector<8x384xf32>
    %cst_142 = arith.constant 0.000000e+00 : f32
    %162 = vector.broadcast %cst_142 : f32 to vector<8x384xf32>
    %163 = arith.cmpf oge, %161, %162 : vector<8x384xf32>
    %cst_143 = arith.constant 2.000000e-01 : f32
    %164 = vector.broadcast %cst_143 : f32 to vector<8x384xf32>
    %165 = arith.mulf %164, %161 : vector<8x384xf32>
    %166 = arith.select %163, %161, %165 : vector<8x384xi1>, vector<8x384xf32>
    %167 = vector.broadcast %0 : vector<1x384xf32> to vector<8x384xf32>
    %168 = arith.mulf %166, %167 : vector<8x384xf32>
    %c18_i32_144 = arith.constant 18 : i32
    %169 = tpu.dynamic_rotate %168 by %c18_i32_144 dim 1 : vector<8x384xf32>, i32 -> vector<8x384xf32>
    %c56_145 = arith.constant 56 : index
    %c0_146 = arith.constant 0 : index
    %170 = vector.load %arg5[%c56_145, %c0_146] : memref<128x384xf32, #tpu.memory_space<vmem>>, vector<8x384xf32>
    tpu.vector_store %arg5[%c56_145, %c0_146], %169 {strides = array<i32>} : memref<128x384xf32, #tpu.memory_space<vmem>>, vector<8x384xf32>,
    %c64_147 = arith.constant 64 : index
    %c0_148 = arith.constant 0 : index
    %171 = vector.load %arg5[%c64_147, %c0_148] : memref<128x384xf32, #tpu.memory_space<vmem>>, vector<8x384xf32>
    tpu.vector_store %arg5[%c64_147, %c0_148], %168 {strides = array<i32>} : memref<128x384xf32, #tpu.memory_space<vmem>>, vector<8x384xf32>,
    %c366_i32_149 = arith.constant 366 : i32
    %172 = tpu.dynamic_rotate %168 by %c366_i32_149 dim 1 : vector<8x384xf32>, i32 -> vector<8x384xf32>
    %c72_150 = arith.constant 72 : index
    %c0_151 = arith.constant 0 : index
    %173 = vector.load %arg5[%c72_150, %c0_151] : memref<128x384xf32, #tpu.memory_space<vmem>>, vector<8x384xf32>
    tpu.vector_store %arg5[%c72_150, %c0_151], %172 {strides = array<i32>} : memref<128x384xf32, #tpu.memory_space<vmem>>, vector<8x384xf32>,
    %c0_152 = arith.constant 0 : index
    %c0_153 = arith.constant 0 : index
    %174 = vector.load %arg5[%c0_152, %c0_153] : memref<128x384xf32, #tpu.memory_space<vmem>>, vector<80x384xf32>
    %c168 = arith.constant 168 : index
    %c0_154 = arith.constant 0 : index
    %175 = vector.load %arg2[%c168, %c0_154] : memref<360x128xf32, #tpu.memory_space<vmem>>, vector<8x80xf32>
    %cst_155 = arith.constant dense<0.000000e+00> : vector<8x384xf32>
    %176 = tpu.matmul %175, %174, %cst_155 {dimension_numbers = #tpu.dot_dimension_numbers<[1], [0], [0], [1], [0, 0, 1, 1], [], []>} : vector<8x80xf32>, vector<80x384xf32>, vector<8x384xf32> -> vector<8x384xf32>
    %c176 = arith.constant 176 : index
    %c0_156 = arith.constant 0 : index
    %177 = vector.load %arg2[%c176, %c0_156] : memref<360x128xf32, #tpu.memory_space<vmem>>, vector<8x80xf32>
    %cst_157 = arith.constant dense<0.000000e+00> : vector<8x384xf32>
    %178 = tpu.matmul %177, %174, %cst_157 {dimension_numbers = #tpu.dot_dimension_numbers<[1], [0], [0], [1], [0, 0, 1, 1], [], []>} : vector<8x80xf32>, vector<80x384xf32>, vector<8x384xf32> -> vector<8x384xf32>
    %c184 = arith.constant 184 : index
    %c0_158 = arith.constant 0 : index
    %179 = vector.load %arg2[%c184, %c0_158] : memref<360x128xf32, #tpu.memory_space<vmem>>, vector<8x80xf32>
    %cst_159 = arith.constant dense<0.000000e+00> : vector<8x384xf32>
    %180 = tpu.matmul %179, %174, %cst_159 {dimension_numbers = #tpu.dot_dimension_numbers<[1], [0], [0], [1], [0, 0, 1, 1], [], []>} : vector<8x80xf32>, vector<80x384xf32>, vector<8x384xf32> -> vector<8x384xf32>
    %c1_i32_160 = arith.constant 1 : i32
    %181 = tpu.dynamic_rotate %176 by %c1_i32_160 dim 1 : vector<8x384xf32>, i32 -> vector<8x384xf32>
    %182 = arith.addf %181, %178 : vector<8x384xf32>
    %c383_i32_161 = arith.constant 383 : i32
    %183 = tpu.dynamic_rotate %180 by %c383_i32_161 dim 1 : vector<8x384xf32>, i32 -> vector<8x384xf32>
    %184 = arith.addf %182, %183 : vector<8x384xf32>
    %cst_162 = arith.constant 0.000000e+00 : f32
    %185 = vector.broadcast %cst_162 : f32 to vector<8x384xf32>
    %186 = arith.cmpf oge, %184, %185 : vector<8x384xf32>
    %cst_163 = arith.constant 2.000000e-01 : f32
    %187 = vector.broadcast %cst_163 : f32 to vector<8x384xf32>
    %188 = arith.mulf %187, %184 : vector<8x384xf32>
    %189 = arith.select %186, %184, %188 : vector<8x384xi1>, vector<8x384xf32>
    %190 = vector.broadcast %0 : vector<1x384xf32> to vector<8x384xf32>
    %191 = arith.mulf %189, %190 : vector<8x384xf32>
    %c18_i32_164 = arith.constant 18 : i32
    %192 = tpu.dynamic_rotate %191 by %c18_i32_164 dim 1 : vector<8x384xf32>, i32 -> vector<8x384xf32>
    %c80_165 = arith.constant 80 : index
    %c0_166 = arith.constant 0 : index
    %193 = vector.load %arg5[%c80_165, %c0_166] : memref<128x384xf32, #tpu.memory_space<vmem>>, vector<8x384xf32>
    tpu.vector_store %arg5[%c80_165, %c0_166], %192 {strides = array<i32>} : memref<128x384xf32, #tpu.memory_space<vmem>>, vector<8x384xf32>,
    %c88_167 = arith.constant 88 : index
    %c0_168 = arith.constant 0 : index
    %194 = vector.load %arg5[%c88_167, %c0_168] : memref<128x384xf32, #tpu.memory_space<vmem>>, vector<8x384xf32>
    tpu.vector_store %arg5[%c88_167, %c0_168], %191 {strides = array<i32>} : memref<128x384xf32, #tpu.memory_space<vmem>>, vector<8x384xf32>,
    %c366_i32_169 = arith.constant 366 : i32
    %195 = tpu.dynamic_rotate %191 by %c366_i32_169 dim 1 : vector<8x384xf32>, i32 -> vector<8x384xf32>
    %c96_170 = arith.constant 96 : index
    %c0_171 = arith.constant 0 : index
    %196 = vector.load %arg5[%c96_170, %c0_171] : memref<128x384xf32, #tpu.memory_space<vmem>>, vector<8x384xf32>
    tpu.vector_store %arg5[%c96_170, %c0_171], %195 {strides = array<i32>} : memref<128x384xf32, #tpu.memory_space<vmem>>, vector<8x384xf32>,
    %c0_172 = arith.constant 0 : index
    %c0_173 = arith.constant 0 : index
    %197 = vector.load %arg5[%c0_172, %c0_173] : memref<128x384xf32, #tpu.memory_space<vmem>>, vector<104x384xf32>
    %c192 = arith.constant 192 : index
    %c0_174 = arith.constant 0 : index
    %198 = vector.load %arg2[%c192, %c0_174] : memref<360x128xf32, #tpu.memory_space<vmem>>, vector<8x104xf32>
    %cst_175 = arith.constant dense<0.000000e+00> : vector<8x384xf32>
    %199 = tpu.matmul %198, %197, %cst_175 {dimension_numbers = #tpu.dot_dimension_numbers<[1], [0], [0], [1], [0, 0, 1, 1], [], []>} : vector<8x104xf32>, vector<104x384xf32>, vector<8x384xf32> -> vector<8x384xf32>
    %c200 = arith.constant 200 : index
    %c0_176 = arith.constant 0 : index
    %200 = vector.load %arg2[%c200, %c0_176] : memref<360x128xf32, #tpu.memory_space<vmem>>, vector<8x104xf32>
    %cst_177 = arith.constant dense<0.000000e+00> : vector<8x384xf32>
    %201 = tpu.matmul %200, %197, %cst_177 {dimension_numbers = #tpu.dot_dimension_numbers<[1], [0], [0], [1], [0, 0, 1, 1], [], []>} : vector<8x104xf32>, vector<104x384xf32>, vector<8x384xf32> -> vector<8x384xf32>
    %c208 = arith.constant 208 : index
    %c0_178 = arith.constant 0 : index
    %202 = vector.load %arg2[%c208, %c0_178] : memref<360x128xf32, #tpu.memory_space<vmem>>, vector<8x104xf32>
    %cst_179 = arith.constant dense<0.000000e+00> : vector<8x384xf32>
    %203 = tpu.matmul %202, %197, %cst_179 {dimension_numbers = #tpu.dot_dimension_numbers<[1], [0], [0], [1], [0, 0, 1, 1], [], []>} : vector<8x104xf32>, vector<104x384xf32>, vector<8x384xf32> -> vector<8x384xf32>
    %c1_i32_180 = arith.constant 1 : i32
    %204 = tpu.dynamic_rotate %199 by %c1_i32_180 dim 1 : vector<8x384xf32>, i32 -> vector<8x384xf32>
    %205 = arith.addf %204, %201 : vector<8x384xf32>
    %c383_i32_181 = arith.constant 383 : i32
    %206 = tpu.dynamic_rotate %203 by %c383_i32_181 dim 1 : vector<8x384xf32>, i32 -> vector<8x384xf32>
    %207 = arith.addf %205, %206 : vector<8x384xf32>
    %cst_182 = arith.constant 0.000000e+00 : f32
    %208 = vector.broadcast %cst_182 : f32 to vector<8x384xf32>
    %209 = arith.cmpf oge, %207, %208 : vector<8x384xf32>
    %cst_183 = arith.constant 2.000000e-01 : f32
    %210 = vector.broadcast %cst_183 : f32 to vector<8x384xf32>
    %211 = arith.mulf %210, %207 : vector<8x384xf32>
    %212 = arith.select %209, %207, %211 : vector<8x384xi1>, vector<8x384xf32>
    %213 = vector.broadcast %0 : vector<1x384xf32> to vector<8x384xf32>
    %214 = arith.mulf %212, %213 : vector<8x384xf32>
    %c18_i32_184 = arith.constant 18 : i32
    %215 = tpu.dynamic_rotate %214 by %c18_i32_184 dim 1 : vector<8x384xf32>, i32 -> vector<8x384xf32>
    %c104_185 = arith.constant 104 : index
    %c0_186 = arith.constant 0 : index
    %216 = vector.load %arg5[%c104_185, %c0_186] : memref<128x384xf32, #tpu.memory_space<vmem>>, vector<8x384xf32>
    tpu.vector_store %arg5[%c104_185, %c0_186], %215 {strides = array<i32>} : memref<128x384xf32, #tpu.memory_space<vmem>>, vector<8x384xf32>,
    %c112_187 = arith.constant 112 : index
    %c0_188 = arith.constant 0 : index
    %217 = vector.load %arg5[%c112_187, %c0_188] : memref<128x384xf32, #tpu.memory_space<vmem>>, vector<8x384xf32>
    tpu.vector_store %arg5[%c112_187, %c0_188], %214 {strides = array<i32>} : memref<128x384xf32, #tpu.memory_space<vmem>>, vector<8x384xf32>,
    %c366_i32_189 = arith.constant 366 : i32
    %218 = tpu.dynamic_rotate %214 by %c366_i32_189 dim 1 : vector<8x384xf32>, i32 -> vector<8x384xf32>
    %c120_190 = arith.constant 120 : index
    %c0_191 = arith.constant 0 : index
    %219 = vector.load %arg5[%c120_190, %c0_191] : memref<128x384xf32, #tpu.memory_space<vmem>>, vector<8x384xf32>
    tpu.vector_store %arg5[%c120_190, %c0_191], %218 {strides = array<i32>} : memref<128x384xf32, #tpu.memory_space<vmem>>, vector<8x384xf32>,
    %c0_192 = arith.constant 0 : index
    %c0_193 = arith.constant 0 : index
    %220 = vector.load %arg5[%c0_192, %c0_193] : memref<128x384xf32, #tpu.memory_space<vmem>>, vector<128x384xf32>
    %c216 = arith.constant 216 : index
    %c0_194 = arith.constant 0 : index
    %221 = vector.load %arg2[%c216, %c0_194] : memref<360x128xf32, #tpu.memory_space<vmem>>, vector<8x128xf32>
    %cst_195 = arith.constant dense<0.000000e+00> : vector<8x384xf32>
    %222 = tpu.matmul %221, %220, %cst_195 {dimension_numbers = #tpu.dot_dimension_numbers<[1], [0], [0], [1], [0, 0, 1, 1], [], []>} : vector<8x128xf32>, vector<128x384xf32>, vector<8x384xf32> -> vector<8x384xf32>
    %c224 = arith.constant 224 : index
    %c0_196 = arith.constant 0 : index
    %223 = vector.load %arg2[%c224, %c0_196] : memref<360x128xf32, #tpu.memory_space<vmem>>, vector<8x128xf32>
    %cst_197 = arith.constant dense<0.000000e+00> : vector<8x384xf32>
    %224 = tpu.matmul %223, %220, %cst_197 {dimension_numbers = #tpu.dot_dimension_numbers<[1], [0], [0], [1], [0, 0, 1, 1], [], []>} : vector<8x128xf32>, vector<128x384xf32>, vector<8x384xf32> -> vector<8x384xf32>
    %c232 = arith.constant 232 : index
    %c0_198 = arith.constant 0 : index
    %225 = vector.load %arg2[%c232, %c0_198] : memref<360x128xf32, #tpu.memory_space<vmem>>, vector<8x128xf32>
    %cst_199 = arith.constant dense<0.000000e+00> : vector<8x384xf32>
    %226 = tpu.matmul %225, %220, %cst_199 {dimension_numbers = #tpu.dot_dimension_numbers<[1], [0], [0], [1], [0, 0, 1, 1], [], []>} : vector<8x128xf32>, vector<128x384xf32>, vector<8x384xf32> -> vector<8x384xf32>
    %c1_i32_200 = arith.constant 1 : i32
    %227 = tpu.dynamic_rotate %222 by %c1_i32_200 dim 1 : vector<8x384xf32>, i32 -> vector<8x384xf32>
    %228 = arith.addf %227, %224 : vector<8x384xf32>
    %c383_i32_201 = arith.constant 383 : i32
    %229 = tpu.dynamic_rotate %226 by %c383_i32_201 dim 1 : vector<8x384xf32>, i32 -> vector<8x384xf32>
    %230 = arith.addf %228, %229 : vector<8x384xf32>
    %cst_202 = arith.constant 0.000000e+00 : f32
    %231 = vector.broadcast %cst_202 : f32 to vector<8x384xf32>
    %232 = arith.cmpf oge, %230, %231 : vector<8x384xf32>
    %cst_203 = arith.constant 2.000000e-01 : f32
    %233 = vector.broadcast %cst_203 : f32 to vector<8x384xf32>
    %234 = arith.mulf %233, %230 : vector<8x384xf32>
    %235 = arith.select %232, %230, %234 : vector<8x384xi1>, vector<8x384xf32>
    %236 = vector.broadcast %0 : vector<1x384xf32> to vector<8x384xf32>
    %237 = arith.mulf %235, %236 : vector<8x384xf32>
    %cst_204 = arith.constant 2.000000e-01 : f32
    %238 = vector.broadcast %cst_204 : f32 to vector<8x384xf32>
    %239 = arith.mulf %237, %238 : vector<8x384xf32>
    %240 = arith.addf %239, %122 : vector<8x384xf32>
    %c18_i32_205 = arith.constant 18 : i32
    %241 = tpu.dynamic_rotate %240 by %c18_i32_205 dim 1 : vector<8x384xf32>, i32 -> vector<8x384xf32>
    %c8_206 = arith.constant 8 : index
    %c0_207 = arith.constant 0 : index
    %242 = vector.load %arg5[%c8_206, %c0_207] : memref<128x384xf32, #tpu.memory_space<vmem>>, vector<8x384xf32>
    tpu.vector_store %arg5[%c8_206, %c0_207], %241 {strides = array<i32>} : memref<128x384xf32, #tpu.memory_space<vmem>>, vector<8x384xf32>,
    %c16_208 = arith.constant 16 : index
    %c0_209 = arith.constant 0 : index
    %243 = vector.load %arg5[%c16_208, %c0_209] : memref<128x384xf32, #tpu.memory_space<vmem>>, vector<8x384xf32>
    tpu.vector_store %arg5[%c16_208, %c0_209], %240 {strides = array<i32>} : memref<128x384xf32, #tpu.memory_space<vmem>>, vector<8x384xf32>,
    %c366_i32_210 = arith.constant 366 : i32
    %244 = tpu.dynamic_rotate %240 by %c366_i32_210 dim 1 : vector<8x384xf32>, i32 -> vector<8x384xf32>
    %c24_211 = arith.constant 24 : index
    %c0_212 = arith.constant 0 : index
    %245 = vector.load %arg5[%c24_211, %c0_212] : memref<128x384xf32, #tpu.memory_space<vmem>>, vector<8x384xf32>
    tpu.vector_store %arg5[%c24_211, %c0_212], %244 {strides = array<i32>} : memref<128x384xf32, #tpu.memory_space<vmem>>, vector<8x384xf32>,
    %c0_213 = arith.constant 0 : index
    %c0_214 = arith.constant 0 : index
    %246 = vector.load %arg5[%c0_213, %c0_214] : memref<128x384xf32, #tpu.memory_space<vmem>>, vector<32x384xf32>
    %c240 = arith.constant 240 : index
    %c0_215 = arith.constant 0 : index
    %247 = vector.load %arg2[%c240, %c0_215] : memref<360x128xf32, #tpu.memory_space<vmem>>, vector<8x32xf32>
    %cst_216 = arith.constant dense<0.000000e+00> : vector<8x384xf32>
    %248 = tpu.matmul %247, %246, %cst_216 {dimension_numbers = #tpu.dot_dimension_numbers<[1], [0], [0], [1], [0, 0, 1, 1], [], []>} : vector<8x32xf32>, vector<32x384xf32>, vector<8x384xf32> -> vector<8x384xf32>
    %c248 = arith.constant 248 : index
    %c0_217 = arith.constant 0 : index
    %249 = vector.load %arg2[%c248, %c0_217] : memref<360x128xf32, #tpu.memory_space<vmem>>, vector<8x32xf32>
    %cst_218 = arith.constant dense<0.000000e+00> : vector<8x384xf32>
    %250 = tpu.matmul %249, %246, %cst_218 {dimension_numbers = #tpu.dot_dimension_numbers<[1], [0], [0], [1], [0, 0, 1, 1], [], []>} : vector<8x32xf32>, vector<32x384xf32>, vector<8x384xf32> -> vector<8x384xf32>
    %c256 = arith.constant 256 : index
    %c0_219 = arith.constant 0 : index
    %251 = vector.load %arg2[%c256, %c0_219] : memref<360x128xf32, #tpu.memory_space<vmem>>, vector<8x32xf32>
    %cst_220 = arith.constant dense<0.000000e+00> : vector<8x384xf32>
    %252 = tpu.matmul %251, %246, %cst_220 {dimension_numbers = #tpu.dot_dimension_numbers<[1], [0], [0], [1], [0, 0, 1, 1], [], []>} : vector<8x32xf32>, vector<32x384xf32>, vector<8x384xf32> -> vector<8x384xf32>
    %c1_i32_221 = arith.constant 1 : i32
    %253 = tpu.dynamic_rotate %248 by %c1_i32_221 dim 1 : vector<8x384xf32>, i32 -> vector<8x384xf32>
    %254 = arith.addf %253, %250 : vector<8x384xf32>
    %c383_i32_222 = arith.constant 383 : i32
    %255 = tpu.dynamic_rotate %252 by %c383_i32_222 dim 1 : vector<8x384xf32>, i32 -> vector<8x384xf32>
    %256 = arith.addf %254, %255 : vector<8x384xf32>
    %cst_223 = arith.constant 0.000000e+00 : f32
    %257 = vector.broadcast %cst_223 : f32 to vector<8x384xf32>
    %258 = arith.cmpf oge, %256, %257 : vector<8x384xf32>
    %cst_224 = arith.constant 2.000000e-01 : f32
    %259 = vector.broadcast %cst_224 : f32 to vector<8x384xf32>
    %260 = arith.mulf %259, %256 : vector<8x384xf32>
    %261 = arith.select %258, %256, %260 : vector<8x384xi1>, vector<8x384xf32>
    %262 = vector.broadcast %0 : vector<1x384xf32> to vector<8x384xf32>
    %263 = arith.mulf %261, %262 : vector<8x384xf32>
    %c18_i32_225 = arith.constant 18 : i32
    %264 = tpu.dynamic_rotate %263 by %c18_i32_225 dim 1 : vector<8x384xf32>, i32 -> vector<8x384xf32>
    %c32_226 = arith.constant 32 : index
    %c0_227 = arith.constant 0 : index
    %265 = vector.load %arg5[%c32_226, %c0_227] : memref<128x384xf32, #tpu.memory_space<vmem>>, vector<8x384xf32>
    tpu.vector_store %arg5[%c32_226, %c0_227], %264 {strides = array<i32>} : memref<128x384xf32, #tpu.memory_space<vmem>>, vector<8x384xf32>,
    %c40_228 = arith.constant 40 : index
    %c0_229 = arith.constant 0 : index
    %266 = vector.load %arg5[%c40_228, %c0_229] : memref<128x384xf32, #tpu.memory_space<vmem>>, vector<8x384xf32>
    tpu.vector_store %arg5[%c40_228, %c0_229], %263 {strides = array<i32>} : memref<128x384xf32, #tpu.memory_space<vmem>>, vector<8x384xf32>,
    %c366_i32_230 = arith.constant 366 : i32
    %267 = tpu.dynamic_rotate %263 by %c366_i32_230 dim 1 : vector<8x384xf32>, i32 -> vector<8x384xf32>
    %c48_231 = arith.constant 48 : index
    %c0_232 = arith.constant 0 : index
    %268 = vector.load %arg5[%c48_231, %c0_232] : memref<128x384xf32, #tpu.memory_space<vmem>>, vector<8x384xf32>
    tpu.vector_store %arg5[%c48_231, %c0_232], %267 {strides = array<i32>} : memref<128x384xf32, #tpu.memory_space<vmem>>, vector<8x384xf32>,
    %c0_233 = arith.constant 0 : index
    %c0_234 = arith.constant 0 : index
    %269 = vector.load %arg5[%c0_233, %c0_234] : memref<128x384xf32, #tpu.memory_space<vmem>>, vector<56x384xf32>
    %c264 = arith.constant 264 : index
    %c0_235 = arith.constant 0 : index
    %270 = vector.load %arg2[%c264, %c0_235] : memref<360x128xf32, #tpu.memory_space<vmem>>, vector<8x56xf32>
    %cst_236 = arith.constant dense<0.000000e+00> : vector<8x384xf32>
    %271 = tpu.matmul %270, %269, %cst_236 {dimension_numbers = #tpu.dot_dimension_numbers<[1], [0], [0], [1], [0, 0, 1, 1], [], []>} : vector<8x56xf32>, vector<56x384xf32>, vector<8x384xf32> -> vector<8x384xf32>
    %c272 = arith.constant 272 : index
    %c0_237 = arith.constant 0 : index
    %272 = vector.load %arg2[%c272, %c0_237] : memref<360x128xf32, #tpu.memory_space<vmem>>, vector<8x56xf32>
    %cst_238 = arith.constant dense<0.000000e+00> : vector<8x384xf32>
    %273 = tpu.matmul %272, %269, %cst_238 {dimension_numbers = #tpu.dot_dimension_numbers<[1], [0], [0], [1], [0, 0, 1, 1], [], []>} : vector<8x56xf32>, vector<56x384xf32>, vector<8x384xf32> -> vector<8x384xf32>
    %c280 = arith.constant 280 : index
    %c0_239 = arith.constant 0 : index
    %274 = vector.load %arg2[%c280, %c0_239] : memref<360x128xf32, #tpu.memory_space<vmem>>, vector<8x56xf32>
    %cst_240 = arith.constant dense<0.000000e+00> : vector<8x384xf32>
    %275 = tpu.matmul %274, %269, %cst_240 {dimension_numbers = #tpu.dot_dimension_numbers<[1], [0], [0], [1], [0, 0, 1, 1], [], []>} : vector<8x56xf32>, vector<56x384xf32>, vector<8x384xf32> -> vector<8x384xf32>
    %c1_i32_241 = arith.constant 1 : i32
    %276 = tpu.dynamic_rotate %271 by %c1_i32_241 dim 1 : vector<8x384xf32>, i32 -> vector<8x384xf32>
    %277 = arith.addf %276, %273 : vector<8x384xf32>
    %c383_i32_242 = arith.constant 383 : i32
    %278 = tpu.dynamic_rotate %275 by %c383_i32_242 dim 1 : vector<8x384xf32>, i32 -> vector<8x384xf32>
    %279 = arith.addf %277, %278 : vector<8x384xf32>
    %cst_243 = arith.constant 0.000000e+00 : f32
    %280 = vector.broadcast %cst_243 : f32 to vector<8x384xf32>
    %281 = arith.cmpf oge, %279, %280 : vector<8x384xf32>
    %cst_244 = arith.constant 2.000000e-01 : f32
    %282 = vector.broadcast %cst_244 : f32 to vector<8x384xf32>
    %283 = arith.mulf %282, %279 : vector<8x384xf32>
    %284 = arith.select %281, %279, %283 : vector<8x384xi1>, vector<8x384xf32>
    %285 = vector.broadcast %0 : vector<1x384xf32> to vector<8x384xf32>
    %286 = arith.mulf %284, %285 : vector<8x384xf32>
    %c18_i32_245 = arith.constant 18 : i32
    %287 = tpu.dynamic_rotate %286 by %c18_i32_245 dim 1 : vector<8x384xf32>, i32 -> vector<8x384xf32>
    %c56_246 = arith.constant 56 : index
    %c0_247 = arith.constant 0 : index
    %288 = vector.load %arg5[%c56_246, %c0_247] : memref<128x384xf32, #tpu.memory_space<vmem>>, vector<8x384xf32>
    tpu.vector_store %arg5[%c56_246, %c0_247], %287 {strides = array<i32>} : memref<128x384xf32, #tpu.memory_space<vmem>>, vector<8x384xf32>,
    %c64_248 = arith.constant 64 : index
    %c0_249 = arith.constant 0 : index
    %289 = vector.load %arg5[%c64_248, %c0_249] : memref<128x384xf32, #tpu.memory_space<vmem>>, vector<8x384xf32>
    tpu.vector_store %arg5[%c64_248, %c0_249], %286 {strides = array<i32>} : memref<128x384xf32, #tpu.memory_space<vmem>>, vector<8x384xf32>,
    %c366_i32_250 = arith.constant 366 : i32
    %290 = tpu.dynamic_rotate %286 by %c366_i32_250 dim 1 : vector<8x384xf32>, i32 -> vector<8x384xf32>
    %c72_251 = arith.constant 72 : index
    %c0_252 = arith.constant 0 : index
    %291 = vector.load %arg5[%c72_251, %c0_252] : memref<128x384xf32, #tpu.memory_space<vmem>>, vector<8x384xf32>
    tpu.vector_store %arg5[%c72_251, %c0_252], %290 {strides = array<i32>} : memref<128x384xf32, #tpu.memory_space<vmem>>, vector<8x384xf32>,
    %c0_253 = arith.constant 0 : index
    %c0_254 = arith.constant 0 : index
    %292 = vector.load %arg5[%c0_253, %c0_254] : memref<128x384xf32, #tpu.memory_space<vmem>>, vector<80x384xf32>
    %c288 = arith.constant 288 : index
    %c0_255 = arith.constant 0 : index
    %293 = vector.load %arg2[%c288, %c0_255] : memref<360x128xf32, #tpu.memory_space<vmem>>, vector<8x80xf32>
    %cst_256 = arith.constant dense<0.000000e+00> : vector<8x384xf32>
    %294 = tpu.matmul %293, %292, %cst_256 {dimension_numbers = #tpu.dot_dimension_numbers<[1], [0], [0], [1], [0, 0, 1, 1], [], []>} : vector<8x80xf32>, vector<80x384xf32>, vector<8x384xf32> -> vector<8x384xf32>
    %c296 = arith.constant 296 : index
    %c0_257 = arith.constant 0 : index
    %295 = vector.load %arg2[%c296, %c0_257] : memref<360x128xf32, #tpu.memory_space<vmem>>, vector<8x80xf32>
    %cst_258 = arith.constant dense<0.000000e+00> : vector<8x384xf32>
    %296 = tpu.matmul %295, %292, %cst_258 {dimension_numbers = #tpu.dot_dimension_numbers<[1], [0], [0], [1], [0, 0, 1, 1], [], []>} : vector<8x80xf32>, vector<80x384xf32>, vector<8x384xf32> -> vector<8x384xf32>
    %c304 = arith.constant 304 : index
    %c0_259 = arith.constant 0 : index
    %297 = vector.load %arg2[%c304, %c0_259] : memref<360x128xf32, #tpu.memory_space<vmem>>, vector<8x80xf32>
    %cst_260 = arith.constant dense<0.000000e+00> : vector<8x384xf32>
    %298 = tpu.matmul %297, %292, %cst_260 {dimension_numbers = #tpu.dot_dimension_numbers<[1], [0], [0], [1], [0, 0, 1, 1], [], []>} : vector<8x80xf32>, vector<80x384xf32>, vector<8x384xf32> -> vector<8x384xf32>
    %c1_i32_261 = arith.constant 1 : i32
    %299 = tpu.dynamic_rotate %294 by %c1_i32_261 dim 1 : vector<8x384xf32>, i32 -> vector<8x384xf32>
    %300 = arith.addf %299, %296 : vector<8x384xf32>
    %c383_i32_262 = arith.constant 383 : i32
    %301 = tpu.dynamic_rotate %298 by %c383_i32_262 dim 1 : vector<8x384xf32>, i32 -> vector<8x384xf32>
    %302 = arith.addf %300, %301 : vector<8x384xf32>
    %cst_263 = arith.constant 0.000000e+00 : f32
    %303 = vector.broadcast %cst_263 : f32 to vector<8x384xf32>
    %304 = arith.cmpf oge, %302, %303 : vector<8x384xf32>
    %cst_264 = arith.constant 2.000000e-01 : f32
    %305 = vector.broadcast %cst_264 : f32 to vector<8x384xf32>
    %306 = arith.mulf %305, %302 : vector<8x384xf32>
    %307 = arith.select %304, %302, %306 : vector<8x384xi1>, vector<8x384xf32>
    %308 = vector.broadcast %0 : vector<1x384xf32> to vector<8x384xf32>
    %309 = arith.mulf %307, %308 : vector<8x384xf32>
    %c18_i32_265 = arith.constant 18 : i32
    %310 = tpu.dynamic_rotate %309 by %c18_i32_265 dim 1 : vector<8x384xf32>, i32 -> vector<8x384xf32>
    %c80_266 = arith.constant 80 : index
    %c0_267 = arith.constant 0 : index
    %311 = vector.load %arg5[%c80_266, %c0_267] : memref<128x384xf32, #tpu.memory_space<vmem>>, vector<8x384xf32>
    tpu.vector_store %arg5[%c80_266, %c0_267], %310 {strides = array<i32>} : memref<128x384xf32, #tpu.memory_space<vmem>>, vector<8x384xf32>,
    %c88_268 = arith.constant 88 : index
    %c0_269 = arith.constant 0 : index
    %312 = vector.load %arg5[%c88_268, %c0_269] : memref<128x384xf32, #tpu.memory_space<vmem>>, vector<8x384xf32>
    tpu.vector_store %arg5[%c88_268, %c0_269], %309 {strides = array<i32>} : memref<128x384xf32, #tpu.memory_space<vmem>>, vector<8x384xf32>,
    %c366_i32_270 = arith.constant 366 : i32
    %313 = tpu.dynamic_rotate %309 by %c366_i32_270 dim 1 : vector<8x384xf32>, i32 -> vector<8x384xf32>
    %c96_271 = arith.constant 96 : index
    %c0_272 = arith.constant 0 : index
    %314 = vector.load %arg5[%c96_271, %c0_272] : memref<128x384xf32, #tpu.memory_space<vmem>>, vector<8x384xf32>
    tpu.vector_store %arg5[%c96_271, %c0_272], %313 {strides = array<i32>} : memref<128x384xf32, #tpu.memory_space<vmem>>, vector<8x384xf32>,
    %c0_273 = arith.constant 0 : index
    %c0_274 = arith.constant 0 : index
    %315 = vector.load %arg5[%c0_273, %c0_274] : memref<128x384xf32, #tpu.memory_space<vmem>>, vector<104x384xf32>
    %c312 = arith.constant 312 : index
    %c0_275 = arith.constant 0 : index
    %316 = vector.load %arg2[%c312, %c0_275] : memref<360x128xf32, #tpu.memory_space<vmem>>, vector<8x104xf32>
    %cst_276 = arith.constant dense<0.000000e+00> : vector<8x384xf32>
    %317 = tpu.matmul %316, %315, %cst_276 {dimension_numbers = #tpu.dot_dimension_numbers<[1], [0], [0], [1], [0, 0, 1, 1], [], []>} : vector<8x104xf32>, vector<104x384xf32>, vector<8x384xf32> -> vector<8x384xf32>
    %c320 = arith.constant 320 : index
    %c0_277 = arith.constant 0 : index
    %318 = vector.load %arg2[%c320, %c0_277] : memref<360x128xf32, #tpu.memory_space<vmem>>, vector<8x104xf32>
    %cst_278 = arith.constant dense<0.000000e+00> : vector<8x384xf32>
    %319 = tpu.matmul %318, %315, %cst_278 {dimension_numbers = #tpu.dot_dimension_numbers<[1], [0], [0], [1], [0, 0, 1, 1], [], []>} : vector<8x104xf32>, vector<104x384xf32>, vector<8x384xf32> -> vector<8x384xf32>
    %c328 = arith.constant 328 : index
    %c0_279 = arith.constant 0 : index
    %320 = vector.load %arg2[%c328, %c0_279] : memref<360x128xf32, #tpu.memory_space<vmem>>, vector<8x104xf32>
    %cst_280 = arith.constant dense<0.000000e+00> : vector<8x384xf32>
    %321 = tpu.matmul %320, %315, %cst_280 {dimension_numbers = #tpu.dot_dimension_numbers<[1], [0], [0], [1], [0, 0, 1, 1], [], []>} : vector<8x104xf32>, vector<104x384xf32>, vector<8x384xf32> -> vector<8x384xf32>
    %c1_i32_281 = arith.constant 1 : i32
    %322 = tpu.dynamic_rotate %317 by %c1_i32_281 dim 1 : vector<8x384xf32>, i32 -> vector<8x384xf32>
    %323 = arith.addf %322, %319 : vector<8x384xf32>
    %c383_i32_282 = arith.constant 383 : i32
    %324 = tpu.dynamic_rotate %321 by %c383_i32_282 dim 1 : vector<8x384xf32>, i32 -> vector<8x384xf32>
    %325 = arith.addf %323, %324 : vector<8x384xf32>
    %cst_283 = arith.constant 0.000000e+00 : f32
    %326 = vector.broadcast %cst_283 : f32 to vector<8x384xf32>
    %327 = arith.cmpf oge, %325, %326 : vector<8x384xf32>
    %cst_284 = arith.constant 2.000000e-01 : f32
    %328 = vector.broadcast %cst_284 : f32 to vector<8x384xf32>
    %329 = arith.mulf %328, %325 : vector<8x384xf32>
    %330 = arith.select %327, %325, %329 : vector<8x384xi1>, vector<8x384xf32>
    %331 = vector.broadcast %0 : vector<1x384xf32> to vector<8x384xf32>
    %332 = arith.mulf %330, %331 : vector<8x384xf32>
    %c18_i32_285 = arith.constant 18 : i32
    %333 = tpu.dynamic_rotate %332 by %c18_i32_285 dim 1 : vector<8x384xf32>, i32 -> vector<8x384xf32>
    %c104_286 = arith.constant 104 : index
    %c0_287 = arith.constant 0 : index
    %334 = vector.load %arg5[%c104_286, %c0_287] : memref<128x384xf32, #tpu.memory_space<vmem>>, vector<8x384xf32>
    tpu.vector_store %arg5[%c104_286, %c0_287], %333 {strides = array<i32>} : memref<128x384xf32, #tpu.memory_space<vmem>>, vector<8x384xf32>,
    %c112_288 = arith.constant 112 : index
    %c0_289 = arith.constant 0 : index
    %335 = vector.load %arg5[%c112_288, %c0_289] : memref<128x384xf32, #tpu.memory_space<vmem>>, vector<8x384xf32>
    tpu.vector_store %arg5[%c112_288, %c0_289], %332 {strides = array<i32>} : memref<128x384xf32, #tpu.memory_space<vmem>>, vector<8x384xf32>,
    %c366_i32_290 = arith.constant 366 : i32
    %336 = tpu.dynamic_rotate %332 by %c366_i32_290 dim 1 : vector<8x384xf32>, i32 -> vector<8x384xf32>
    %c120_291 = arith.constant 120 : index
    %c0_292 = arith.constant 0 : index
    %337 = vector.load %arg5[%c120_291, %c0_292] : memref<128x384xf32, #tpu.memory_space<vmem>>, vector<8x384xf32>
    tpu.vector_store %arg5[%c120_291, %c0_292], %336 {strides = array<i32>} : memref<128x384xf32, #tpu.memory_space<vmem>>, vector<8x384xf32>,
    %c0_293 = arith.constant 0 : index
    %c0_294 = arith.constant 0 : index
    %338 = vector.load %arg5[%c0_293, %c0_294] : memref<128x384xf32, #tpu.memory_space<vmem>>, vector<128x384xf32>
    %c336 = arith.constant 336 : index
    %c0_295 = arith.constant 0 : index
    %339 = vector.load %arg2[%c336, %c0_295] : memref<360x128xf32, #tpu.memory_space<vmem>>, vector<8x128xf32>
    %cst_296 = arith.constant dense<0.000000e+00> : vector<8x384xf32>
    %340 = tpu.matmul %339, %338, %cst_296 {dimension_numbers = #tpu.dot_dimension_numbers<[1], [0], [0], [1], [0, 0, 1, 1], [], []>} : vector<8x128xf32>, vector<128x384xf32>, vector<8x384xf32> -> vector<8x384xf32>
    %c344 = arith.constant 344 : index
    %c0_297 = arith.constant 0 : index
    %341 = vector.load %arg2[%c344, %c0_297] : memref<360x128xf32, #tpu.memory_space<vmem>>, vector<8x128xf32>
    %cst_298 = arith.constant dense<0.000000e+00> : vector<8x384xf32>
    %342 = tpu.matmul %341, %338, %cst_298 {dimension_numbers = #tpu.dot_dimension_numbers<[1], [0], [0], [1], [0, 0, 1, 1], [], []>} : vector<8x128xf32>, vector<128x384xf32>, vector<8x384xf32> -> vector<8x384xf32>
    %c352 = arith.constant 352 : index
    %c0_299 = arith.constant 0 : index
    %343 = vector.load %arg2[%c352, %c0_299] : memref<360x128xf32, #tpu.memory_space<vmem>>, vector<8x128xf32>
    %cst_300 = arith.constant dense<0.000000e+00> : vector<8x384xf32>
    %344 = tpu.matmul %343, %338, %cst_300 {dimension_numbers = #tpu.dot_dimension_numbers<[1], [0], [0], [1], [0, 0, 1, 1], [], []>} : vector<8x128xf32>, vector<128x384xf32>, vector<8x384xf32> -> vector<8x384xf32>
    %c1_i32_301 = arith.constant 1 : i32
    %345 = tpu.dynamic_rotate %340 by %c1_i32_301 dim 1 : vector<8x384xf32>, i32 -> vector<8x384xf32>
    %346 = arith.addf %345, %342 : vector<8x384xf32>
    %c383_i32_302 = arith.constant 383 : i32
    %347 = tpu.dynamic_rotate %344 by %c383_i32_302 dim 1 : vector<8x384xf32>, i32 -> vector<8x384xf32>
    %348 = arith.addf %346, %347 : vector<8x384xf32>
    %cst_303 = arith.constant 0.000000e+00 : f32
    %349 = vector.broadcast %cst_303 : f32 to vector<8x384xf32>
    %350 = arith.cmpf oge, %348, %349 : vector<8x384xf32>
    %cst_304 = arith.constant 2.000000e-01 : f32
    %351 = vector.broadcast %cst_304 : f32 to vector<8x384xf32>
    %352 = arith.mulf %351, %348 : vector<8x384xf32>
    %353 = arith.select %350, %348, %352 : vector<8x384xi1>, vector<8x384xf32>
    %354 = vector.broadcast %0 : vector<1x384xf32> to vector<8x384xf32>
    %355 = arith.mulf %353, %354 : vector<8x384xf32>
    %cst_305 = arith.constant 2.000000e-01 : f32
    %356 = vector.broadcast %cst_305 : f32 to vector<8x384xf32>
    %357 = arith.mulf %355, %356 : vector<8x384xf32>
    %358 = arith.addf %357, %240 : vector<8x384xf32>
    %cst_306 = arith.constant 2.000000e-01 : f32
    %359 = vector.broadcast %cst_306 : f32 to vector<8x384xf32>
    %360 = arith.mulf %358, %359 : vector<8x384xf32>
    %361 = arith.addf %360, %4 : vector<8x384xf32>
    %c0_307 = arith.constant 0 : index
    %c0_308 = arith.constant 0 : index
    %c0_309 = arith.constant 0 : index
    %362 = vector.load %arg4[%c0_307, %c0_308, %c0_309] : memref<1x8x384xf32, #tpu.memory_space<vmem>>, vector<1x8x384xf32>
    %363 = vector.shape_cast %362 : vector<1x8x384xf32> to vector<8x384xf32>
    %364 = vector.shape_cast %361 : vector<8x384xf32> to vector<1x8x384xf32>
    tpu.vector_store %arg4[%c0_307, %c0_308, %c0_309], %364 {strides = array<i32>} : memref<1x8x384xf32, #tpu.memory_space<vmem>>, vector<1x8x384xf32>,
    return
  }
  func.func @transform_0(%arg0: i32) -> (i32, i32, i32) {
    %c0_i32 = arith.constant 0 : i32
    %c0_i32_0 = arith.constant 0 : i32
    %c0_i32_1 = arith.constant 0 : i32
    return %arg0, %c0_i32, %c0_i32_0 : i32, i32, i32
  }
  func.func @transform_1(%arg0: i32) -> (i32, i32) {
    %c0_i32 = arith.constant 0 : i32
    %c0_i32_0 = arith.constant 0 : i32
    %c0_i32_1 = arith.constant 0 : i32
    return %c0_i32, %c0_i32_0 : i32, i32
  }
  func.func @transform_2(%arg0: i32) -> (i32, i32) {
    %c0_i32 = arith.constant 0 : i32
    %c0_i32_0 = arith.constant 0 : i32
    %c0_i32_1 = arith.constant 0 : i32
    return %c0_i32, %c0_i32_0 : i32, i32
  }
  func.func @transform_3(%arg0: i32) -> (i32, i32, i32) {
    %c0_i32 = arith.constant 0 : i32
    %c0_i32_0 = arith.constant 0 : i32
    %c0_i32_1 = arith.constant 0 : i32
    return %arg0, %c0_i32, %c0_i32_0 : i32, i32, i32
  }
}

</mosaic_0001>

<bundles_post_ra>
// kernel: rrdb_forward.1
= control target key start
LH: loop header
LB: loop body
LE: loop exit
PB: predicated region body
PF: predicated region fallthrough
CT: control target
= control target key end

     0   :  { %s11481_s12 = smov 0   ;;  %s13615_s0 = inlined_call_operand.vmem [shape: f32[2,8,384], index: 0, kind: input, shape index: {}]   ;;  %s13616_s1 = inlined_call_operand.vmem [shape: f32[360,128], index: 1, kind: input, shape index: {}]   ;;  %s13617_s2 = inlined_call_operand.vmem [shape: f32[1,384], index: 2, kind: input, shape index: {}]   ;;  %s13618_s3 = inlined_call_operand.vmem [shape: f32[2,8,384], index: 3, kind: output, shape index: {}]  }
   0x1 LB: > { %s8179_s13 = sadd.s32 4294967295, %s11451_s12   ;;  %p8183_p0 = scmp.ge.s32.totalorder %s11451_s12, 1  ;;  %s11451_s12 = sphi %s11481_s12, %s13_s12  }
   0x2   : > { %p137_p1 = scmp.lt.s32.totalorder %s11451_s12, 3 }
   0x4   : > { %p138_p2 = pnand %p8183_p0, %p137_p1 }
   0x5   : > { %p161_p3 = scmp.lt.s32.totalorder (!%p138_p2), %s8179_s13, 1  ;;  %v11453_v0 = vmov (!%p138_p2), 0.0|0.0   ;;  %s11454_s18 = smov (!%p138_p2), 18   ;;  %v11456_v6 = vmov (!%p138_p2), 0.0   ;;  %vm11457_vm0 = vmmov (!%p138_p2), 0   ;;  %v184_v7 = vlaneseq (!%p138_p2)  ;;  %v221_v30 = vld [vmem:[%s13616_s1] sm:$0xff] (!%p138_p2) }
   0x6   : > { %141 = sbr.rel (%p138_p2) target bundleno = 7672 (0x1df8), region = 32  ;;  %9798 = vmatprep.subr.bf16.mxu1 (!%p138_p2), %v11453_v0  ;;  %s11455_s19 = smov (!%p138_p2), 110   ;;  %290 = vmatprep.mubr.f32.mxu0 (!%p138_p2), %v11456_v6  ;;  %v11458_v17 = vmov (!%p138_p2), 1.0   ;;  %vm222_vm3 = vcmask (!%p138_p2), 261120   ;;  %v367_v31 = vld [vmem:[%s13616_s1 + $0x8] sm:$0xff] (!%p138_p2)  ;;  %v512_v32 = vld [vmem:[%s13616_s1 + $0x10] sm:$0xff] (!%p138_p2) }
   0x7   : > { %8763 = vmatprep.mubr.msk.f32.mxu1 (!%p138_p2), %vm11457_vm0, %v11456_v6  ;;  %v11511_v8 = vand.u32 (!%p138_p2), 127, %v184_v7  ;;  %s11459_s26 = smov (!%p138_p2), 1   ;;  %s11460_s27 = smov (!%p138_p2), 127   ;;  %v694_v49 = vshrl.u32 (!%p138_p2), %v184_v7, 7  ;;  %v171_v63 = vld [vmem:[%s13617_s2] sm:$0x7] (!%p138_p2) }
   0x8   : > { %vm760_vm9 = vcmask (!%p138_p2), 457728   ;;  %vm1289_vm13 = vcmask (!%p138_p2), 654336  }
   0x9   : > { %vm186_vm1 = vcmp.lt.s32.totalorder (!%p138_p2), %v11511_v8, 18  ;;  %vm202_vm2 = vcmp.lt.s32.totalorder (!%p138_p2), %v11511_v8, 110  ;;  %vm663_vm4 = vcmp.lt.s32.totalorder (!%p138_p2), %v11511_v8, 1  ;;  %vm676_vm5 = vcmp.lt.s32.totalorder (!%p138_p2), %v11511_v8, 127 }
   0xa   : > { %v703_v57 = vsub.s32 (!%p138_p2), 2, %v694_v49  ;;  %v695_v58 = vsub.s32 (!%p138_p2), 0, %v694_v49  ;;  %v699_v59 = vsub.s32 (!%p138_p2), 1, %v694_v49 }
   0xd   : > { %s13620_s13 = smov (!%p161_p3, %s8179_s13), 1 }
   0xe   : > { %s11302_s14 = smul.u32 24, %s13620_s13 }
  0x10   : > { %s11498_s17 = scalar_lea.vmem %s13615_s0, %s11302_s14  ;;  %s170_s9 = scalar_lea.vmem %s13618_s3, %s11302_s14 }
  0x11   : > { %v175_v1 = vld [vmem:[%s11498_s17] sm:$0xff]  ;;  %v176_v2 = vld [vmem:[%s11498_s17 + $0x8] sm:$0xff]  ;;  %v177_v3 = vld [vmem:[%s11498_s17 + $0x10] sm:$0xff] }
  0x12   : > { %v11319_v4 = vpack.i.bf16 %v176_v2, %v175_v1  ;;  %v11324_v5 = vpack.i.bf16 %v177_v3, %v176_v2 }
  0x14   : > { %11320 = vrot.lane.b32.xlu0 %v11319_v4, %s11454_s18  ;;  %11325 = vrot.lane.b32.xlu1 %v11324_v5, %s11455_s19 }
  0x18   : > { %182 = vrot.lane.b32.xlu0 %v177_v3, %s11454_s18  ;;  %196 = vrot.lane.b32.xlu1 %v175_v1, %s11455_s19 }
  0x86   : > { %v11321_v9 = vpop.permute.xlu0 %11320  ;;  %v11326_v10 = vpop.permute.xlu1 %11325 }
  0x87   : > { %v11323_v11 = vunpack.i.h.bf16 %v11321_v9  ;;  %v11322_v12 = vunpack.i.l.bf16 %v11321_v9  ;;  %v11328_v13 = vunpack.i.h.bf16 %v11326_v10  ;;  %v11327_v14 = vunpack.i.l.bf16 %v11326_v10 }
  0x88   : > { %v11622_v9 = vrot.slane %v171_v63, %v703_v57  ;;  %v11624_v10 = vrot.slane %v171_v63, %v695_v58 }
  0x89   : > { %v188_v15 = vsel %vm186_vm1, %v11322_v12, %v11323_v11  ;;  %v203_v16 = vsel %vm202_vm2, %v11327_v14, %v11328_v13 }
  0x8a   : > { %v11520_v18 = vpack.c.bf16 %v188_v15, %v11458_v17  ;;  %v183_v19 = vpop.permute.xlu0 %182  ;;  %v197_v20 = vpop.permute.xlu1 %196  ;;  %v11522_v21 = vpack.c.bf16 %v203_v16, %v176_v2 }
  0x8b   : > { %v187_v22 = vsel %vm186_vm1, %v11323_v11, %v183_v19  ;;  %v189_v23 = vsel %vm186_vm1, %v183_v19, %v11322_v12  ;;  %v204_v26 = vsel %vm202_vm2, %v197_v20, %v11327_v14  ;;  %v205_v27 = vsel %vm202_vm2, %v11328_v13, %v197_v20 }
  0x8c   : > { %v11529_v24 = vpack.c.bf16 %v189_v23, %v11458_v17  ;;  %v11532_v25 = vpack.c.bf16 %v187_v22, %v11458_v17  ;;  %9791 = vmatprep.subr.bf16.mxu0 %v11520_v18  ;;  %v11543_v28 = vpack.c.bf16 %v204_v26, %v175_v1  ;;  %v11545_v29 = vpack.c.bf16 %v205_v27, %v177_v3 }
  0x8d   : > { %v11626_v11 = vrot.slane %v171_v63, %v699_v59 }
  0x8e   : > { %9793 = vmatpush1.bf16.msra.mxu0 %v11529_v24  ;;  %9800 = vmatpush3.bf16.msra.mxu1 %v11532_v25 }
  0x8f   : > { %9795 = vmatprep.subr.bf16.mxu0 %v11522_v21  ;;  %9801 = vmatprep.subr.bf16.mxu1 %v11453_v0 }
  0x92   : > { %9797 = vmatpush1.bf16.msra.mxu0 %v11543_v28  ;;  %9803 = vmatpush3.bf16.msra.mxu1 %v11545_v29 }
  0x93   : > { %9805 = vmatprep.subr.bf16.mxu0 %v11520_v18  ;;  %9812 = vmatprep.subr.bf16.mxu1 %v11453_v0 }
  0x95   : > { %8186 = vmatmul.mubr.msk.f32.vlgmr.msra.gmra.mrb[0].mxu0 %vm222_vm3, %v221_v30  ;;  %8764 = vmatmul.mubr.msk.f32.vlgmr.msra.gmra.mrb[0].mxu1 %vm222_vm3, %v221_v30 }
  0x96   : > { %9807 = vmatpush1.bf16.msra.mxu0 %v11529_v24  ;;  %9814 = vmatpush3.bf16.msra.mxu1 %v11532_v25 }
  0x97   : > { %9809 = vmatprep.subr.bf16.mxu0 %v11522_v21  ;;  %9815 = vmatprep.subr.bf16.mxu1 %v11453_v0 }
  0x98   : > { %435 = vmatprep.mubr.f32.mxu0 %v11456_v6  ;;  %8774 = vmatprep.mubr.msk.f32.mxu1 %vm11457_vm0, %v11456_v6 }
  0x9a   : > { %9811 = vmatpush1.bf16.msra.mxu0 %v11543_v28  ;;  %9817 = vmatpush3.bf16.msra.mxu1 %v11545_v29 }
  0x9b   : > { %9819 = vmatprep.subr.bf16.mxu0 %v11520_v18  ;;  %9826 = vmatprep.subr.bf16.mxu1 %v11453_v0 }
  0x9d   : > { %8188 = vmatmul.mubr.msk.f32.vlgmr.msra.gmra.mrb[2].mxu0 %vm222_vm3, %v367_v31  ;;  %8775 = vmatmul.mubr.msk.f32.vlgmr.msra.gmra.mrb[2].mxu1 %vm222_vm3, %v367_v31 }
  0x9e   : > { %9821 = vmatpush1.bf16.msra.mxu0 %v11529_v24  ;;  %9828 = vmatpush3.bf16.msra.mxu1 %v11532_v25 }
  0x9f   : > { %9823 = vmatprep.subr.bf16.mxu0 %v11522_v21  ;;  %9829 = vmatprep.subr.bf16.mxu1 %v11453_v0 }
  0xa0   : > { %580 = vmatprep.mubr.f32.mxu0 %v11456_v6  ;;  %8785 = vmatprep.mubr.msk.f32.mxu1 %vm11457_vm0, %v11456_v6 }
  0xa2   : > { %9825 = vmatpush1.bf16.msra.mxu0 %v11543_v28  ;;  %9831 = vmatpush3.bf16.msra.mxu1 %v11545_v29 }
  0xa3   : > { %9833 = vmatprep.subr.bf16.mxu0 %v11520_v18  ;;  %9844 = vmatprep.subr.bf16.mxu1 %v11453_v0 }
  0xa5   : > { %8190 = vmatmul.mubr.msk.f32.vlgmr.msra.gmra.mrb[4].mxu0 %vm222_vm3, %v512_v32  ;;  %8786 = vmatmul.mubr.msk.f32.vlgmr.msra.gmra.mrb[4].mxu1 %vm222_vm3, %v512_v32 }
  0xa6   : > { %9835 = vmatpush1.bf16.msra.mxu0 %v11529_v24  ;;  %9846 = vmatpush3.bf16.msra.mxu1 %v11532_v25 }
  0xa7   : > { %9837 = vmatprep.subr.bf16.mxu0 %v11522_v21  ;;  %9847 = vmatprep.subr.bf16.mxu1 %v11453_v0 }
  0xa8   : > { %8802 = vmatprep.mubr.msk.f32.mxu1 %vm11457_vm0, %v11456_v6  ;;  %828 = vmatprep.mubr.f32.mxu0 %v11456_v6 }
  0xaa   : > { %9839 = vmatpush1.bf16.msra.mxu0 %v11543_v28  ;;  %9849 = vmatpush3.bf16.msra.mxu1 %v11545_v29 }
  0xab   : > { %9850 = vmatprep.subr.bf16.mxu1 %v11453_v0 }
 0x168   : > { %v292_v33 = vpop.f32.mrb[0].mxu0  ;;  %v363_v34 = vpop.f32.mrb[0].mxu1 }
 0x169   : > { %661 = vrot.lane.b32.xlu0 %v363_v34, %s11459_s26  ;;  %v294_v35 = vpop.f32.mrb[1].mxu0  ;;  %v8765_v36 = vpop.f32.mrb[1].mxu1 }
 0x16a   : > { %659 = vrot.lane.b32.xlu1 %v294_v35, %s11459_s26 }
 0x16d   : > { %657 = vrot.lane.b32.xlu0 %v292_v33, %s11459_s26 }
 0x170   : > { %v437_v37 = vpop.f32.mrb[2].mxu0  ;;  %v508_v38 = vpop.f32.mrb[2].mxu1 }
 0x171   : > { %v439_v39 = vpop.f32.mrb[3].mxu0  ;;  %v8776_v40 = vpop.f32.mrb[3].mxu1 }
 0x178   : > { %v582_v41 = vpop.f32.mrb[4].mxu0  ;;  %v653_v42 = vpop.f32.mrb[4].mxu1 }
 0x179   : > { %670 = vrot.lane.b32.xlu1 %v582_v41, %s11460_s27  ;;  %v584_v43 = vpop.f32.mrb[5].mxu0  ;;  %v8787_v44 = vpop.f32.mrb[5].mxu1  ;;  %v759_v41 = vld [vmem:[%s13616_s1 + $0x18] sm:$0xff] }
 0x17a   : > { %672 = vrot.lane.b32.xlu0 %v584_v43, %s11460_s27  ;;  %v905_v44 = vld [vmem:[%s13616_s1 + $0x20] sm:$0xff] }
 0x17d   : > { %674 = vrot.lane.b32.xlu1 %v653_v42, %s11460_s27 }
 0x1db   : > { %v662_v45 = vpop.permute.xlu0 %661 }
 0x1dc   : > { %v660_v47 = vpop.permute.xlu1 %659 }
 0x1dd   : > { %v664_v51 = vsel %vm663_vm4, %v660_v47, %v662_v45 }
 0x1de   : > { %v669_v60 = vadd.f32 %v664_v51, %v508_v38 }
 0x1df   : > { %v658_v46 = vpop.permute.xlu0 %657 }
 0x1e0   : > { %v666_v48 = vsel %vm663_vm4, %v662_v45, %v658_v46  ;;  %v665_v52 = vsel %vm663_vm4, %v658_v46, %v660_v47  ;;  %v1050_v45 = vld [vmem:[%s13616_s1 + $0x28] sm:$0xff] }
 0x1e1   : > { %v667_v53 = vadd.f32 %v666_v48, %v437_v37  ;;  %v668_v61 = vadd.f32 %v665_v52, %v439_v39 }
 0x1eb   : > { %v671_v50 = vpop.permute.xlu1 %670 }
 0x1ec   : > { %v673_v54 = vpop.permute.xlu0 %672 }
 0x1ed   : > { %v678_v55 = vsel %vm676_vm5, %v671_v50, %v673_v54 }
 0x1ee   : > { %v680_v56 = vadd.f32 %v678_v55, %v667_v53 }
 0x1ef   : > { %v675_v62 = vpop.permute.xlu1 %674 }
 0x1f0   : > { %vm683_vm6 = vcmp.ge.f32.partialorder %v680_v56, 0.0  ;;  %v686_v1 = vmul.f32 0.2, %v680_v56  ;;  %v677_v2 = vsel %vm676_vm5, %v673_v54, %v675_v62  ;;  %v679_v3 = vsel %vm676_vm5, %v675_v62, %v671_v50 }
 0x1f1   : > { %v681_v4 = vadd.f32 %v677_v2, %v668_v61  ;;  %v682_v5 = vadd.f32 %v679_v3, %v669_v60 }
 0x1f2   : > { %v689_v7 = vsel %vm683_vm6, %v680_v56, %v686_v1 }
 0x1f3   : > { %vm684_vm7 = vcmp.ge.f32.partialorder %v681_v4, 0.0  ;;  %v687_v12 = vmul.f32 0.2, %v681_v4  ;;  %v688_v13 = vmul.f32 0.2, %v682_v5  ;;  %vm685_vm8 = vcmp.ge.f32.partialorder %v682_v5, 0.0 }
 0x1f4   : > { %v708_v19 = vmul.f32 %v11624_v10, %v689_v7 }
 0x1f5   : > { %v690_v14 = vsel %vm684_vm7, %v681_v4, %v687_v12  ;;  %v691_v15 = vsel %vm685_vm8, %v682_v5, %v688_v13  ;;  %vm1827_vm7 = vcmask 850944  }
 0x1f6   : > { %v710_v16 = vmul.f32 %v11622_v9, %v691_v15  ;;  %v709_v20 = vmul.f32 %v11626_v11, %v690_v14 }
 0x1f8   : > { %715 = vrot.lane.b32.xlu1 %v710_v16, %s11454_s18  ;;  %v11329_v22 = vpack.i.bf16 %v709_v20, %v708_v19 }
 0x1fa   : > { %11330 = vrot.lane.b32.xlu0 %v11329_v22, %s11454_s18 }
 0x1fc   : > { %730 = vrot.lane.b32.xlu1 %v710_v16, %s11455_s19 }
 0x1fe   : > { %728 = vrot.lane.b32.xlu0 %v709_v20, %s11455_s19 }
 0x202   : > { %726 = vrot.lane.b32.xlu0 %v708_v19, %s11455_s19 }
 0x26a   : > { %v716_v23 = vpop.permute.xlu1 %715 }
 0x26c   : > { %v11331_v26 = vpop.permute.xlu0 %11330 }
 0x26d   : > { %v11333_v27 = vunpack.i.h.bf16 %v11331_v26  ;;  %v11332_v30 = vunpack.i.l.bf16 %v11331_v26 }
 0x26e   : > { %v731_v38 = vpop.permute.xlu1 %730 }
 0x26f   : > { %v717_v31 = vsel %vm186_vm1, %v11333_v27, %v716_v23  ;;  %v718_v32 = vsel %vm186_vm1, %v11332_v30, %v11333_v27  ;;  %v719_v33 = vsel %vm186_vm1, %v716_v23, %v11332_v30 }
 0x270   : > { %v11642_v34 = vpack.c.bf16 %v710_v16, %v717_v31  ;;  %v11644_v35 = vpack.c.bf16 %v709_v20, %v718_v32  ;;  %v11646_v36 = vpack.c.bf16 %v708_v19, %v719_v33  ;;  %v729_v37 = vpop.permute.xlu0 %728 }
 0x271   : > { %v11653_v39 = vsel %vm202_vm2, %v729_v37, %v731_v38 }
 0x272   : > { %9841 = vmatprep.subr.bf16.mxu0 %v11644_v35  ;;  %9852 = vmatpush3.bf16.msra.mxu1 %v11642_v34 }
 0x273   : > { %9843 = vmatpush1.bf16.msra.mxu0 %v11646_v36  ;;  %8800 = vmatprep.subr.mxu1 %v11456_v6 }
 0x274   : > { %v727_v40 = vpop.permute.xlu0 %726  ;;  %776 = vmatprep.subr.mxu0 %v11653_v39 }
 0x275   : > { %v11662_v42 = vsel %vm202_vm2, %v731_v38, %v727_v40  ;;  %v11666_v43 = vsel %vm202_vm2, %v727_v40, %v729_v37 }
 0x276   : > { %8801 = vmatpush3.msra.mxu1 %v11662_v42 }
 0x277   : > { %777 = vmatpush1.msra.mxu0 %v11666_v43  ;;  %8803 = vmatmul.mubr.msk.f32.vlgmr.msra.gmra.mrb[6].mxu1 %vm760_vm9, %v759_v41 }
 0x278   : > { %9865 = vmatprep.subr.bf16.mxu1 %v11453_v0  ;;  %8192 = vmatmul.mubr.msk.f32.vlgmr.msra.gmra.mrb[6].mxu0 %vm760_vm9, %v759_v41 }
 0x279   : > { %9854 = vmatprep.subr.bf16.mxu0 %v11520_v18  ;;  %9867 = vmatpush3.bf16.msra.mxu1 %v11532_v25 }
 0x27a   : > { %9856 = vmatpush1.bf16.msra.mxu0 %v11529_v24  ;;  %9868 = vmatprep.subr.bf16.mxu1 %v11453_v0 }
 0x27b   : > { %9858 = vmatprep.subr.bf16.mxu0 %v11522_v21  ;;  %973 = vmatprep.mubr.f32.mxu0 %v11456_v6 }
 0x27c   : > { %8819 = vmatprep.mubr.msk.f32.mxu1 %vm11457_vm0, %v11456_v6 }
 0x27d   : > { %9870 = vmatpush3.bf16.msra.mxu1 %v11545_v29 }
 0x27e   : > { %9860 = vmatpush1.bf16.msra.mxu0 %v11543_v28  ;;  %9871 = vmatprep.subr.bf16.mxu1 %v11453_v0 }
 0x27f   : > { %9862 = vmatprep.subr.bf16.mxu0 %v11644_v35 }
 0x281   : > { %9873 = vmatpush3.bf16.msra.mxu1 %v11642_v34 }
 0x282   : > { %9864 = vmatpush1.bf16.msra.mxu0 %v11646_v36  ;;  %8817 = vmatprep.subr.mxu1 %v11456_v6 }
 0x283   : > { %921 = vmatprep.subr.mxu0 %v11653_v39 }
 0x285   : > { %8818 = vmatpush3.msra.mxu1 %v11662_v42 }
 0x286   : > { %922 = vmatpush1.msra.mxu0 %v11666_v43  ;;  %9886 = vmatprep.subr.bf16.mxu1 %v11453_v0 }
 0x287   : > { %8194 = vmatmul.mubr.msk.f32.vlgmr.msra.gmra.mrb[8].mxu0 %vm760_vm9, %v905_v44  ;;  %8820 = vmatmul.mubr.msk.f32.vlgmr.msra.gmra.mrb[8].mxu1 %vm760_vm9, %v905_v44 }
 0x288   : > { %9875 = vmatprep.subr.bf16.mxu0 %v11520_v18  ;;  %9888 = vmatpush3.bf16.msra.mxu1 %v11532_v25 }
 0x289   : > { %9877 = vmatpush1.bf16.msra.mxu0 %v11529_v24  ;;  %9889 = vmatprep.subr.bf16.mxu1 %v11453_v0 }
 0x28a   : > { %9879 = vmatprep.subr.bf16.mxu0 %v11522_v21  ;;  %1118 = vmatprep.mubr.f32.mxu0 %v11456_v6 }
 0x28b   : > { %8836 = vmatprep.mubr.msk.f32.mxu1 %vm11457_vm0, %v11456_v6 }
 0x28c   : > { %9891 = vmatpush3.bf16.msra.mxu1 %v11545_v29 }
 0x28d   : > { %9881 = vmatpush1.bf16.msra.mxu0 %v11543_v28  ;;  %9892 = vmatprep.subr.bf16.mxu1 %v11453_v0 }
 0x28e   : > { %9883 = vmatprep.subr.bf16.mxu0 %v11644_v35 }
 0x290   : > { %9894 = vmatpush3.bf16.msra.mxu1 %v11642_v34 }
 0x291   : > { %9885 = vmatpush1.bf16.msra.mxu0 %v11646_v36  ;;  %8834 = vmatprep.subr.mxu1 %v11456_v6 }
 0x292   : > { %1066 = vmatprep.subr.mxu0 %v11653_v39 }
 0x294   : > { %8835 = vmatpush3.msra.mxu1 %v11662_v42 }
 0x295   : > { %1067 = vmatpush1.msra.mxu0 %v11666_v43  ;;  %9915 = vmatprep.subr.bf16.mxu1 %v11453_v0 }
 0x296   : > { %8196 = vmatmul.mubr.msk.f32.vlgmr.msra.gmra.mrb[10].mxu0 %vm760_vm9, %v1050_v45  ;;  %8837 = vmatmul.mubr.msk.f32.vlgmr.msra.gmra.mrb[10].mxu1 %vm760_vm9, %v1050_v45 }
 0x297   : > { %9896 = vmatprep.subr.bf16.mxu0 %v11520_v18  ;;  %9917 = vmatpush3.bf16.msra.mxu1 %v11532_v25 }
 0x298   : > { %9898 = vmatpush1.bf16.msra.mxu0 %v11529_v24  ;;  %9918 = vmatprep.subr.bf16.mxu1 %v11453_v0 }
 0x299   : > { %9900 = vmatprep.subr.bf16.mxu0 %v11522_v21  ;;  %8859 = vmatprep.mubr.msk.f32.mxu1 %vm11457_vm0, %v11456_v6 }
 0x29a   : > { %1357 = vmatprep.mubr.f32.mxu0 %v11456_v6 }
 0x29b   : > { %9920 = vmatpush3.bf16.msra.mxu1 %v11545_v29 }
 0x29c   : > { %9902 = vmatpush1.bf16.msra.mxu0 %v11543_v28  ;;  %9921 = vmatprep.subr.bf16.mxu1 %v11453_v0 }
 0x29d   : > { %9904 = vmatprep.subr.bf16.mxu0 %v11644_v35 }
 0x29f   : > { %9923 = vmatpush3.bf16.msra.mxu1 %v11642_v34 }
 0x2a0   : > { %9906 = vmatpush1.bf16.msra.mxu0 %v11646_v36  ;;  %9924 = vmatprep.subr.bf16.mxu1 %v11453_v0 }
 0x34a   : > { %v901_v46 = vpop.f32.mrb[6].mxu1 }
 0x34b   : > { %1199 = vrot.lane.b32.xlu1 %v901_v46, %s11459_s26  ;;  %v830_v47 = vpop.f32.mrb[6].mxu0  ;;  %v8804_v48 = vpop.f32.mrb[7].mxu1 }
 0x34c   : > { %v832_v49 = vpop.f32.mrb[7].mxu0 }
 0x34d   : > { %1197 = vrot.lane.b32.xlu0 %v832_v49, %s11459_s26 }
 0x34f   : > { %1195 = vrot.lane.b32.xlu1 %v830_v47, %s11459_s26 }
 0x35a   : > { %v975_v50 = vpop.f32.mrb[8].mxu0  ;;  %v1046_v51 = vpop.f32.mrb[8].mxu1 }
 0x35b   : > { %v977_v52 = vpop.f32.mrb[9].mxu0  ;;  %v8821_v53 = vpop.f32.mrb[9].mxu1 }
 0x369   : > { %v1120_v54 = vpop.f32.mrb[10].mxu0  ;;  %v1191_v55 = vpop.f32.mrb[10].mxu1 }
 0x36a   : > { %1207 = vrot.lane.b32.xlu0 %v1120_v54, %s11460_s27  ;;  %v1122_v56 = vpop.f32.mrb[11].mxu0  ;;  %v8838_v57 = vpop.f32.mrb[11].mxu1 }
 0x36b   : > { %1209 = vrot.lane.b32.xlu1 %v1122_v56, %s11460_s27 }
 0x36e   : > { %1211 = vrot.lane.b32.xlu0 %v1191_v55, %s11460_s27 }
 0x3bd   : > { %v1200_v58 = vpop.permute.xlu1 %1199 }
 0x3bf   : > { %v1198_v60 = vpop.permute.xlu0 %1197 }
 0x3c0   : > { %v1201_v63 = vsel %vm663_vm4, %v1198_v60, %v1200_v58 }
 0x3c1   : > { %v1196_v59 = vpop.permute.xlu1 %1195  ;;  %v1206_v7 = vadd.f32 %v1201_v63, %v1046_v51 }
 0x3c2   : > { %v1203_v61 = vsel %vm663_vm4, %v1200_v58, %v1196_v59  ;;  %v1202_v1 = vsel %vm663_vm4, %v1196_v59, %v1198_v60  ;;  %v1288_v59 = vld [vmem:[%s13616_s1 + $0x30] sm:$0xff]  ;;  %v1434_v60 = vld [vmem:[%s13616_s1 + $0x38] sm:$0xff] }
 0x3c3   : > { %v1204_v2 = vadd.f32 %v1203_v61, %v975_v50  ;;  %v1205_v12 = vadd.f32 %v1202_v1, %v977_v52  ;;  %v1579_v61 = vld [vmem:[%s13616_s1 + $0x40] sm:$0xff] }
 0x3dc   : > { %v1208_v62 = vpop.permute.xlu0 %1207 }
 0x3dd   : > { %v1210_v3 = vpop.permute.xlu1 %1209 }
 0x3de   : > { %v1214_v4 = vsel %vm676_vm5, %v1208_v62, %v1210_v3 }
 0x3df   : > { %v1216_v5 = vadd.f32 %v1214_v4, %v1204_v2 }
 0x3e0   : > { %v1212_v13 = vpop.permute.xlu0 %1211 }
 0x3e1   : > { %vm1219_vm10 = vcmp.ge.f32.partialorder %v1216_v5, 0.0  ;;  %v1222_v14 = vmul.f32 0.2, %v1216_v5  ;;  %v1213_v15 = vsel %vm676_vm5, %v1210_v3, %v1212_v13  ;;  %v1215_v16 = vsel %vm676_vm5, %v1212_v13, %v1208_v62 }
 0x3e2   : > { %v1217_v19 = vadd.f32 %v1213_v15, %v1205_v12  ;;  %v1218_v20 = vadd.f32 %v1215_v16, %v1206_v7 }
 0x3e3   : > { %v1225_v22 = vsel %vm1219_vm10, %v1216_v5, %v1222_v14 }
 0x3e4   : > { %vm1220_vm11 = vcmp.ge.f32.partialorder %v1217_v19, 0.0  ;;  %v1223_v23 = vmul.f32 0.2, %v1217_v19  ;;  %v1224_v26 = vmul.f32 0.2, %v1218_v20  ;;  %vm1221_vm12 = vcmp.ge.f32.partialorder %v1218_v20, 0.0 }
 0x3e5   : > { %v1228_v32 = vmul.f32 %v1225_v22, %v11624_v10 }
 0x3e6   : > { %v1226_v27 = vsel %vm1220_vm11, %v1217_v19, %v1223_v23  ;;  %v1227_v30 = vsel %vm1221_vm12, %v1218_v20, %v1224_v26 }
 0x3e7   : > { %v1230_v31 = vmul.f32 %v1227_v30, %v11622_v9  ;;  %v1229_v33 = vmul.f32 %v1226_v27, %v11626_v11 }
 0x3e9   : > { %1235 = vrot.lane.b32.xlu0 %v1230_v31, %s11454_s18  ;;  %v11334_v37 = vpack.i.bf16 %v1229_v33, %v1228_v32  ;;  %v11339_v38 = vpack.i.bf16 %v1230_v31, %v1229_v33 }
 0x3eb   : > { %11335 = vrot.lane.b32.xlu1 %v11334_v37, %s11454_s18 }
 0x3ed   : > { %1246 = vrot.lane.b32.xlu0 %v1228_v32, %s11455_s19 }
 0x3ef   : > { %11340 = vrot.lane.b32.xlu1 %v11339_v38, %s11455_s19 }
 0x45b   : > { %v1236_v40 = vpop.permute.xlu0 %1235 }
 0x45d   : > { %v11336_v41 = vpop.permute.xlu1 %11335 }
 0x45e   : > { %v11338_v44 = vunpack.i.h.bf16 %v11336_v41  ;;  %v11337_v45 = vunpack.i.l.bf16 %v11336_v41 }
 0x45f   : > { %v1247_v55 = vpop.permute.xlu0 %1246 }
 0x460   : > { %v1237_v46 = vsel %vm186_vm1, %v11338_v44, %v1236_v40  ;;  %v1238_v47 = vsel %vm186_vm1, %v11337_v45, %v11338_v44  ;;  %v1239_v48 = vsel %vm186_vm1, %v1236_v40, %v11337_v45 }
 0x461   : > { %v11768_v49 = vpack.c.bf16 %v1237_v46, %v11662_v42  ;;  %v11771_v50 = vpack.c.bf16 %v1238_v47, %v11653_v39  ;;  %v11774_v51 = vpack.c.bf16 %v1239_v48, %v11666_v43  ;;  %v11341_v52 = vpop.permute.xlu1 %11340 }
 0x462   : > { %v11343_v53 = vunpack.i.h.bf16 %v11341_v52  ;;  %v11342_v54 = vunpack.i.l.bf16 %v11341_v52 }
 0x463   : > { %9908 = vmatprep.subr.bf16.mxu0 %v11771_v50  ;;  %9926 = vmatpush3.bf16.msra.mxu1 %v11768_v49 }
 0x464   : > { %v1254_v56 = vsel %vm202_vm2, %v11343_v53, %v1247_v55  ;;  %v1252_v42 = vsel %vm202_vm2, %v11342_v54, %v11343_v53  ;;  %v1253_v39 = vsel %vm202_vm2, %v1247_v55, %v11342_v54  ;;  %9910 = vmatpush1.bf16.msra.mxu0 %v11774_v51  ;;  %9927 = vmatprep.subr.bf16.mxu1 %v11453_v0 }
 0x465   : > { %v11786_v43 = vpack.c.bf16 %v1254_v56, %v1230_v31  ;;  %v11788_v57 = vpack.c.bf16 %v1252_v42, %v1229_v33  ;;  %v11790_v58 = vpack.c.bf16 %v1253_v39, %v1228_v32 }
 0x467   : > { %9912 = vmatprep.subr.bf16.mxu0 %v11788_v57  ;;  %9929 = vmatpush3.bf16.msra.mxu1 %v11786_v43 }
 0x468   : > { %9914 = vmatpush1.bf16.msra.mxu0 %v11790_v58  ;;  %9950 = vmatprep.subr.bf16.mxu1 %v11453_v0 }
 0x469   : > { %9931 = vmatprep.subr.bf16.mxu0 %v11520_v18 }
 0x46a   : > { %8860 = vmatmul.mubr.msk.f32.vlgmr.msra.gmra.mrb[12].mxu1 %vm1289_vm13, %v1288_v59 }
 0x46b   : > { %8198 = vmatmul.mubr.msk.f32.vlgmr.msra.gmra.mrb[12].mxu0 %vm1289_vm13, %v1288_v59  ;;  %9952 = vmatpush3.bf16.msra.mxu1 %v11532_v25 }
 0x46c   : > { %9933 = vmatpush1.bf16.msra.mxu0 %v11529_v24  ;;  %9953 = vmatprep.subr.bf16.mxu1 %v11453_v0 }
 0x46d   : > { %9935 = vmatprep.subr.bf16.mxu0 %v11522_v21  ;;  %1502 = vmatprep.mubr.f32.mxu0 %v11456_v6 }
 0x46e   : > { %8882 = vmatprep.mubr.msk.f32.mxu1 %vm11457_vm0, %v11456_v6 }
 0x46f   : > { %9955 = vmatpush3.bf16.msra.mxu1 %v11545_v29 }
 0x470   : > { %9937 = vmatpush1.bf16.msra.mxu0 %v11543_v28  ;;  %9956 = vmatprep.subr.bf16.mxu1 %v11453_v0 }
 0x471   : > { %9939 = vmatprep.subr.bf16.mxu0 %v11644_v35 }
 0x473   : > { %9958 = vmatpush3.bf16.msra.mxu1 %v11642_v34 }
 0x474   : > { %9941 = vmatpush1.bf16.msra.mxu0 %v11646_v36  ;;  %9959 = vmatprep.subr.bf16.mxu1 %v11453_v0 }
 0x475   : > { %9943 = vmatprep.subr.bf16.mxu0 %v11771_v50 }
 0x477   : > { %9961 = vmatpush3.bf16.msra.mxu1 %v11768_v49 }
 0x478   : > { %9945 = vmatpush1.bf16.msra.mxu0 %v11774_v51  ;;  %9962 = vmatprep.subr.bf16.mxu1 %v11453_v0 }
 0x479   : > { %9947 = vmatprep.subr.bf16.mxu0 %v11788_v57 }
 0x47b   : > { %9964 = vmatpush3.bf16.msra.mxu1 %v11786_v43 }
 0x47c   : > { %9949 = vmatpush1.bf16.msra.mxu0 %v11790_v58  ;;  %9985 = vmatprep.subr.bf16.mxu1 %v11453_v0 }
 0x47d   : > { %9966 = vmatprep.subr.bf16.mxu0 %v11520_v18 }
 0x47e   : > { %8883 = vmatmul.mubr.msk.f32.vlgmr.msra.gmra.mrb[14].mxu1 %vm1289_vm13, %v1434_v60 }
 0x47f   : > { %8200 = vmatmul.mubr.msk.f32.vlgmr.msra.gmra.mrb[14].mxu0 %vm1289_vm13, %v1434_v60  ;;  %9987 = vmatpush3.bf16.msra.mxu1 %v11532_v25 }
 0x480   : > { %9968 = vmatpush1.bf16.msra.mxu0 %v11529_v24  ;;  %9988 = vmatprep.subr.bf16.mxu1 %v11453_v0 }
 0x481   : > { %9970 = vmatprep.subr.bf16.mxu0 %v11522_v21  ;;  %1647 = vmatprep.mubr.f32.mxu0 %v11456_v6 }
 0x482   : > { %8905 = vmatprep.mubr.msk.f32.mxu1 %vm11457_vm0, %v11456_v6 }
 0x483   : > { %9990 = vmatpush3.bf16.msra.mxu1 %v11545_v29 }
 0x484   : > { %9972 = vmatpush1.bf16.msra.mxu0 %v11543_v28  ;;  %9991 = vmatprep.subr.bf16.mxu1 %v11453_v0 }
 0x485   : > { %9974 = vmatprep.subr.bf16.mxu0 %v11644_v35 }
 0x487   : > { %9993 = vmatpush3.bf16.msra.mxu1 %v11642_v34 }
 0x488   : > { %9976 = vmatpush1.bf16.msra.mxu0 %v11646_v36  ;;  %9994 = vmatprep.subr.bf16.mxu1 %v11453_v0 }
 0x489   : > { %9978 = vmatprep.subr.bf16.mxu0 %v11771_v50 }
 0x48b   : > { %9996 = vmatpush3.bf16.msra.mxu1 %v11768_v49 }
 0x48c   : > { %9980 = vmatpush1.bf16.msra.mxu0 %v11774_v51  ;;  %9997 = vmatprep.subr.bf16.mxu1 %v11453_v0 }
 0x48d   : > { %9982 = vmatprep.subr.bf16.mxu0 %v11788_v57 }
 0x48f   : > { %9999 = vmatpush3.bf16.msra.mxu1 %v11786_v43 }
 0x490   : > { %9984 = vmatpush1.bf16.msra.mxu0 %v11790_v58  ;;  %10024 = vmatprep.subr.bf16.mxu1 %v11453_v0 }
 0x491   : > { %10001 = vmatprep.subr.bf16.mxu0 %v11520_v18 }
 0x492   : > { %8906 = vmatmul.mubr.msk.f32.vlgmr.msra.gmra.mrb[16].mxu1 %vm1289_vm13, %v1579_v61 }
 0x493   : > { %8202 = vmatmul.mubr.msk.f32.vlgmr.msra.gmra.mrb[16].mxu0 %vm1289_vm13, %v1579_v61  ;;  %10026 = vmatpush3.bf16.msra.mxu1 %v11532_v25 }
 0x494   : > { %10003 = vmatpush1.bf16.msra.mxu0 %v11529_v24  ;;  %10027 = vmatprep.subr.bf16.mxu1 %v11453_v0 }
 0x495   : > { %10005 = vmatprep.subr.bf16.mxu0 %v11522_v21  ;;  %8934 = vmatprep.mubr.msk.f32.mxu1 %vm11457_vm0, %v11456_v6 }
 0x496   : > { %1895 = vmatprep.mubr.f32.mxu0 %v11456_v6 }
 0x497   : > { %10029 = vmatpush3.bf16.msra.mxu1 %v11545_v29 }
 0x498   : > { %10007 = vmatpush1.bf16.msra.mxu0 %v11543_v28  ;;  %10030 = vmatprep.subr.bf16.mxu1 %v11453_v0 }
 0x499   : > { %10009 = vmatprep.subr.bf16.mxu0 %v11644_v35 }
 0x49b   : > { %10032 = vmatpush3.bf16.msra.mxu1 %v11642_v34 }
 0x49c   : > { %10011 = vmatpush1.bf16.msra.mxu0 %v11646_v36  ;;  %10033 = vmatprep.subr.bf16.mxu1 %v11453_v0 }
 0x49d   : > { %10013 = vmatprep.subr.bf16.mxu0 %v11771_v50 }
 0x49f   : > { %10035 = vmatpush3.bf16.msra.mxu1 %v11768_v49 }
 0x4a0   : > { %10015 = vmatpush1.bf16.msra.mxu0 %v11774_v51  ;;  %10036 = vmatprep.subr.bf16.mxu1 %v11453_v0 }
 0x4a1   : > { %10017 = vmatprep.subr.bf16.mxu0 %v11788_v57 }
 0x4a3   : > { %10038 = vmatpush3.bf16.msra.mxu1 %v11786_v43 }
 0x4a4   : > { %10019 = vmatpush1.bf16.msra.mxu0 %v11790_v58  ;;  %10039 = vmatprep.subr.bf16.mxu1 %v11453_v0 }
 0x53d   : > { %v1430_v62 = vpop.f32.mrb[12].mxu1 }
 0x53e   : > { %1728 = vrot.lane.b32.xlu1 %v1430_v62, %s11459_s26  ;;  %v1359_v63 = vpop.f32.mrb[12].mxu0  ;;  %v8861_v1 = vpop.f32.mrb[13].mxu1 }
 0x53f   : > { %v1361_v2 = vpop.f32.mrb[13].mxu0 }
 0x540   : > { %1726 = vrot.lane.b32.xlu0 %v1361_v2, %s11459_s26 }
 0x542   : > { %1724 = vrot.lane.b32.xlu1 %v1359_v63, %s11459_s26 }
 0x551   : > { %v1575_v3 = vpop.f32.mrb[14].mxu1 }
 0x552   : > { %v1504_v4 = vpop.f32.mrb[14].mxu0  ;;  %v8884_v5 = vpop.f32.mrb[15].mxu1 }
 0x553   : > { %v1506_v7 = vpop.f32.mrb[15].mxu0 }
 0x565   : > { %v1720_v12 = vpop.f32.mrb[16].mxu1 }
 0x566   : > { %v1649_v13 = vpop.f32.mrb[16].mxu0  ;;  %v8907_v14 = vpop.f32.mrb[17].mxu1 }
 0x567   : > { %1736 = vrot.lane.b32.xlu0 %v1649_v13, %s11460_s27  ;;  %v1651_v15 = vpop.f32.mrb[17].mxu0 }
 0x568   : > { %1738 = vrot.lane.b32.xlu1 %v1651_v15, %s11460_s27 }
 0x56b   : > { %1740 = vrot.lane.b32.xlu0 %v1720_v12, %s11460_s27 }
 0x5b0   : > { %v1729_v16 = vpop.permute.xlu1 %1728 }
 0x5b2   : > { %v1727_v20 = vpop.permute.xlu0 %1726 }
 0x5b3   : > { %v1730_v26 = vsel %vm663_vm4, %v1727_v20, %v1729_v16 }
 0x5b4   : > { %v1725_v19 = vpop.permute.xlu1 %1724  ;;  %v1735_v37 = vadd.f32 %v1730_v26, %v1575_v3 }
 0x5b5   : > { %v1732_v22 = vsel %vm663_vm4, %v1729_v16, %v1725_v19  ;;  %v1731_v27 = vsel %vm663_vm4, %v1725_v19, %v1727_v20  ;;  %v1826_v16 = vld [vmem:[%s13616_s1 + $0x48] sm:$0xff] }
 0x5b6   : > { %v1733_v30 = vadd.f32 %v1732_v22, %v1504_v4  ;;  %v1734_v38 = vadd.f32 %v1731_v27, %v1506_v7  ;;  %v1972_v22 = vld [vmem:[%s13616_s1 + $0x50] sm:$0xff] }
 0x5d9   : > { %v1737_v23 = vpop.permute.xlu0 %1736 }
 0x5da   : > { %v1739_v31 = vpop.permute.xlu1 %1738 }
 0x5db   : > { %v1743_v32 = vsel %vm676_vm5, %v1737_v23, %v1739_v31 }
 0x5dc   : > { %v1745_v33 = vadd.f32 %v1743_v32, %v1733_v30 }
 0x5dd   : > { %v1741_v40 = vpop.permute.xlu0 %1740 }
 0x5de   : > { %vm1748_vm14 = vcmp.ge.f32.partialorder %v1745_v33, 0.0  ;;  %v1751_v41 = vmul.f32 0.2, %v1745_v33  ;;  %v1742_v44 = vsel %vm676_vm5, %v1739_v31, %v1741_v40  ;;  %v1744_v45 = vsel %vm676_vm5, %v1741_v40, %v1737_v23  ;;  %v2117_v23 = vld [vmem:[%s13616_s1 + $0x58] sm:$0xff] }
 0x5df   : > { %v1746_v46 = vadd.f32 %v1742_v44, %v1734_v38  ;;  %v1747_v47 = vadd.f32 %v1744_v45, %v1735_v37 }
 0x5e0   : > { %v1754_v48 = vsel %vm1748_vm14, %v1745_v33, %v1751_v41 }
 0x5e1   : > { %vm1749_vm15 = vcmp.ge.f32.partialorder %v1746_v46, 0.0  ;;  %v1752_v52 = vmul.f32 0.2, %v1746_v46  ;;  %v1753_v53 = vmul.f32 0.2, %v1747_v47  ;;  %vm1750_vm6 = vcmp.ge.f32.partialorder %v1747_v47, 0.0 }
 0x5e2   : > { %v1757_v42 = vmul.f32 %v1754_v48, %v11624_v10 }
 0x5e3   : > { %v1755_v54 = vsel %vm1749_vm15, %v1746_v46, %v1752_v52  ;;  %v1756_v55 = vsel %vm1750_vm6, %v1747_v47, %v1753_v53 }
 0x5e4   : > { %v1759_v56 = vmul.f32 %v1756_v55, %v11622_v9  ;;  %v1758_v39 = vmul.f32 %v1755_v54, %v11626_v11 }
 0x5e6   : > { %1764 = vrot.lane.b32.xlu0 %v1759_v56, %s11454_s18  ;;  %v11344_v59 = vpack.i.bf16 %v1758_v39, %v1757_v42 }
 0x5e8   : > { %11345 = vrot.lane.b32.xlu1 %v11344_v59, %s11454_s18 }
 0x5ea   : > { %1779 = vrot.lane.b32.xlu0 %v1759_v56, %s11455_s19 }
 0x5ec   : > { %1777 = vrot.lane.b32.xlu1 %v1758_v39, %s11455_s19 }
 0x5f0   : > { %1775 = vrot.lane.b32.xlu1 %v1757_v42, %s11455_s19 }
 0x658   : > { %v1765_v60 = vpop.permute.xlu0 %1764 }
 0x65a   : > { %v11346_v61 = vpop.permute.xlu1 %11345 }
 0x65b   : > { %v11348_v62 = vunpack.i.h.bf16 %v11346_v61  ;;  %v11347_v63 = vunpack.i.l.bf16 %v11346_v61 }
 0x65c   : > { %v1780_v13 = vpop.permute.xlu0 %1779 }
 0x65d   : > { %v1766_v1 = vsel %vm186_vm1, %v11348_v62, %v1765_v60  ;;  %v1767_v2 = vsel %vm186_vm1, %v11347_v63, %v11348_v62  ;;  %v1768_v3 = vsel %vm186_vm1, %v1765_v60, %v11347_v63 }
 0x65e   : > { %v11912_v4 = vpack.c.bf16 %v1759_v56, %v1766_v1  ;;  %v11914_v5 = vpack.c.bf16 %v1758_v39, %v1767_v2  ;;  %v11916_v7 = vpack.c.bf16 %v1757_v42, %v1768_v3  ;;  %v1778_v12 = vpop.permute.xlu1 %1777 }
 0x65f   : > { %v11923_v14 = vsel %vm202_vm2, %v1778_v12, %v1780_v13 }
 0x660   : > { %10021 = vmatprep.subr.bf16.mxu0 %v11914_v5  ;;  %10041 = vmatpush3.bf16.msra.mxu1 %v11912_v4 }
 0x661   : > { %10023 = vmatpush1.bf16.msra.mxu0 %v11916_v7  ;;  %8932 = vmatprep.subr.mxu1 %v11456_v6 }
 0x662   : > { %v1776_v15 = vpop.permute.xlu1 %1775  ;;  %1855 = vmatprep.subr.mxu0 %v11923_v14 }
 0x663   : > { %v11932_v19 = vsel %vm202_vm2, %v1780_v13, %v1776_v15  ;;  %v11936_v20 = vsel %vm202_vm2, %v1776_v15, %v1778_v12 }
 0x664   : > { %8933 = vmatpush3.msra.mxu1 %v11932_v19 }
 0x665   : > { %1856 = vmatpush1.msra.mxu0 %v11936_v20  ;;  %8935 = vmatmul.mubr.msk.f32.vlgmr.msra.gmra.mrb[18].mxu1 %vm1827_vm7, %v1826_v16 }
 0x666   : > { %10066 = vmatprep.subr.bf16.mxu1 %v11453_v0  ;;  %8204 = vmatmul.mubr.msk.f32.vlgmr.msra.gmra.mrb[18].mxu0 %vm1827_vm7, %v1826_v16 }
 0x667   : > { %10043 = vmatprep.subr.bf16.mxu0 %v11520_v18  ;;  %10068 = vmatpush3.bf16.msra.mxu1 %v11532_v25 }
 0x668   : > { %10045 = vmatpush1.bf16.msra.mxu0 %v11529_v24  ;;  %10069 = vmatprep.subr.bf16.mxu1 %v11453_v0 }
 0x669   : > { %10047 = vmatprep.subr.bf16.mxu0 %v11522_v21  ;;  %2040 = vmatprep.mubr.f32.mxu0 %v11456_v6 }
 0x66a   : > { %8963 = vmatprep.mubr.msk.f32.mxu1 %vm11457_vm0, %v11456_v6 }
 0x66b   : > { %10071 = vmatpush3.bf16.msra.mxu1 %v11545_v29 }
 0x66c   : > { %10049 = vmatpush1.bf16.msra.mxu0 %v11543_v28  ;;  %10072 = vmatprep.subr.bf16.mxu1 %v11453_v0 }
 0x66d   : > { %10051 = vmatprep.subr.bf16.mxu0 %v11644_v35 }
 0x66f   : > { %10074 = vmatpush3.bf16.msra.mxu1 %v11642_v34 }
 0x670   : > { %10053 = vmatpush1.bf16.msra.mxu0 %v11646_v36  ;;  %10075 = vmatprep.subr.bf16.mxu1 %v11453_v0 }
 0x671   : > { %10055 = vmatprep.subr.bf16.mxu0 %v11771_v50 }
 0x673   : > { %10077 = vmatpush3.bf16.msra.mxu1 %v11768_v49 }
 0x674   : > { %10057 = vmatpush1.bf16.msra.mxu0 %v11774_v51  ;;  %10078 = vmatprep.subr.bf16.mxu1 %v11453_v0 }
 0x675   : > { %10059 = vmatprep.subr.bf16.mxu0 %v11788_v57 }
 0x677   : > { %10080 = vmatpush3.bf16.msra.mxu1 %v11786_v43 }
 0x678   : > { %10061 = vmatpush1.bf16.msra.mxu0 %v11790_v58  ;;  %10081 = vmatprep.subr.bf16.mxu1 %v11453_v0 }
 0x679   : > { %10063 = vmatprep.subr.bf16.mxu0 %v11914_v5 }
 0x67b   : > { %10083 = vmatpush3.bf16.msra.mxu1 %v11912_v4 }
 0x67c   : > { %10065 = vmatpush1.bf16.msra.mxu0 %v11916_v7  ;;  %8961 = vmatprep.subr.mxu1 %v11456_v6 }
 0x67d   : > { %2000 = vmatprep.subr.mxu0 %v11923_v14 }
 0x67f   : > { %8962 = vmatpush3.msra.mxu1 %v11932_v19 }
 0x680   : > { %2001 = vmatpush1.msra.mxu0 %v11936_v20  ;;  %10108 = vmatprep.subr.bf16.mxu1 %v11453_v0 }
 0x681   : > { %8206 = vmatmul.mubr.msk.f32.vlgmr.msra.gmra.mrb[20].mxu0 %vm1827_vm7, %v1972_v22  ;;  %8964 = vmatmul.mubr.msk.f32.vlgmr.msra.gmra.mrb[20].mxu1 %vm1827_vm7, %v1972_v22 }
 0x682   : > { %10085 = vmatprep.subr.bf16.mxu0 %v11520_v18  ;;  %10110 = vmatpush3.bf16.msra.mxu1 %v11532_v25 }
 0x683   : > { %10087 = vmatpush1.bf16.msra.mxu0 %v11529_v24  ;;  %10111 = vmatprep.subr.bf16.mxu1 %v11453_v0 }
 0x684   : > { %10089 = vmatprep.subr.bf16.mxu0 %v11522_v21  ;;  %2185 = vmatprep.mubr.f32.mxu0 %v11456_v6 }
 0x685   : > { %8992 = vmatprep.mubr.msk.f32.mxu1 %vm11457_vm0, %v11456_v6 }
 0x686   : > { %10113 = vmatpush3.bf16.msra.mxu1 %v11545_v29 }
 0x687   : > { %10091 = vmatpush1.bf16.msra.mxu0 %v11543_v28  ;;  %10114 = vmatprep.subr.bf16.mxu1 %v11453_v0 }
 0x688   : > { %10093 = vmatprep.subr.bf16.mxu0 %v11644_v35 }
 0x68a   : > { %10116 = vmatpush3.bf16.msra.mxu1 %v11642_v34 }
 0x68b   : > { %10095 = vmatpush1.bf16.msra.mxu0 %v11646_v36  ;;  %10117 = vmatprep.subr.bf16.mxu1 %v11453_v0 }
 0x68c   : > { %10097 = vmatprep.subr.bf16.mxu0 %v11771_v50 }
 0x68e   : > { %10119 = vmatpush3.bf16.msra.mxu1 %v11768_v49 }
 0x68f   : > { %10099 = vmatpush1.bf16.msra.mxu0 %v11774_v51  ;;  %10120 = vmatprep.subr.bf16.mxu1 %v11453_v0 }
 0x690   : > { %10101 = vmatprep.subr.bf16.mxu0 %v11788_v57 }
 0x692   : > { %10122 = vmatpush3.bf16.msra.mxu1 %v11786_v43 }
 0x693   : > { %10103 = vmatpush1.bf16.msra.mxu0 %v11790_v58  ;;  %10123 = vmatprep.subr.bf16.mxu1 %v11453_v0 }
 0x694   : > { %10105 = vmatprep.subr.bf16.mxu0 %v11914_v5 }
 0x696   : > { %10125 = vmatpush3.bf16.msra.mxu1 %v11912_v4 }
 0x697   : > { %10107 = vmatpush1.bf16.msra.mxu0 %v11916_v7  ;;  %8990 = vmatprep.subr.mxu1 %v11456_v6 }
 0x698   : > { %2145 = vmatprep.subr.mxu0 %v11923_v14 }
 0x69a   : > { %8991 = vmatpush3.msra.mxu1 %v11932_v19 }
 0x69b   : > { %2146 = vmatpush1.msra.mxu0 %v11936_v20  ;;  %10158 = vmatprep.subr.bf16.mxu1 %v11453_v0 }
 0x69c   : > { %8208 = vmatmul.mubr.msk.f32.vlgmr.msra.gmra.mrb[22].mxu0 %vm1827_vm7, %v2117_v23  ;;  %8993 = vmatmul.mubr.msk.f32.vlgmr.msra.gmra.mrb[22].mxu1 %vm1827_vm7, %v2117_v23 }
 0x69d   : > { %10127 = vmatprep.subr.bf16.mxu0 %v11520_v18  ;;  %10160 = vmatpush3.bf16.msra.mxu1 %v11532_v25 }
 0x69e   : > { %10129 = vmatpush1.bf16.msra.mxu0 %v11529_v24  ;;  %10161 = vmatprep.subr.bf16.mxu1 %v11453_v0 }
 0x69f   : > { %10131 = vmatprep.subr.bf16.mxu0 %v11522_v21  ;;  %9027 = vmatprep.mubr.msk.f32.mxu1 %vm11457_vm0, %v11456_v6 }
 0x6a0   : > { %2438 = vmatprep.mubr.f32.mxu0 %v11456_v6 }
 0x6a1   : > { %10163 = vmatpush3.bf16.msra.mxu1 %v11545_v29 }
 0x6a2   : > { %10133 = vmatpush1.bf16.msra.mxu0 %v11543_v28  ;;  %10164 = vmatprep.subr.bf16.mxu1 %v11453_v0 }
 0x6a3   : > { %10135 = vmatprep.subr.bf16.mxu0 %v11644_v35 }
 0x6a5   : > { %10166 = vmatpush3.bf16.msra.mxu1 %v11642_v34 }
 0x6a6   : > { %10137 = vmatpush1.bf16.msra.mxu0 %v11646_v36  ;;  %10167 = vmatprep.subr.bf16.mxu1 %v11453_v0 }
 0x6a7   : > { %10139 = vmatprep.subr.bf16.mxu0 %v11771_v50 }
 0x6a9   : > { %10169 = vmatpush3.bf16.msra.mxu1 %v11768_v49 }
 0x6aa   : > { %10141 = vmatpush1.bf16.msra.mxu0 %v11774_v51  ;;  %10170 = vmatprep.subr.bf16.mxu1 %v11453_v0 }
 0x6ab   : > { %10143 = vmatprep.subr.bf16.mxu0 %v11788_v57 }
 0x6ad   : > { %10172 = vmatpush3.bf16.msra.mxu1 %v11786_v43 }
 0x6ae   : > { %10145 = vmatpush1.bf16.msra.mxu0 %v11790_v58  ;;  %10173 = vmatprep.subr.bf16.mxu1 %v11453_v0 }
 0x6af   : > { %10147 = vmatprep.subr.bf16.mxu0 %v11914_v5 }
 0x6b1   : > { %10175 = vmatpush3.bf16.msra.mxu1 %v11912_v4 }
 0x6b2   : > { %10149 = vmatpush1.bf16.msra.mxu0 %v11916_v7  ;;  %10176 = vmatprep.subr.bf16.mxu1 %v11453_v0 }
 0x738   : > { %v1968_v26 = vpop.f32.mrb[18].mxu1 }
 0x739   : > { %2266 = vrot.lane.b32.xlu0 %v1968_v26, %s11459_s26  ;;  %v1897_v27 = vpop.f32.mrb[18].mxu0  ;;  %v8936_v30 = vpop.f32.mrb[19].mxu1 }
 0x73a   : > { %v1899_v31 = vpop.f32.mrb[19].mxu0 }
 0x73b   : > { %2264 = vrot.lane.b32.xlu1 %v1899_v31, %s11459_s26 }
 0x73d   : > { %2262 = vrot.lane.b32.xlu0 %v1897_v27, %s11459_s26 }
 0x754   : > { %v2042_v32 = vpop.f32.mrb[20].mxu0  ;;  %v2113_v33 = vpop.f32.mrb[20].mxu1 }
 0x755   : > { %v2044_v37 = vpop.f32.mrb[21].mxu0  ;;  %v8965_v38 = vpop.f32.mrb[21].mxu1 }
 0x76f   : > { %v2187_v40 = vpop.f32.mrb[22].mxu0  ;;  %v2258_v41 = vpop.f32.mrb[22].mxu1 }
 0x770   : > { %2274 = vrot.lane.b32.xlu1 %v2187_v40, %s11460_s27  ;;  %v2189_v44 = vpop.f32.mrb[23].mxu0  ;;  %v8994_v45 = vpop.f32.mrb[23].mxu1 }
 0x771   : > { %2276 = vrot.lane.b32.xlu0 %v2189_v44, %s11460_s27 }
 0x774   : > { %2278 = vrot.lane.b32.xlu1 %v2258_v41, %s11460_s27 }
 0x7ab   : > { %v2267_v46 = vpop.permute.xlu0 %2266 }
 0x7ad   : > { %v2265_v48 = vpop.permute.xlu1 %2264 }
 0x7ae   : > { %v2268_v54 = vsel %vm663_vm4, %v2265_v48, %v2267_v46 }
 0x7af   : > { %v2263_v47 = vpop.permute.xlu0 %2262  ;;  %v2273_v60 = vadd.f32 %v2268_v54, %v2113_v33 }
 0x7b0   : > { %v2270_v52 = vsel %vm663_vm4, %v2267_v46, %v2263_v47  ;;  %v2269_v55 = vsel %vm663_vm4, %v2263_v47, %v2265_v48 }
 0x7b1   : > { %v2271_v56 = vadd.f32 %v2270_v52, %v2042_v32  ;;  %v2272_v61 = vadd.f32 %v2269_v55, %v2044_v37 }
 0x7e2   : > { %v2275_v53 = vpop.permute.xlu1 %2274 }
 0x7e3   : > { %v2277_v42 = vpop.permute.xlu0 %2276 }
 0x7e4   : > { %v2281_v39 = vsel %vm676_vm5, %v2275_v53, %v2277_v42 }
 0x7e5   : > { %v2283_v59 = vadd.f32 %v2281_v39, %v2271_v56 }
 0x7e6   : > { %v2279_v62 = vpop.permute.xlu1 %2278 }
 0x7e7   : > { %vm2286_vm8 = vcmp.ge.f32.partialorder %v2283_v59, 0.0  ;;  %v2289_v63 = vmul.f32 0.2, %v2283_v59  ;;  %v2280_v1 = vsel %vm676_vm5, %v2277_v42, %v2279_v62  ;;  %v2282_v2 = vsel %vm676_vm5, %v2279_v62, %v2275_v53 }
 0x7e8   : > { %v2284_v3 = vadd.f32 %v2280_v1, %v2272_v61  ;;  %v2285_v12 = vadd.f32 %v2282_v2, %v2273_v60  ;;  %v2515_v60 = vld [vmem:[%s13616_s1 + $0x68] sm:$0xff] }
 0x7e9   : > { %v2292_v13 = vsel %vm2286_vm8, %v2283_v59, %v2289_v63  ;;  %v2373_v59 = vld [vmem:[%s13616_s1 + $0x60] sm:$0xff] }
 0x7ea   : > { %vm2287_vm10 = vcmp.ge.f32.partialorder %v2284_v3, 0.0  ;;  %v2290_v15 = vmul.f32 0.2, %v2284_v3  ;;  %v2291_v16 = vmul.f32 0.2, %v2285_v12  ;;  %vm2288_vm11 = vcmp.ge.f32.partialorder %v2285_v12, 0.0 }
 0x7eb   : > { %v2295_v27 = vmul.f32 %v2292_v13, %v11624_v10 }
 0x7ec   : > { %v2293_v22 = vsel %vm2287_vm10, %v2284_v3, %v2290_v15  ;;  %v2294_v23 = vsel %vm2288_vm11, %v2285_v12, %v2291_v16 }
 0x7ed   : > { %v2297_v26 = vmul.f32 %v2294_v23, %v11622_v9  ;;  %v2296_v30 = vmul.f32 %v2293_v22, %v11626_v11 }
 0x7ef   : > { %2302 = vrot.lane.b32.xlu1 %v2297_v26, %s11454_s18  ;;  %v11349_v31 = vpack.i.bf16 %v2296_v30, %v2295_v27  ;;  %v11354_v32 = vpack.i.bf16 %v2297_v26, %v2296_v30 }
 0x7f1   : > { %11350 = vrot.lane.b32.xlu0 %v11349_v31, %s11454_s18 }
 0x7f3   : > { %2313 = vrot.lane.b32.xlu1 %v2295_v27, %s11455_s19 }
 0x7f5   : > { %11355 = vrot.lane.b32.xlu0 %v11354_v32, %s11455_s19 }
 0x861   : > { %v2303_v33 = vpop.permute.xlu1 %2302 }
 0x863   : > { %v11351_v37 = vpop.permute.xlu0 %11350 }
 0x864   : > { %v11353_v38 = vunpack.i.h.bf16 %v11351_v37  ;;  %v11352_v40 = vunpack.i.l.bf16 %v11351_v37 }
 0x865   : > { %v2314_v55 = vpop.permute.xlu1 %2313 }
 0x866   : > { %v2304_v41 = vsel %vm186_vm1, %v11353_v38, %v2303_v33  ;;  %v2306_v44 = vsel %vm186_vm1, %v2303_v33, %v11352_v40  ;;  %v2305_v45 = vsel %vm186_vm1, %v11352_v40, %v11353_v38 }
 0x867   : > { %v11356_v46 = vpop.permute.xlu0 %11355  ;;  %v12074_v47 = vpack.c.bf16 %v2305_v45, %v11923_v14  ;;  %v12077_v48 = vpack.c.bf16 %v2304_v41, %v11932_v19  ;;  %v12080_v52 = vpack.c.bf16 %v2306_v44, %v11936_v20 }
 0x868   : > { %v11358_v53 = vunpack.i.h.bf16 %v11356_v46  ;;  %v11357_v54 = vunpack.i.l.bf16 %v11356_v46 }
 0x869   : > { %10151 = vmatprep.subr.bf16.mxu0 %v12074_v47  ;;  %10178 = vmatpush3.bf16.msra.mxu1 %v12077_v48 }
 0x86a   : > { %v2321_v56 = vsel %vm202_vm2, %v11358_v53, %v2314_v55  ;;  %v2320_v14 = vsel %vm202_vm2, %v2314_v55, %v11357_v54  ;;  %10153 = vmatpush1.bf16.msra.mxu0 %v12080_v52  ;;  %10179 = vmatprep.subr.bf16.mxu1 %v11453_v0  ;;  %v2319_v19 = vsel %vm202_vm2, %v11357_v54, %v11358_v53  ;;  %v11441_v54 = vld [vmem:[%s11498_s17 + $0x10] sm:$0xff] }
 0x86b   : > { %v12092_v20 = vpack.c.bf16 %v2319_v19, %v2296_v30  ;;  %v12094_v42 = vpack.c.bf16 %v2321_v56, %v2297_v26  ;;  %v12096_v39 = vpack.c.bf16 %v2320_v14, %v2295_v27 }
 0x86d   : > { %10155 = vmatprep.subr.bf16.mxu0 %v12092_v20  ;;  %10181 = vmatpush3.bf16.msra.mxu1 %v12094_v42 }
 0x86e   : > { %10157 = vmatpush1.bf16.msra.mxu0 %v12096_v39  ;;  %10214 = vmatprep.subr.bf16.mxu1 %v11453_v0 }
 0x86f   : > { %10183 = vmatprep.subr.bf16.mxu0 %v11520_v18 }
 0x870   : > { %9028 = vmatmul.mubr.f32.vlgmr.msra.gmra.mrb[24].mxu1 %v2373_v59 }
 0x871   : > { %2439 = vmatmul.mubr.f32.vlgmr.msra.gmra.mrb[24].mxu0 %v2373_v59  ;;  %10216 = vmatpush3.bf16.msra.mxu1 %v11532_v25 }
 0x872   : > { %10185 = vmatpush1.bf16.msra.mxu0 %v11529_v24  ;;  %10217 = vmatprep.subr.bf16.mxu1 %v11453_v0 }
 0x873   : > { %10187 = vmatprep.subr.bf16.mxu0 %v11522_v21  ;;  %2580 = vmatprep.mubr.f32.mxu0 %v11456_v6 }
 0x874   : > { %9062 = vmatprep.mubr.msk.f32.mxu1 %vm11457_vm0, %v11456_v6 }
 0x875   : > { %10219 = vmatpush3.bf16.msra.mxu1 %v11545_v29 }
 0x876   : > { %10189 = vmatpush1.bf16.msra.mxu0 %v11543_v28  ;;  %10220 = vmatprep.subr.bf16.mxu1 %v11453_v0 }
 0x877   : > { %10191 = vmatprep.subr.bf16.mxu0 %v11644_v35 }
 0x879   : > { %10222 = vmatpush3.bf16.msra.mxu1 %v11642_v34 }
 0x87a   : > { %10193 = vmatpush1.bf16.msra.mxu0 %v11646_v36  ;;  %10223 = vmatprep.subr.bf16.mxu1 %v11453_v0 }
 0x87b   : > { %10195 = vmatprep.subr.bf16.mxu0 %v11771_v50 }
 0x87d   : > { %10225 = vmatpush3.bf16.msra.mxu1 %v11768_v49 }
 0x87e   : > { %10197 = vmatpush1.bf16.msra.mxu0 %v11774_v51  ;;  %10226 = vmatprep.subr.bf16.mxu1 %v11453_v0 }
 0x87f   : > { %10199 = vmatprep.subr.bf16.mxu0 %v11788_v57 }
 0x881   : > { %10228 = vmatpush3.bf16.msra.mxu1 %v11786_v43 }
 0x882   : > { %10201 = vmatpush1.bf16.msra.mxu0 %v11790_v58  ;;  %10229 = vmatprep.subr.bf16.mxu1 %v11453_v0 }
 0x883   : > { %10203 = vmatprep.subr.bf16.mxu0 %v11914_v5 }
 0x885   : > { %10231 = vmatpush3.bf16.msra.mxu1 %v11912_v4 }
 0x886   : > { %10205 = vmatpush1.bf16.msra.mxu0 %v11916_v7  ;;  %10232 = vmatprep.subr.bf16.mxu1 %v11453_v0 }
 0x887   : > { %10207 = vmatprep.subr.bf16.mxu0 %v12074_v47 }
 0x889   : > { %10234 = vmatpush3.bf16.msra.mxu1 %v12077_v48 }
 0x88a   : > { %10209 = vmatpush1.bf16.msra.mxu0 %v12080_v52  ;;  %10235 = vmatprep.subr.bf16.mxu1 %v11453_v0 }
 0x88b   : > { %10211 = vmatprep.subr.bf16.mxu0 %v12092_v20 }
 0x88d   : > { %10237 = vmatpush3.bf16.msra.mxu1 %v12094_v42 }
 0x88e   : > { %10213 = vmatpush1.bf16.msra.mxu0 %v12096_v39  ;;  %10270 = vmatprep.subr.bf16.mxu1 %v11453_v0 }
 0x88f   : > { %10239 = vmatprep.subr.bf16.mxu0 %v11520_v18  ;;  %v2657_v18 = vld [vmem:[%s13616_s1 + $0x70] sm:$0xff] }
 0x890   : > { %9063 = vmatmul.mubr.f32.vlgmr.msra.gmra.mrb[26].mxu1 %v2515_v60 }
 0x891   : > { %2581 = vmatmul.mubr.f32.vlgmr.msra.gmra.mrb[26].mxu0 %v2515_v60  ;;  %10272 = vmatpush3.bf16.msra.mxu1 %v11532_v25 }
 0x892   : > { %10241 = vmatpush1.bf16.msra.mxu0 %v11529_v24  ;;  %10273 = vmatprep.subr.bf16.mxu1 %v11453_v0 }
 0x893   : > { %10243 = vmatprep.subr.bf16.mxu0 %v11522_v21  ;;  %2722 = vmatprep.mubr.f32.mxu0 %v11456_v6 }
 0x894   : > { %9097 = vmatprep.mubr.msk.f32.mxu1 %vm11457_vm0, %v11456_v6 }
 0x895   : > { %10275 = vmatpush3.bf16.msra.mxu1 %v11545_v29 }
 0x896   : > { %10245 = vmatpush1.bf16.msra.mxu0 %v11543_v28  ;;  %10276 = vmatprep.subr.bf16.mxu1 %v11453_v0 }
 0x897   : > { %10247 = vmatprep.subr.bf16.mxu0 %v11644_v35 }
 0x899   : > { %10278 = vmatpush3.bf16.msra.mxu1 %v11642_v34 }
 0x89a   : > { %10249 = vmatpush1.bf16.msra.mxu0 %v11646_v36  ;;  %10279 = vmatprep.subr.bf16.mxu1 %v11453_v0 }
 0x89b   : > { %10251 = vmatprep.subr.bf16.mxu0 %v11771_v50 }
 0x89d   : > { %10281 = vmatpush3.bf16.msra.mxu1 %v11768_v49 }
 0x89e   : > { %10253 = vmatpush1.bf16.msra.mxu0 %v11774_v51  ;;  %10282 = vmatprep.subr.bf16.mxu1 %v11453_v0 }
 0x89f   : > { %10255 = vmatprep.subr.bf16.mxu0 %v11788_v57 }
 0x8a1   : > { %10284 = vmatpush3.bf16.msra.mxu1 %v11786_v43 }
 0x8a2   : > { %10257 = vmatpush1.bf16.msra.mxu0 %v11790_v58  ;;  %10285 = vmatprep.subr.bf16.mxu1 %v11453_v0 }
 0x8a3   : > { %10259 = vmatprep.subr.bf16.mxu0 %v11914_v5 }
 0x8a5   : > { %10287 = vmatpush3.bf16.msra.mxu1 %v11912_v4 }
 0x8a6   : > { %10261 = vmatpush1.bf16.msra.mxu0 %v11916_v7  ;;  %10288 = vmatprep.subr.bf16.mxu1 %v11453_v0 }
 0x8a7   : > { %10263 = vmatprep.subr.bf16.mxu0 %v12074_v47  ;;  %v11439_v47 = vld [vmem:[%s11498_s17] sm:$0xff] }
 0x8a9   : > { %10290 = vmatpush3.bf16.msra.mxu1 %v12077_v48 }
 0x8aa   : > { %10265 = vmatpush1.bf16.msra.mxu0 %v12080_v52  ;;  %10291 = vmatprep.subr.bf16.mxu1 %v11453_v0  ;;  %v11440_v52 = vld [vmem:[%s11498_s17 + $0x8] sm:$0xff] }
 0x8ab   : > { %10267 = vmatprep.subr.bf16.mxu0 %v12092_v20 }
 0x8ad   : > { %10293 = vmatpush3.bf16.msra.mxu1 %v12094_v42 }
 0x8ae   : > { %10269 = vmatpush1.bf16.msra.mxu0 %v12096_v39  ;;  %10302 = vmatprep.subr.bf16.mxu1 %v11453_v0 }
 0x8b0   : > { %9098 = vmatmul.mubr.f32.vlgmr.msra.gmra.mrb[28].mxu1 %v2657_v18 }
 0x8b1   : > { %2723 = vmatmul.mubr.f32.vlgmr.msra.gmra.mrb[28].mxu0 %v2657_v18  ;;  %9108 = vmatprep.mubr.msk.f32.mxu1 %vm11457_vm0, %v11456_v6 }
 0x8b2   : > { %2948 = vmatprep.mubr.f32.mxu0 %v11456_v6 }
 0x943   : > { %v2511_v21 = vpop.f32.mrb[24].mxu1 }
 0x944   : > { %2803 = vrot.lane.b32.xlu0 %v2511_v21, %s11459_s26  ;;  %v2440_v24 = vpop.f32.mrb[24].mxu0  ;;  %v9029_v25 = vpop.f32.mrb[25].mxu1 }
 0x945   : > { %v2442_v28 = vpop.f32.mrb[25].mxu0 }
 0x946   : > { %2801 = vrot.lane.b32.xlu1 %v2442_v28, %s11459_s26 }
 0x948   : > { %2799 = vrot.lane.b32.xlu0 %v2440_v24, %s11459_s26 }
 0x963   : > { %v2653_v29 = vpop.f32.mrb[26].mxu1 }
 0x964   : > { %v2582_v34 = vpop.f32.mrb[26].mxu0  ;;  %v9064_v35 = vpop.f32.mrb[27].mxu1 }
 0x965   : > { %v2584_v36 = vpop.f32.mrb[27].mxu0 }
 0x983   : > { %v2795_v49 = vpop.f32.mrb[28].mxu1 }
 0x984   : > { %v2724_v50 = vpop.f32.mrb[28].mxu0  ;;  %v9099_v51 = vpop.f32.mrb[29].mxu1 }
 0x985   : > { %2811 = vrot.lane.b32.xlu1 %v2724_v50, %s11460_s27  ;;  %v2726_v43 = vpop.f32.mrb[29].mxu0 }
 0x986   : > { %2813 = vrot.lane.b32.xlu0 %v2726_v43, %s11460_s27 }
 0x989   : > { %2815 = vrot.lane.b32.xlu1 %v2795_v49, %s11460_s27 }
 0x9b6   : > { %v2804_v57 = vpop.permute.xlu0 %2803 }
 0x9b8   : > { %v2802_v4 = vpop.permute.xlu1 %2801 }
 0x9b9   : > { %v2805_v61 = vsel %vm663_vm4, %v2802_v4, %v2804_v57 }
 0x9ba   : > { %v2800_v58 = vpop.permute.xlu0 %2799  ;;  %v2810_v12 = vadd.f32 %v2805_v61, %v2653_v29 }
 0x9bb   : > { %v2807_v5 = vsel %vm663_vm4, %v2804_v57, %v2800_v58  ;;  %v2806_v62 = vsel %vm663_vm4, %v2800_v58, %v2802_v4  ;;  %v2880_v58 = vld [vmem:[%s13616_s1 + $0x78] sm:$0xff]  ;;  %v3025_v4 = vld [vmem:[%s13616_s1 + $0x80] sm:$0xff] }
 0x9bc   : > { %v2808_v63 = vadd.f32 %v2807_v5, %v2582_v34  ;;  %v2809_v13 = vadd.f32 %v2806_v62, %v2584_v36  ;;  %v3170_v5 = vld [vmem:[%s13616_s1 + $0x88] sm:$0xff] }
 0x9f7   : > { %v2812_v7 = vpop.permute.xlu1 %2811 }
 0x9f8   : > { %v2814_v1 = vpop.permute.xlu0 %2813 }
 0x9f9   : > { %v2818_v2 = vsel %vm676_vm5, %v2812_v7, %v2814_v1 }
 0x9fa   : > { %v2820_v3 = vadd.f32 %v2818_v2, %v2808_v63 }
 0x9fb   : > { %v2816_v15 = vpop.permute.xlu1 %2815 }
 0x9fc   : > { %vm2823_vm12 = vcmp.ge.f32.partialorder %v2820_v3, 0.0  ;;  %v2826_v16 = vmul.f32 0.2, %v2820_v3  ;;  %v2817_v22 = vsel %vm676_vm5, %v2814_v1, %v2816_v15  ;;  %v2819_v23 = vsel %vm676_vm5, %v2816_v15, %v2812_v7 }
 0x9fd   : > { %v2821_v26 = vadd.f32 %v2817_v22, %v2809_v13  ;;  %v2822_v27 = vadd.f32 %v2819_v23, %v2810_v12 }
 0x9fe   : > { %v2829_v30 = vsel %vm2823_vm12, %v2820_v3, %v2826_v16 }
 0x9ff   : > { %v2832_v31 = vmul.f32 %v2829_v30, %v11624_v10  ;;  %vm2824_vm14 = vcmp.ge.f32.partialorder %v2821_v26, 0.0  ;;  %vm2825_vm15 = vcmp.ge.f32.partialorder %v2822_v27, 0.0  ;;  %v2827_v32 = vmul.f32 0.2, %v2821_v26 }
 0xa00   : > { %v2828_v33 = vmul.f32 0.2, %v2822_v27 }
 0xa01   : > { %v2830_v37 = vsel %vm2824_vm14, %v2821_v26, %v2827_v32  ;;  %v2835_v38 = vmul.f32 0.2, %v2832_v31 }
 0xa02   : > { %v2831_v40 = vsel %vm2825_vm15, %v2822_v27, %v2828_v33  ;;  %v2833_v41 = vmul.f32 %v2830_v37, %v11626_v11 }
 0xa03   : > { %v2834_v44 = vmul.f32 %v2831_v40, %v11622_v9  ;;  %v12206_v48 = vadd.f32 %v11439_v47, %v2835_v38 }
 0xa04   : > { %v2836_v45 = vmul.f32 0.2, %v2833_v41 }
 0xa05   : > { %v2837_v46 = vmul.f32 0.2, %v2834_v44 }
 0xa06   : > { %v12209_v53 = vadd.f32 %v11440_v52, %v2836_v45 }
 0xa07   : > { %v12212_v55 = vadd.f32 %v11441_v54, %v2837_v46 }
 0xa08   : > { %v11359_v56 = vpack.i.bf16 %v12209_v53, %v12206_v48 }
 0xa09   : > { %2845 = vrot.lane.b32.xlu1 %v12212_v55, %s11454_s18  ;;  %v11364_v14 = vpack.i.bf16 %v12212_v55, %v12209_v53 }
 0xa0a   : > { %11360 = vrot.lane.b32.xlu0 %v11359_v56, %s11454_s18 }
 0xa0d   : > { %2856 = vrot.lane.b32.xlu1 %v12206_v48, %s11455_s19 }
 0xa0e   : > { %11365 = vrot.lane.b32.xlu0 %v11364_v14, %s11455_s19 }
 0xa7b   : > { %v2846_v19 = vpop.permute.xlu1 %2845 }
 0xa7c   : > { %v11361_v20 = vpop.permute.xlu0 %11360 }
 0xa7d   : > { %v11363_v42 = vunpack.i.h.bf16 %v11361_v20  ;;  %v11362_v39 = vunpack.i.l.bf16 %v11361_v20 }
 0xa7f   : > { %v2847_v59 = vsel %vm186_vm1, %v11363_v42, %v2846_v19  ;;  %v2848_v60 = vsel %vm186_vm1, %v11362_v39, %v11363_v42  ;;  %v2849_v18 = vsel %vm186_vm1, %v2846_v19, %v11362_v39  ;;  %v2857_v35 = vpop.permute.xlu1 %2856 }
 0xa80   : > { %v12231_v21 = vpack.c.bf16 %v2847_v59, %v11458_v17  ;;  %v12234_v24 = vpack.c.bf16 %v2848_v60, %v11458_v17  ;;  %v12237_v25 = vpack.c.bf16 %v2849_v18, %v11458_v17  ;;  %v11366_v28 = vpop.permute.xlu0 %11365 }
 0xa81   : > { %v11368_v29 = vunpack.i.h.bf16 %v11366_v28  ;;  %v11367_v34 = vunpack.i.l.bf16 %v11366_v28 }
 0xa82   : > { %10295 = vmatprep.subr.bf16.mxu0 %v12234_v24  ;;  %10304 = vmatpush3.bf16.msra.mxu1 %v12231_v21 }
 0xa83   : > { %v2864_v36 = vsel %vm202_vm2, %v11368_v29, %v2857_v35  ;;  %v2862_v49 = vsel %vm202_vm2, %v11367_v34, %v11368_v29  ;;  %v2863_v50 = vsel %vm202_vm2, %v2857_v35, %v11367_v34  ;;  %10297 = vmatpush1.bf16.msra.mxu0 %v12237_v25  ;;  %10305 = vmatprep.subr.bf16.mxu1 %v11453_v0 }
 0xa84   : > { %v12250_v51 = vpack.c.bf16 %v2864_v36, %v12212_v55  ;;  %v12253_v43 = vpack.c.bf16 %v2862_v49, %v12209_v53  ;;  %v12256_v57 = vpack.c.bf16 %v2863_v50, %v12206_v48 }
 0xa86   : > { %10299 = vmatprep.subr.bf16.mxu0 %v12253_v43  ;;  %10307 = vmatpush3.bf16.msra.mxu1 %v12250_v51 }
 0xa87   : > { %10301 = vmatpush1.bf16.msra.mxu0 %v12256_v57  ;;  %10316 = vmatprep.subr.bf16.mxu1 %v11453_v0 }
 0xa88   : > { %10309 = vmatprep.subr.bf16.mxu0 %v12234_v24 }
 0xa89   : > { %9109 = vmatmul.mubr.msk.f32.vlgmr.msra.gmra.mrb[30].mxu1 %vm222_vm3, %v2880_v58 }
 0xa8a   : > { %8210 = vmatmul.mubr.msk.f32.vlgmr.msra.gmra.mrb[30].mxu0 %vm222_vm3, %v2880_v58  ;;  %10318 = vmatpush3.bf16.msra.mxu1 %v12231_v21 }
 0xa8b   : > { %10311 = vmatpush1.bf16.msra.mxu0 %v12237_v25  ;;  %10319 = vmatprep.subr.bf16.mxu1 %v11453_v0 }
 0xa8c   : > { %10313 = vmatprep.subr.bf16.mxu0 %v12253_v43  ;;  %3093 = vmatprep.mubr.f32.mxu0 %v11456_v6 }
 0xa8d   : > { %9119 = vmatprep.mubr.msk.f32.mxu1 %vm11457_vm0, %v11456_v6 }
 0xa8e   : > { %10321 = vmatpush3.bf16.msra.mxu1 %v12250_v51 }
 0xa8f   : > { %10315 = vmatpush1.bf16.msra.mxu0 %v12256_v57  ;;  %10330 = vmatprep.subr.bf16.mxu1 %v11453_v0 }
 0xa90   : > { %10323 = vmatprep.subr.bf16.mxu0 %v12234_v24 }
 0xa91   : > { %9120 = vmatmul.mubr.msk.f32.vlgmr.msra.gmra.mrb[32].mxu1 %vm222_vm3, %v3025_v4 }
 0xa92   : > { %8212 = vmatmul.mubr.msk.f32.vlgmr.msra.gmra.mrb[32].mxu0 %vm222_vm3, %v3025_v4  ;;  %10332 = vmatpush3.bf16.msra.mxu1 %v12231_v21 }
 0xa93   : > { %10325 = vmatpush1.bf16.msra.mxu0 %v12237_v25  ;;  %10333 = vmatprep.subr.bf16.mxu1 %v11453_v0 }
 0xa94   : > { %10327 = vmatprep.subr.bf16.mxu0 %v12253_v43  ;;  %3238 = vmatprep.mubr.f32.mxu0 %v11456_v6 }
 0xa95   : > { %9130 = vmatprep.mubr.msk.f32.mxu1 %vm11457_vm0, %v11456_v6 }
 0xa96   : > { %10335 = vmatpush3.bf16.msra.mxu1 %v12250_v51 }
 0xa97   : > { %10329 = vmatpush1.bf16.msra.mxu0 %v12256_v57  ;;  %10348 = vmatprep.subr.bf16.mxu1 %v11453_v0 }
 0xa98   : > { %10337 = vmatprep.subr.bf16.mxu0 %v12234_v24 }
 0xa99   : > { %9131 = vmatmul.mubr.msk.f32.vlgmr.msra.gmra.mrb[34].mxu1 %vm222_vm3, %v3170_v5 }
 0xa9a   : > { %8214 = vmatmul.mubr.msk.f32.vlgmr.msra.gmra.mrb[34].mxu0 %vm222_vm3, %v3170_v5  ;;  %10350 = vmatpush3.bf16.msra.mxu1 %v12231_v21 }
 0xa9b   : > { %10339 = vmatpush1.bf16.msra.mxu0 %v12237_v25  ;;  %10351 = vmatprep.subr.bf16.mxu1 %v11453_v0 }
 0xa9c   : > { %10341 = vmatprep.subr.bf16.mxu0 %v12253_v43  ;;  %9147 = vmatprep.mubr.msk.f32.mxu1 %vm11457_vm0, %v11456_v6 }
 0xa9d   : > { %3467 = vmatprep.mubr.f32.mxu0 %v11456_v6 }
 0xa9e   : > { %10353 = vmatpush3.bf16.msra.mxu1 %v12250_v51 }
 0xa9f   : > { %10343 = vmatpush1.bf16.msra.mxu0 %v12256_v57  ;;  %10354 = vmatprep.subr.bf16.mxu1 %v11453_v0 }
 0xb5c   : > { %v3021_v7 = vpop.f32.mrb[30].mxu1 }
 0xb5d   : > { %3319 = vrot.lane.b32.xlu0 %v3021_v7, %s11459_s26  ;;  %v2950_v61 = vpop.f32.mrb[30].mxu0  ;;  %v9110_v62 = vpop.f32.mrb[31].mxu1 }
 0xb5e   : > { %v2952_v63 = vpop.f32.mrb[31].mxu0 }
 0xb5f   : > { %3317 = vrot.lane.b32.xlu1 %v2952_v63, %s11459_s26 }
 0xb61   : > { %3315 = vrot.lane.b32.xlu0 %v2950_v61, %s11459_s26 }
 0xb64   : > { %v3166_v1 = vpop.f32.mrb[32].mxu1 }
 0xb65   : > { %v3095_v2 = vpop.f32.mrb[32].mxu0  ;;  %v9121_v3 = vpop.f32.mrb[33].mxu1 }
 0xb66   : > { %v3097_v12 = vpop.f32.mrb[33].mxu0  ;;  %v3399_v3 = vld [vmem:[%s13616_s1 + $0x90] sm:$0xff] }
 0xb6c   : > { %v3311_v13 = vpop.f32.mrb[34].mxu1 }
 0xb6d   : > { %v3240_v15 = vpop.f32.mrb[34].mxu0  ;;  %v9132_v16 = vpop.f32.mrb[35].mxu1 }
 0xb6e   : > { %3327 = vrot.lane.b32.xlu1 %v3240_v15, %s11460_s27  ;;  %v3242_v22 = vpop.f32.mrb[35].mxu0  ;;  %v3544_v15 = vld [vmem:[%s13616_s1 + $0x98] sm:$0xff]  ;;  %v3689_v16 = vld [vmem:[%s13616_s1 + $0xa0] sm:$0xff] }
 0xb6f   : > { %3329 = vrot.lane.b32.xlu0 %v3242_v22, %s11460_s27 }
 0xb72   : > { %3331 = vrot.lane.b32.xlu1 %v3311_v13, %s11460_s27 }
 0xbcf   : > { %v3320_v23 = vpop.permute.xlu0 %3319 }
 0xbd1   : > { %v3318_v27 = vpop.permute.xlu1 %3317 }
 0xbd2   : > { %v3321_v32 = vsel %vm663_vm4, %v3318_v27, %v3320_v23 }
 0xbd3   : > { %v3316_v26 = vpop.permute.xlu0 %3315  ;;  %v3326_v44 = vadd.f32 %v3321_v32, %v3166_v1 }
 0xbd4   : > { %v3323_v30 = vsel %vm663_vm4, %v3320_v23, %v3316_v26  ;;  %v3322_v33 = vsel %vm663_vm4, %v3316_v26, %v3318_v27 }
 0xbd5   : > { %v3324_v37 = vadd.f32 %v3323_v30, %v3095_v2  ;;  %v3325_v45 = vadd.f32 %v3322_v33, %v3097_v12 }
 0xbe0   : > { %v3328_v31 = vpop.permute.xlu1 %3327 }
 0xbe1   : > { %v3330_v38 = vpop.permute.xlu0 %3329 }
 0xbe2   : > { %v3334_v40 = vsel %vm676_vm5, %v3328_v31, %v3330_v38 }
 0xbe3   : > { %v3336_v41 = vadd.f32 %v3334_v40, %v3324_v37 }
 0xbe4   : > { %v3332_v46 = vpop.permute.xlu1 %3331 }
 0xbe5   : > { %vm3339_vm6 = vcmp.ge.f32.partialorder %v3336_v41, 0.0  ;;  %v3342_v47 = vmul.f32 0.2, %v3336_v41  ;;  %v3333_v52 = vsel %vm676_vm5, %v3330_v38, %v3332_v46  ;;  %v3335_v54 = vsel %vm676_vm5, %v3332_v46, %v3328_v31 }
 0xbe6   : > { %v3337_v56 = vadd.f32 %v3333_v52, %v3325_v45  ;;  %v3338_v14 = vadd.f32 %v3335_v54, %v3326_v44 }
 0xbe7   : > { %v3345_v19 = vsel %vm3339_vm6, %v3336_v41, %v3342_v47 }
 0xbe8   : > { %vm3340_vm8 = vcmp.ge.f32.partialorder %v3337_v56, 0.0  ;;  %v3343_v20 = vmul.f32 0.2, %v3337_v56  ;;  %v3344_v42 = vmul.f32 0.2, %v3338_v14  ;;  %vm3341_vm10 = vcmp.ge.f32.partialorder %v3338_v14, 0.0 }
 0xbe9   : > { %v3348_v60 = vmul.f32 %v3345_v19, %v11624_v10 }
 0xbea   : > { %v3346_v39 = vsel %vm3340_vm8, %v3337_v56, %v3343_v20  ;;  %v3347_v59 = vsel %vm3341_vm10, %v3338_v14, %v3344_v42 }
 0xbeb   : > { %v3349_v18 = vmul.f32 %v3346_v39, %v11626_v11  ;;  %v3350_v28 = vmul.f32 %v3347_v59, %v11622_v9 }
 0xbed   : > { %3355 = vrot.lane.b32.xlu1 %v3350_v28, %s11454_s18  ;;  %v11369_v29 = vpack.i.bf16 %v3349_v18, %v3348_v60 }
 0xbef   : > { %11370 = vrot.lane.b32.xlu0 %v11369_v29, %s11454_s18 }
 0xbf1   : > { %3370 = vrot.lane.b32.xlu1 %v3350_v28, %s11455_s19 }
 0xbf3   : > { %3368 = vrot.lane.b32.xlu0 %v3349_v18, %s11455_s19 }
 0xbf7   : > { %3366 = vrot.lane.b32.xlu0 %v3348_v60, %s11455_s19 }
 0xc5f   : > { %v3356_v34 = vpop.permute.xlu1 %3355 }
 0xc61   : > { %v11371_v35 = vpop.permute.xlu0 %11370 }
 0xc62   : > { %v11373_v36 = vunpack.i.h.bf16 %v11371_v35  ;;  %v11372_v49 = vunpack.i.l.bf16 %v11371_v35 }
 0xc63   : > { %v3371_v63 = vpop.permute.xlu1 %3370 }
 0xc64   : > { %v3357_v50 = vsel %vm186_vm1, %v11373_v36, %v3356_v34  ;;  %v3358_v58 = vsel %vm186_vm1, %v11372_v49, %v11373_v36  ;;  %v3359_v4 = vsel %vm186_vm1, %v3356_v34, %v11372_v49 }
 0xc65   : > { %v12342_v5 = vpack.c.bf16 %v3350_v28, %v3357_v50  ;;  %v12344_v7 = vpack.c.bf16 %v3349_v18, %v3358_v58  ;;  %v12346_v61 = vpack.c.bf16 %v3348_v60, %v3359_v4  ;;  %v3369_v62 = vpop.permute.xlu0 %3368 }
 0xc66   : > { %v12352_v1 = vsel %vm202_vm2, %v3369_v62, %v3371_v63 }
 0xc67   : > { %10345 = vmatprep.subr.bf16.mxu0 %v12344_v7  ;;  %10356 = vmatpush3.bf16.msra.mxu1 %v12342_v5 }
 0xc68   : > { %10347 = vmatpush1.bf16.msra.mxu0 %v12346_v61  ;;  %9145 = vmatprep.subr.mxu1 %v11456_v6 }
 0xc69   : > { %v3367_v2 = vpop.permute.xlu0 %3366  ;;  %3415 = vmatprep.subr.mxu0 %v12352_v1 }
 0xc6a   : > { %v12362_v12 = vsel %vm202_vm2, %v3367_v2, %v3369_v62  ;;  %v12366_v13 = vsel %vm202_vm2, %v3371_v63, %v3367_v2 }
 0xc6b   : > { %9146 = vmatpush3.msra.mxu1 %v12366_v13 }
 0xc6c   : > { %3416 = vmatpush1.msra.mxu0 %v12362_v12  ;;  %9148 = vmatmul.mubr.msk.f32.vlgmr.msra.gmra.mrb[36].mxu1 %vm760_vm9, %v3399_v3 }
 0xc6d   : > { %10369 = vmatprep.subr.bf16.mxu1 %v11453_v0  ;;  %8216 = vmatmul.mubr.msk.f32.vlgmr.msra.gmra.mrb[36].mxu0 %vm760_vm9, %v3399_v3 }
 0xc6e   : > { %10358 = vmatprep.subr.bf16.mxu0 %v12234_v24  ;;  %10371 = vmatpush3.bf16.msra.mxu1 %v12231_v21 }
 0xc6f   : > { %10360 = vmatpush1.bf16.msra.mxu0 %v12237_v25  ;;  %10372 = vmatprep.subr.bf16.mxu1 %v11453_v0 }
 0xc70   : > { %10362 = vmatprep.subr.bf16.mxu0 %v12253_v43  ;;  %3612 = vmatprep.mubr.f32.mxu0 %v11456_v6 }
 0xc71   : > { %9164 = vmatprep.mubr.msk.f32.mxu1 %vm11457_vm0, %v11456_v6 }
 0xc72   : > { %10374 = vmatpush3.bf16.msra.mxu1 %v12250_v51 }
 0xc73   : > { %10364 = vmatpush1.bf16.msra.mxu0 %v12256_v57  ;;  %10375 = vmatprep.subr.bf16.mxu1 %v11453_v0 }
 0xc74   : > { %10366 = vmatprep.subr.bf16.mxu0 %v12344_v7 }
 0xc76   : > { %10377 = vmatpush3.bf16.msra.mxu1 %v12342_v5 }
 0xc77   : > { %10368 = vmatpush1.bf16.msra.mxu0 %v12346_v61  ;;  %9162 = vmatprep.subr.mxu1 %v11456_v6 }
 0xc78   : > { %3560 = vmatprep.subr.mxu0 %v12352_v1 }
 0xc7a   : > { %9163 = vmatpush3.msra.mxu1 %v12366_v13 }
 0xc7b   : > { %3561 = vmatpush1.msra.mxu0 %v12362_v12  ;;  %10390 = vmatprep.subr.bf16.mxu1 %v11453_v0 }
 0xc7c   : > { %8218 = vmatmul.mubr.msk.f32.vlgmr.msra.gmra.mrb[38].mxu0 %vm760_vm9, %v3544_v15  ;;  %9165 = vmatmul.mubr.msk.f32.vlgmr.msra.gmra.mrb[38].mxu1 %vm760_vm9, %v3544_v15 }
 0xc7d   : > { %10379 = vmatprep.subr.bf16.mxu0 %v12234_v24  ;;  %10392 = vmatpush3.bf16.msra.mxu1 %v12231_v21 }
 0xc7e   : > { %10381 = vmatpush1.bf16.msra.mxu0 %v12237_v25  ;;  %10393 = vmatprep.subr.bf16.mxu1 %v11453_v0 }
 0xc7f   : > { %10383 = vmatprep.subr.bf16.mxu0 %v12253_v43  ;;  %3757 = vmatprep.mubr.f32.mxu0 %v11456_v6 }
 0xc80   : > { %9181 = vmatprep.mubr.msk.f32.mxu1 %vm11457_vm0, %v11456_v6 }
 0xc81   : > { %10395 = vmatpush3.bf16.msra.mxu1 %v12250_v51 }
 0xc82   : > { %10385 = vmatpush1.bf16.msra.mxu0 %v12256_v57  ;;  %10396 = vmatprep.subr.bf16.mxu1 %v11453_v0 }
 0xc83   : > { %10387 = vmatprep.subr.bf16.mxu0 %v12344_v7 }
 0xc85   : > { %10398 = vmatpush3.bf16.msra.mxu1 %v12342_v5 }
 0xc86   : > { %10389 = vmatpush1.bf16.msra.mxu0 %v12346_v61  ;;  %9179 = vmatprep.subr.mxu1 %v11456_v6 }
 0xc87   : > { %3705 = vmatprep.subr.mxu0 %v12352_v1 }
 0xc89   : > { %9180 = vmatpush3.msra.mxu1 %v12366_v13 }
 0xc8a   : > { %3706 = vmatpush1.msra.mxu0 %v12362_v12  ;;  %10419 = vmatprep.subr.bf16.mxu1 %v11453_v0 }
 0xc8b   : > { %8220 = vmatmul.mubr.msk.f32.vlgmr.msra.gmra.mrb[40].mxu0 %vm760_vm9, %v3689_v16  ;;  %9182 = vmatmul.mubr.msk.f32.vlgmr.msra.gmra.mrb[40].mxu1 %vm760_vm9, %v3689_v16 }
 0xc8c   : > { %10400 = vmatprep.subr.bf16.mxu0 %v12234_v24  ;;  %10421 = vmatpush3.bf16.msra.mxu1 %v12231_v21 }
 0xc8d   : > { %10402 = vmatpush1.bf16.msra.mxu0 %v12237_v25  ;;  %10422 = vmatprep.subr.bf16.mxu1 %v11453_v0 }
 0xc8e   : > { %10404 = vmatprep.subr.bf16.mxu0 %v12253_v43  ;;  %9204 = vmatprep.mubr.msk.f32.mxu1 %vm11457_vm0, %v11456_v6 }
 0xc8f   : > { %3995 = vmatprep.mubr.f32.mxu0 %v11456_v6 }
 0xc90   : > { %10424 = vmatpush3.bf16.msra.mxu1 %v12250_v51 }
 0xc91   : > { %10406 = vmatpush1.bf16.msra.mxu0 %v12256_v57  ;;  %10425 = vmatprep.subr.bf16.mxu1 %v11453_v0 }
 0xc92   : > { %10408 = vmatprep.subr.bf16.mxu0 %v12344_v7 }
 0xc94   : > { %10427 = vmatpush3.bf16.msra.mxu1 %v12342_v5 }
 0xc95   : > { %10410 = vmatpush1.bf16.msra.mxu0 %v12346_v61  ;;  %10428 = vmatprep.subr.bf16.mxu1 %v11453_v0 }
 0xd3f   : > { %v3540_v22 = vpop.f32.mrb[36].mxu1 }
 0xd40   : > { %3838 = vrot.lane.b32.xlu1 %v3540_v22, %s11459_s26  ;;  %v3469_v23 = vpop.f32.mrb[36].mxu0  ;;  %v9149_v26 = vpop.f32.mrb[37].mxu1 }
 0xd41   : > { %v3471_v27 = vpop.f32.mrb[37].mxu0 }
 0xd42   : > { %3836 = vrot.lane.b32.xlu0 %v3471_v27, %s11459_s26 }
 0xd44   : > { %3834 = vrot.lane.b32.xlu1 %v3469_v23, %s11459_s26 }
 0xd4f   : > { %v3614_v30 = vpop.f32.mrb[38].mxu0  ;;  %v3685_v31 = vpop.f32.mrb[38].mxu1 }
 0xd50   : > { %v3616_v32 = vpop.f32.mrb[39].mxu0  ;;  %v9166_v33 = vpop.f32.mrb[39].mxu1 }
 0xd5e   : > { %v3759_v37 = vpop.f32.mrb[40].mxu0  ;;  %v3830_v38 = vpop.f32.mrb[40].mxu1 }
 0xd5f   : > { %3846 = vrot.lane.b32.xlu0 %v3759_v37, %s11460_s27  ;;  %v3761_v40 = vpop.f32.mrb[41].mxu0  ;;  %v9183_v41 = vpop.f32.mrb[41].mxu1 }
 0xd60   : > { %3848 = vrot.lane.b32.xlu1 %v3761_v40, %s11460_s27 }
 0xd63   : > { %3850 = vrot.lane.b32.xlu0 %v3830_v38, %s11460_s27 }
 0xdb2   : > { %v3839_v44 = vpop.permute.xlu1 %3838 }
 0xdb4   : > { %v3837_v46 = vpop.permute.xlu0 %3836 }
 0xdb5   : > { %v3840_v54 = vsel %vm663_vm4, %v3837_v46, %v3839_v44 }
 0xdb6   : > { %v3835_v45 = vpop.permute.xlu1 %3834  ;;  %v3845_v39 = vadd.f32 %v3840_v54, %v3685_v31  ;;  %v4072_v54 = vld [vmem:[%s13616_s1 + $0xb0] sm:$0xff] }
 0xdb7   : > { %v3842_v47 = vsel %vm663_vm4, %v3839_v44, %v3835_v45  ;;  %v3841_v56 = vsel %vm663_vm4, %v3835_v45, %v3837_v46 }
 0xdb8   : > { %v3843_v14 = vadd.f32 %v3842_v47, %v3614_v30  ;;  %v3844_v59 = vadd.f32 %v3841_v56, %v3616_v32  ;;  %v4217_v56 = vld [vmem:[%s13616_s1 + $0xb8] sm:$0xff] }
 0xdd1   : > { %v3847_v52 = vpop.permute.xlu0 %3846 }
 0xdd2   : > { %v3849_v19 = vpop.permute.xlu1 %3848 }
 0xdd3   : > { %v3853_v20 = vsel %vm676_vm5, %v3847_v52, %v3849_v19 }
 0xdd4   : > { %v3855_v42 = vadd.f32 %v3853_v20, %v3843_v14 }
 0xdd5   : > { %v3851_v60 = vpop.permute.xlu0 %3850 }
 0xdd6   : > { %vm3858_vm11 = vcmp.ge.f32.partialorder %v3855_v42, 0.0  ;;  %v3861_v18 = vmul.f32 0.2, %v3855_v42  ;;  %v3852_v28 = vsel %vm676_vm5, %v3849_v19, %v3851_v60  ;;  %v3854_v29 = vsel %vm676_vm5, %v3851_v60, %v3847_v52  ;;  %v3927_v52 = vld [vmem:[%s13616_s1 + $0xa8] sm:$0xff] }
 0xdd7   : > { %v3856_v34 = vadd.f32 %v3852_v28, %v3844_v59  ;;  %v3857_v35 = vadd.f32 %v3854_v29, %v3845_v39 }
 0xdd8   : > { %v3864_v36 = vsel %vm3858_vm11, %v3855_v42, %v3861_v18 }
 0xdd9   : > { %vm3859_vm12 = vcmp.ge.f32.partialorder %v3856_v34, 0.0  ;;  %v3862_v49 = vmul.f32 0.2, %v3856_v34  ;;  %v3863_v50 = vmul.f32 0.2, %v3857_v35  ;;  %vm3860_vm14 = vcmp.ge.f32.partialorder %v3857_v35, 0.0 }
 0xdda   : > { %v3867_v62 = vmul.f32 %v3864_v36, %v11624_v10 }
 0xddb   : > { %v3865_v58 = vsel %vm3859_vm12, %v3856_v34, %v3862_v49  ;;  %v3866_v4 = vsel %vm3860_vm14, %v3857_v35, %v3863_v50 }
 0xddc   : > { %v3868_v63 = vmul.f32 %v3865_v58, %v11626_v11  ;;  %v3869_v2 = vmul.f32 %v3866_v4, %v11622_v9 }
 0xdde   : > { %3874 = vrot.lane.b32.xlu0 %v3869_v2, %s11454_s18  ;;  %v11374_v3 = vpack.i.bf16 %v3868_v63, %v3867_v62  ;;  %v11379_v15 = vpack.i.bf16 %v3869_v2, %v3868_v63 }
 0xde0   : > { %11375 = vrot.lane.b32.xlu1 %v11374_v3, %s11454_s18 }
 0xde2   : > { %3885 = vrot.lane.b32.xlu0 %v3867_v62, %s11455_s19 }
 0xde4   : > { %11380 = vrot.lane.b32.xlu1 %v11379_v15, %s11455_s19 }
 0xe50   : > { %v3875_v16 = vpop.permute.xlu0 %3874 }
 0xe52   : > { %v11376_v22 = vpop.permute.xlu1 %11375 }
 0xe53   : > { %v11378_v23 = vunpack.i.h.bf16 %v11376_v22  ;;  %v11377_v26 = vunpack.i.l.bf16 %v11376_v22 }
 0xe54   : > { %v3886_v44 = vpop.permute.xlu0 %3885 }
 0xe55   : > { %v3876_v27 = vsel %vm186_vm1, %v11378_v23, %v3875_v16  ;;  %v3877_v30 = vsel %vm186_vm1, %v11377_v26, %v11378_v23  ;;  %v3878_v31 = vsel %vm186_vm1, %v3875_v16, %v11377_v26 }
 0xe56   : > { %v12468_v32 = vpack.c.bf16 %v3876_v27, %v12366_v13  ;;  %v12471_v33 = vpack.c.bf16 %v3877_v30, %v12352_v1  ;;  %v12474_v37 = vpack.c.bf16 %v3878_v31, %v12362_v12  ;;  %v11381_v38 = vpop.permute.xlu1 %11380 }
 0xe57   : > { %v11383_v40 = vunpack.i.h.bf16 %v11381_v38  ;;  %v11382_v41 = vunpack.i.l.bf16 %v11381_v38 }
 0xe58   : > { %10412 = vmatprep.subr.bf16.mxu0 %v12471_v33  ;;  %10430 = vmatpush3.bf16.msra.mxu1 %v12468_v32 }
 0xe59   : > { %v3893_v45 = vsel %vm202_vm2, %v11383_v40, %v3886_v44  ;;  %v3891_v13 = vsel %vm202_vm2, %v11382_v41, %v11383_v40  ;;  %v3892_v1 = vsel %vm202_vm2, %v3886_v44, %v11382_v41  ;;  %10414 = vmatpush1.bf16.msra.mxu0 %v12474_v37  ;;  %10431 = vmatprep.subr.bf16.mxu1 %v11453_v0 }
 0xe5a   : > { %v12486_v12 = vpack.c.bf16 %v3893_v45, %v3869_v2  ;;  %v12488_v46 = vpack.c.bf16 %v3891_v13, %v3868_v63  ;;  %v12490_v47 = vpack.c.bf16 %v3892_v1, %v3867_v62 }
 0xe5c   : > { %10416 = vmatprep.subr.bf16.mxu0 %v12488_v46  ;;  %10433 = vmatpush3.bf16.msra.mxu1 %v12486_v12 }
 0xe5d   : > { %10418 = vmatpush1.bf16.msra.mxu0 %v12490_v47  ;;  %10454 = vmatprep.subr.bf16.mxu1 %v11453_v0 }
 0xe5e   : > { %10435 = vmatprep.subr.bf16.mxu0 %v12234_v24 }
 0xe5f   : > { %9205 = vmatmul.mubr.msk.f32.vlgmr.msra.gmra.mrb[42].mxu1 %vm1289_vm13, %v3927_v52 }
 0xe60   : > { %8222 = vmatmul.mubr.msk.f32.vlgmr.msra.gmra.mrb[42].mxu0 %vm1289_vm13, %v3927_v52  ;;  %10456 = vmatpush3.bf16.msra.mxu1 %v12231_v21 }
 0xe61   : > { %10437 = vmatpush1.bf16.msra.mxu0 %v12237_v25  ;;  %10457 = vmatprep.subr.bf16.mxu1 %v11453_v0 }
 0xe62   : > { %10439 = vmatprep.subr.bf16.mxu0 %v12253_v43  ;;  %4140 = vmatprep.mubr.f32.mxu0 %v11456_v6 }
 0xe63   : > { %9227 = vmatprep.mubr.msk.f32.mxu1 %vm11457_vm0, %v11456_v6 }
 0xe64   : > { %10459 = vmatpush3.bf16.msra.mxu1 %v12250_v51 }
 0xe65   : > { %10441 = vmatpush1.bf16.msra.mxu0 %v12256_v57  ;;  %10460 = vmatprep.subr.bf16.mxu1 %v11453_v0 }
 0xe66   : > { %10443 = vmatprep.subr.bf16.mxu0 %v12344_v7 }
 0xe68   : > { %10462 = vmatpush3.bf16.msra.mxu1 %v12342_v5 }
 0xe69   : > { %10445 = vmatpush1.bf16.msra.mxu0 %v12346_v61  ;;  %10463 = vmatprep.subr.bf16.mxu1 %v11453_v0 }
 0xe6a   : > { %10447 = vmatprep.subr.bf16.mxu0 %v12471_v33 }
 0xe6c   : > { %10465 = vmatpush3.bf16.msra.mxu1 %v12468_v32 }
 0xe6d   : > { %10449 = vmatpush1.bf16.msra.mxu0 %v12474_v37  ;;  %10466 = vmatprep.subr.bf16.mxu1 %v11453_v0 }
 0xe6e   : > { %10451 = vmatprep.subr.bf16.mxu0 %v12488_v46 }
 0xe70   : > { %10468 = vmatpush3.bf16.msra.mxu1 %v12486_v12 }
 0xe71   : > { %10453 = vmatpush1.bf16.msra.mxu0 %v12490_v47  ;;  %10489 = vmatprep.subr.bf16.mxu1 %v11453_v0 }
 0xe72   : > { %10470 = vmatprep.subr.bf16.mxu0 %v12234_v24 }
 0xe73   : > { %9228 = vmatmul.mubr.msk.f32.vlgmr.msra.gmra.mrb[44].mxu1 %vm1289_vm13, %v4072_v54 }
 0xe74   : > { %8224 = vmatmul.mubr.msk.f32.vlgmr.msra.gmra.mrb[44].mxu0 %vm1289_vm13, %v4072_v54  ;;  %10491 = vmatpush3.bf16.msra.mxu1 %v12231_v21 }
 0xe75   : > { %10472 = vmatpush1.bf16.msra.mxu0 %v12237_v25  ;;  %10492 = vmatprep.subr.bf16.mxu1 %v11453_v0 }
 0xe76   : > { %10474 = vmatprep.subr.bf16.mxu0 %v12253_v43  ;;  %4285 = vmatprep.mubr.f32.mxu0 %v11456_v6 }
 0xe77   : > { %9250 = vmatprep.mubr.msk.f32.mxu1 %vm11457_vm0, %v11456_v6 }
 0xe78   : > { %10494 = vmatpush3.bf16.msra.mxu1 %v12250_v51 }
 0xe79   : > { %10476 = vmatpush1.bf16.msra.mxu0 %v12256_v57  ;;  %10495 = vmatprep.subr.bf16.mxu1 %v11453_v0 }
 0xe7a   : > { %10478 = vmatprep.subr.bf16.mxu0 %v12344_v7 }
 0xe7c   : > { %10497 = vmatpush3.bf16.msra.mxu1 %v12342_v5 }
 0xe7d   : > { %10480 = vmatpush1.bf16.msra.mxu0 %v12346_v61  ;;  %10498 = vmatprep.subr.bf16.mxu1 %v11453_v0 }
 0xe7e   : > { %10482 = vmatprep.subr.bf16.mxu0 %v12471_v33 }
 0xe80   : > { %10500 = vmatpush3.bf16.msra.mxu1 %v12468_v32 }
 0xe81   : > { %10484 = vmatpush1.bf16.msra.mxu0 %v12474_v37  ;;  %10501 = vmatprep.subr.bf16.mxu1 %v11453_v0 }
 0xe82   : > { %10486 = vmatprep.subr.bf16.mxu0 %v12488_v46 }
 0xe84   : > { %10503 = vmatpush3.bf16.msra.mxu1 %v12486_v12 }
 0xe85   : > { %10488 = vmatpush1.bf16.msra.mxu0 %v12490_v47  ;;  %10528 = vmatprep.subr.bf16.mxu1 %v11453_v0 }
 0xe86   : > { %10505 = vmatprep.subr.bf16.mxu0 %v12234_v24 }
 0xe87   : > { %9251 = vmatmul.mubr.msk.f32.vlgmr.msra.gmra.mrb[46].mxu1 %vm1289_vm13, %v4217_v56 }
 0xe88   : > { %8226 = vmatmul.mubr.msk.f32.vlgmr.msra.gmra.mrb[46].mxu0 %vm1289_vm13, %v4217_v56  ;;  %10530 = vmatpush3.bf16.msra.mxu1 %v12231_v21 }
 0xe89   : > { %10507 = vmatpush1.bf16.msra.mxu0 %v12237_v25  ;;  %10531 = vmatprep.subr.bf16.mxu1 %v11453_v0 }
 0xe8a   : > { %10509 = vmatprep.subr.bf16.mxu0 %v12253_v43  ;;  %9279 = vmatprep.mubr.msk.f32.mxu1 %vm11457_vm0, %v11456_v6 }
 0xe8b   : > { %4532 = vmatprep.mubr.f32.mxu0 %v11456_v6 }
 0xe8c   : > { %10533 = vmatpush3.bf16.msra.mxu1 %v12250_v51 }
 0xe8d   : > { %10511 = vmatpush1.bf16.msra.mxu0 %v12256_v57  ;;  %10534 = vmatprep.subr.bf16.mxu1 %v11453_v0 }
 0xe8e   : > { %10513 = vmatprep.subr.bf16.mxu0 %v12344_v7 }
 0xe90   : > { %10536 = vmatpush3.bf16.msra.mxu1 %v12342_v5 }
 0xe91   : > { %10515 = vmatpush1.bf16.msra.mxu0 %v12346_v61  ;;  %10537 = vmatprep.subr.bf16.mxu1 %v11453_v0 }
 0xe92   : > { %10517 = vmatprep.subr.bf16.mxu0 %v12471_v33 }
 0xe94   : > { %10539 = vmatpush3.bf16.msra.mxu1 %v12468_v32 }
 0xe95   : > { %10519 = vmatpush1.bf16.msra.mxu0 %v12474_v37  ;;  %10540 = vmatprep.subr.bf16.mxu1 %v11453_v0 }
 0xe96   : > { %10521 = vmatprep.subr.bf16.mxu0 %v12488_v46 }
 0xe98   : > { %10542 = vmatpush3.bf16.msra.mxu1 %v12486_v12 }
 0xe99   : > { %10523 = vmatpush1.bf16.msra.mxu0 %v12490_v47  ;;  %10543 = vmatprep.subr.bf16.mxu1 %v11453_v0 }
 0xf32   : > { %v4068_v14 = vpop.f32.mrb[42].mxu1 }
 0xf33   : > { %4366 = vrot.lane.b32.xlu1 %v4068_v14, %s11459_s26  ;;  %v3997_v19 = vpop.f32.mrb[42].mxu0  ;;  %v9206_v20 = vpop.f32.mrb[43].mxu1 }
 0xf34   : > { %v3999_v42 = vpop.f32.mrb[43].mxu0 }
 0xf35   : > { %4364 = vrot.lane.b32.xlu0 %v3999_v42, %s11459_s26 }
 0xf37   : > { %4362 = vrot.lane.b32.xlu1 %v3997_v19, %s11459_s26 }
 0xf46   : > { %v4213_v39 = vpop.f32.mrb[44].mxu1 }
 0xf47   : > { %v4142_v59 = vpop.f32.mrb[44].mxu0  ;;  %v9229_v60 = vpop.f32.mrb[45].mxu1 }
 0xf48   : > { %v4144_v18 = vpop.f32.mrb[45].mxu0 }
 0xf5a   : > { %v4358_v28 = vpop.f32.mrb[46].mxu1 }
 0xf5b   : > { %v4287_v29 = vpop.f32.mrb[46].mxu0  ;;  %v9252_v34 = vpop.f32.mrb[47].mxu1 }
 0xf5c   : > { %4374 = vrot.lane.b32.xlu0 %v4287_v29, %s11460_s27  ;;  %v4289_v35 = vpop.f32.mrb[47].mxu0 }
 0xf5d   : > { %4376 = vrot.lane.b32.xlu1 %v4289_v35, %s11460_s27 }
 0xf60   : > { %4378 = vrot.lane.b32.xlu0 %v4358_v28, %s11460_s27 }
 0xfa5   : > { %v4367_v36 = vpop.permute.xlu1 %4366 }
 0xfa7   : > { %v4365_v50 = vpop.permute.xlu0 %4364 }
 0xfa8   : > { %v4368_v62 = vsel %vm663_vm4, %v4365_v50, %v4367_v36 }
 0xfa9   : > { %v4363_v49 = vpop.permute.xlu1 %4362  ;;  %v4373_v22 = vadd.f32 %v4368_v62, %v4213_v39 }
 0xfaa   : > { %v4370_v58 = vsel %vm663_vm4, %v4367_v36, %v4363_v49  ;;  %v4369_v63 = vsel %vm663_vm4, %v4363_v49, %v4365_v50 }
 0xfab   : > { %v4371_v2 = vadd.f32 %v4370_v58, %v4142_v59  ;;  %v4372_v23 = vadd.f32 %v4369_v63, %v4144_v18  ;;  %v4464_v58 = vld [vmem:[%s13616_s1 + $0xc0] sm:$0xff]  ;;  %v4609_v63 = vld [vmem:[%s13616_s1 + $0xc8] sm:$0xff] }
 0xfce   : > { %v4375_v4 = vpop.permute.xlu0 %4374 }
 0xfcf   : > { %v4377_v3 = vpop.permute.xlu1 %4376 }
 0xfd0   : > { %v4381_v15 = vsel %vm676_vm5, %v4375_v4, %v4377_v3 }
 0xfd1   : > { %v4383_v16 = vadd.f32 %v4381_v15, %v4371_v2  ;;  %v4754_v2 = vld [vmem:[%s13616_s1 + $0xd0] sm:$0xff] }
 0xfd2   : > { %v4379_v26 = vpop.permute.xlu0 %4378 }
 0xfd3   : > { %vm4386_vm15 = vcmp.ge.f32.partialorder %v4383_v16, 0.0  ;;  %v4389_v27 = vmul.f32 0.2, %v4383_v16  ;;  %v4380_v30 = vsel %vm676_vm5, %v4377_v3, %v4379_v26  ;;  %v4382_v31 = vsel %vm676_vm5, %v4379_v26, %v4375_v4 }
 0xfd4   : > { %v4384_v38 = vadd.f32 %v4380_v30, %v4372_v23  ;;  %v4385_v40 = vadd.f32 %v4382_v31, %v4373_v22 }
 0xfd5   : > { %v4392_v41 = vsel %vm4386_vm15, %v4383_v16, %v4389_v27 }
 0xfd6   : > { %vm4387_vm6 = vcmp.ge.f32.partialorder %v4384_v38, 0.0  ;;  %v4390_v44 = vmul.f32 0.2, %v4384_v38  ;;  %v4391_v45 = vmul.f32 0.2, %v4385_v40  ;;  %vm4388_vm8 = vcmp.ge.f32.partialorder %v4385_v40, 0.0 }
 0xfd7   : > { %v4395_v52 = vmul.f32 %v4392_v41, %v11624_v10 }
 0xfd8   : > { %v4393_v13 = vsel %vm4387_vm6, %v4384_v38, %v4390_v44  ;;  %v4394_v1 = vsel %vm4388_vm8, %v4385_v40, %v4391_v45 }
 0xfd9   : > { %v4396_v54 = vmul.f32 %v4393_v13, %v11626_v11  ;;  %v4397_v56 = vmul.f32 %v4394_v1, %v11622_v9 }
 0xfdb   : > { %4402 = vrot.lane.b32.xlu0 %v4397_v56, %s11454_s18  ;;  %v11384_v14 = vpack.i.bf16 %v4396_v54, %v4395_v52 }
 0xfdd   : > { %11385 = vrot.lane.b32.xlu1 %v11384_v14, %s11454_s18 }
 0xfdf   : > { %4417 = vrot.lane.b32.xlu0 %v4397_v56, %s11455_s19 }
 0xfe1   : > { %4415 = vrot.lane.b32.xlu1 %v4396_v54, %s11455_s19 }
 0xfe5   : > { %4413 = vrot.lane.b32.xlu1 %v4395_v52, %s11455_s19 }
0x104d   : > { %v4403_v19 = vpop.permute.xlu0 %4402 }
0x104f   : > { %v11386_v20 = vpop.permute.xlu1 %11385 }
0x1050   : > { %v11388_v42 = vunpack.i.h.bf16 %v11386_v20  ;;  %v11387_v39 = vunpack.i.l.bf16 %v11386_v20 }
0x1051   : > { %v4418_v36 = vpop.permute.xlu0 %4417 }
0x1052   : > { %v4404_v59 = vsel %vm186_vm1, %v11388_v42, %v4403_v19  ;;  %v4405_v60 = vsel %vm186_vm1, %v11387_v39, %v11388_v42  ;;  %v4406_v18 = vsel %vm186_vm1, %v4403_v19, %v11387_v39 }
0x1053   : > { %v12612_v28 = vpack.c.bf16 %v4397_v56, %v4404_v59  ;;  %v12614_v29 = vpack.c.bf16 %v4396_v54, %v4405_v60  ;;  %v12616_v34 = vpack.c.bf16 %v4395_v52, %v4406_v18  ;;  %v4416_v35 = vpop.permute.xlu1 %4415 }
0x1054   : > { %v12622_v49 = vsel %vm202_vm2, %v4416_v35, %v4418_v36 }
0x1055   : > { %10525 = vmatprep.subr.bf16.mxu0 %v12614_v29  ;;  %10545 = vmatpush3.bf16.msra.mxu1 %v12612_v28 }
0x1056   : > { %10527 = vmatpush1.bf16.msra.mxu0 %v12616_v34  ;;  %9277 = vmatprep.subr.mxu1 %v11456_v6 }
0x1057   : > { %v4414_v50 = vpop.permute.xlu1 %4413  ;;  %4492 = vmatprep.subr.mxu0 %v12622_v49 }
0x1058   : > { %v12632_v4 = vsel %vm202_vm2, %v4414_v50, %v4416_v35  ;;  %v12636_v62 = vsel %vm202_vm2, %v4418_v36, %v4414_v50 }
0x1059   : > { %9278 = vmatpush3.msra.mxu1 %v12636_v62 }
0x105a   : > { %4493 = vmatpush1.msra.mxu0 %v12632_v4  ;;  %9280 = vmatmul.mubr.msk.f32.vlgmr.msra.gmra.mrb[48].mxu1 %vm1827_vm7, %v4464_v58 }
0x105b   : > { %10570 = vmatprep.subr.bf16.mxu1 %v11453_v0  ;;  %8228 = vmatmul.mubr.msk.f32.vlgmr.msra.gmra.mrb[48].mxu0 %vm1827_vm7, %v4464_v58 }
0x105c   : > { %10547 = vmatprep.subr.bf16.mxu0 %v12234_v24  ;;  %10572 = vmatpush3.bf16.msra.mxu1 %v12231_v21 }
0x105d   : > { %10549 = vmatpush1.bf16.msra.mxu0 %v12237_v25  ;;  %10573 = vmatprep.subr.bf16.mxu1 %v11453_v0 }
0x105e   : > { %10551 = vmatprep.subr.bf16.mxu0 %v12253_v43  ;;  %4677 = vmatprep.mubr.f32.mxu0 %v11456_v6 }
0x105f   : > { %9308 = vmatprep.mubr.msk.f32.mxu1 %vm11457_vm0, %v11456_v6 }
0x1060   : > { %10575 = vmatpush3.bf16.msra.mxu1 %v12250_v51 }
0x1061   : > { %10553 = vmatpush1.bf16.msra.mxu0 %v12256_v57  ;;  %10576 = vmatprep.subr.bf16.mxu1 %v11453_v0 }
0x1062   : > { %10555 = vmatprep.subr.bf16.mxu0 %v12344_v7 }
0x1064   : > { %10578 = vmatpush3.bf16.msra.mxu1 %v12342_v5 }
0x1065   : > { %10557 = vmatpush1.bf16.msra.mxu0 %v12346_v61  ;;  %10579 = vmatprep.subr.bf16.mxu1 %v11453_v0 }
0x1066   : > { %10559 = vmatprep.subr.bf16.mxu0 %v12471_v33 }
0x1068   : > { %10581 = vmatpush3.bf16.msra.mxu1 %v12468_v32 }
0x1069   : > { %10561 = vmatpush1.bf16.msra.mxu0 %v12474_v37  ;;  %10582 = vmatprep.subr.bf16.mxu1 %v11453_v0 }
0x106a   : > { %10563 = vmatprep.subr.bf16.mxu0 %v12488_v46 }
0x106c   : > { %10584 = vmatpush3.bf16.msra.mxu1 %v12486_v12 }
0x106d   : > { %10565 = vmatpush1.bf16.msra.mxu0 %v12490_v47  ;;  %10585 = vmatprep.subr.bf16.mxu1 %v11453_v0 }
0x106e   : > { %10567 = vmatprep.subr.bf16.mxu0 %v12614_v29 }
0x1070   : > { %10587 = vmatpush3.bf16.msra.mxu1 %v12612_v28 }
0x1071   : > { %10569 = vmatpush1.bf16.msra.mxu0 %v12616_v34  ;;  %9306 = vmatprep.subr.mxu1 %v11456_v6 }
0x1072   : > { %4637 = vmatprep.subr.mxu0 %v12622_v49 }
0x1074   : > { %9307 = vmatpush3.msra.mxu1 %v12636_v62 }
0x1075   : > { %4638 = vmatpush1.msra.mxu0 %v12632_v4  ;;  %10612 = vmatprep.subr.bf16.mxu1 %v11453_v0 }
0x1076   : > { %8230 = vmatmul.mubr.msk.f32.vlgmr.msra.gmra.mrb[50].mxu0 %vm1827_vm7, %v4609_v63  ;;  %9309 = vmatmul.mubr.msk.f32.vlgmr.msra.gmra.mrb[50].mxu1 %vm1827_vm7, %v4609_v63 }
0x1077   : > { %10589 = vmatprep.subr.bf16.mxu0 %v12234_v24  ;;  %10614 = vmatpush3.bf16.msra.mxu1 %v12231_v21 }
0x1078   : > { %10591 = vmatpush1.bf16.msra.mxu0 %v12237_v25  ;;  %10615 = vmatprep.subr.bf16.mxu1 %v11453_v0 }
0x1079   : > { %10593 = vmatprep.subr.bf16.mxu0 %v12253_v43  ;;  %4822 = vmatprep.mubr.f32.mxu0 %v11456_v6 }
0x107a   : > { %9337 = vmatprep.mubr.msk.f32.mxu1 %vm11457_vm0, %v11456_v6 }
0x107b   : > { %10617 = vmatpush3.bf16.msra.mxu1 %v12250_v51 }
0x107c   : > { %10595 = vmatpush1.bf16.msra.mxu0 %v12256_v57  ;;  %10618 = vmatprep.subr.bf16.mxu1 %v11453_v0 }
0x107d   : > { %10597 = vmatprep.subr.bf16.mxu0 %v12344_v7 }
0x107f   : > { %10620 = vmatpush3.bf16.msra.mxu1 %v12342_v5 }
0x1080   : > { %10599 = vmatpush1.bf16.msra.mxu0 %v12346_v61  ;;  %10621 = vmatprep.subr.bf16.mxu1 %v11453_v0 }
0x1081   : > { %10601 = vmatprep.subr.bf16.mxu0 %v12471_v33 }
0x1083   : > { %10623 = vmatpush3.bf16.msra.mxu1 %v12468_v32 }
0x1084   : > { %10603 = vmatpush1.bf16.msra.mxu0 %v12474_v37  ;;  %10624 = vmatprep.subr.bf16.mxu1 %v11453_v0 }
0x1085   : > { %10605 = vmatprep.subr.bf16.mxu0 %v12488_v46 }
0x1087   : > { %10626 = vmatpush3.bf16.msra.mxu1 %v12486_v12 }
0x1088   : > { %10607 = vmatpush1.bf16.msra.mxu0 %v12490_v47  ;;  %10627 = vmatprep.subr.bf16.mxu1 %v11453_v0 }
0x1089   : > { %10609 = vmatprep.subr.bf16.mxu0 %v12614_v29 }
0x108b   : > { %10629 = vmatpush3.bf16.msra.mxu1 %v12612_v28 }
0x108c   : > { %10611 = vmatpush1.bf16.msra.mxu0 %v12616_v34  ;;  %9335 = vmatprep.subr.mxu1 %v11456_v6 }
0x108d   : > { %4782 = vmatprep.subr.mxu0 %v12622_v49 }
0x108f   : > { %9336 = vmatpush3.msra.mxu1 %v12636_v62 }
0x1090   : > { %4783 = vmatpush1.msra.mxu0 %v12632_v4  ;;  %10662 = vmatprep.subr.bf16.mxu1 %v11453_v0 }
0x1091   : > { %8232 = vmatmul.mubr.msk.f32.vlgmr.msra.gmra.mrb[52].mxu0 %vm1827_vm7, %v4754_v2  ;;  %9338 = vmatmul.mubr.msk.f32.vlgmr.msra.gmra.mrb[52].mxu1 %vm1827_vm7, %v4754_v2 }
0x1092   : > { %10631 = vmatprep.subr.bf16.mxu0 %v12234_v24  ;;  %10664 = vmatpush3.bf16.msra.mxu1 %v12231_v21 }
0x1093   : > { %10633 = vmatpush1.bf16.msra.mxu0 %v12237_v25  ;;  %10665 = vmatprep.subr.bf16.mxu1 %v11453_v0 }
0x1094   : > { %10635 = vmatprep.subr.bf16.mxu0 %v12253_v43  ;;  %9372 = vmatprep.mubr.msk.f32.mxu1 %vm11457_vm0, %v11456_v6 }
0x1095   : > { %5075 = vmatprep.mubr.f32.mxu0 %v11456_v6 }
0x1096   : > { %10667 = vmatpush3.bf16.msra.mxu1 %v12250_v51 }
0x1097   : > { %10637 = vmatpush1.bf16.msra.mxu0 %v12256_v57  ;;  %10668 = vmatprep.subr.bf16.mxu1 %v11453_v0 }
0x1098   : > { %10639 = vmatprep.subr.bf16.mxu0 %v12344_v7 }
0x109a   : > { %10670 = vmatpush3.bf16.msra.mxu1 %v12342_v5 }
0x109b   : > { %10641 = vmatpush1.bf16.msra.mxu0 %v12346_v61  ;;  %10671 = vmatprep.subr.bf16.mxu1 %v11453_v0 }
0x109c   : > { %10643 = vmatprep.subr.bf16.mxu0 %v12471_v33 }
0x109e   : > { %10673 = vmatpush3.bf16.msra.mxu1 %v12468_v32 }
0x109f   : > { %10645 = vmatpush1.bf16.msra.mxu0 %v12474_v37  ;;  %10674 = vmatprep.subr.bf16.mxu1 %v11453_v0 }
0x10a0   : > { %10647 = vmatprep.subr.bf16.mxu0 %v12488_v46 }
0x10a2   : > { %10676 = vmatpush3.bf16.msra.mxu1 %v12486_v12 }
0x10a3   : > { %10649 = vmatpush1.bf16.msra.mxu0 %v12490_v47  ;;  %10677 = vmatprep.subr.bf16.mxu1 %v11453_v0 }
0x10a4   : > { %10651 = vmatprep.subr.bf16.mxu0 %v12614_v29 }
0x10a6   : > { %10679 = vmatpush3.bf16.msra.mxu1 %v12612_v28 }
0x10a7   : > { %10653 = vmatpush1.bf16.msra.mxu0 %v12616_v34  ;;  %10680 = vmatprep.subr.bf16.mxu1 %v11453_v0 }
0x112d   : > { %v4605_v3 = vpop.f32.mrb[48].mxu1 }
0x112e   : > { %4903 = vrot.lane.b32.xlu0 %v4605_v3, %s11459_s26  ;;  %v4534_v15 = vpop.f32.mrb[48].mxu0  ;;  %v9281_v16 = vpop.f32.mrb[49].mxu1 }
0x112f   : > { %v4536_v22 = vpop.f32.mrb[49].mxu0 }
0x1130   : > { %4901 = vrot.lane.b32.xlu1 %v4536_v22, %s11459_s26 }
0x1132   : > { %4899 = vrot.lane.b32.xlu0 %v4534_v15, %s11459_s26 }
0x1149   : > { %v4679_v23 = vpop.f32.mrb[50].mxu0  ;;  %v4750_v26 = vpop.f32.mrb[50].mxu1 }
0x114a   : > { %v4681_v27 = vpop.f32.mrb[51].mxu0  ;;  %v9310_v30 = vpop.f32.mrb[51].mxu1 }
0x1164   : > { %v4824_v31 = vpop.f32.mrb[52].mxu0  ;;  %v4895_v38 = vpop.f32.mrb[52].mxu1 }
0x1165   : > { %4911 = vrot.lane.b32.xlu1 %v4824_v31, %s11460_s27  ;;  %v4826_v40 = vpop.f32.mrb[53].mxu0  ;;  %v9339_v41 = vpop.f32.mrb[53].mxu1 }
0x1166   : > { %4913 = vrot.lane.b32.xlu0 %v4826_v40, %s11460_s27 }
0x1169   : > { %4915 = vrot.lane.b32.xlu1 %v4895_v38, %s11460_s27 }
0x11a0   : > { %v4904_v44 = vpop.permute.xlu0 %4903 }
0x11a2   : > { %v4902_v13 = vpop.permute.xlu1 %4901 }
0x11a3   : > { %v4905_v54 = vsel %vm663_vm4, %v4902_v13, %v4904_v44 }
0x11a4   : > { %v4900_v45 = vpop.permute.xlu0 %4899  ;;  %v4910_v39 = vadd.f32 %v4905_v54, %v4750_v26 }
0x11a5   : > { %v4907_v1 = vsel %vm663_vm4, %v4904_v44, %v4900_v45  ;;  %v4906_v56 = vsel %vm663_vm4, %v4900_v45, %v4902_v13 }
0x11a6   : > { %v4908_v14 = vadd.f32 %v4907_v1, %v4679_v23  ;;  %v4909_v59 = vadd.f32 %v4906_v56, %v4681_v27 }
0x11d7   : > { %v4912_v52 = vpop.permute.xlu1 %4911 }
0x11d8   : > { %v4914_v19 = vpop.permute.xlu0 %4913 }
0x11d9   : > { %v4918_v20 = vsel %vm676_vm5, %v4912_v52, %v4914_v19 }
0x11da   : > { %v4920_v42 = vadd.f32 %v4918_v20, %v4908_v14 }
0x11db   : > { %v4916_v60 = vpop.permute.xlu1 %4915 }
0x11dc   : > { %vm4923_vm10 = vcmp.ge.f32.partialorder %v4920_v42, 0.0  ;;  %v4926_v18 = vmul.f32 0.2, %v4920_v42  ;;  %v4917_v35 = vsel %vm676_vm5, %v4914_v19, %v4916_v60  ;;  %v4919_v36 = vsel %vm676_vm5, %v4916_v60, %v4912_v52  ;;  %v5010_v60 = vld [vmem:[%s13616_s1 + $0xd8] sm:$0xff] }
0x11dd   : > { %v4921_v50 = vadd.f32 %v4917_v35, %v4909_v59  ;;  %v4922_v58 = vadd.f32 %v4919_v36, %v4910_v39 }
0x11de   : > { %v4929_v63 = vsel %vm4923_vm10, %v4920_v42, %v4926_v18  ;;  %v5152_v18 = vld [vmem:[%s13616_s1 + $0xe0] sm:$0xff] }
0x11df   : > { %vm4924_vm11 = vcmp.ge.f32.partialorder %v4921_v50, 0.0  ;;  %v4927_v2 = vmul.f32 0.2, %v4921_v50  ;;  %v4928_v3 = vmul.f32 0.2, %v4922_v58  ;;  %vm4925_vm12 = vcmp.ge.f32.partialorder %v4922_v58, 0.0 }
0x11e0   : > { %v4932_v22 = vmul.f32 %v4929_v63, %v11624_v10 }
0x11e1   : > { %v4930_v15 = vsel %vm4924_vm11, %v4921_v50, %v4927_v2  ;;  %v4931_v16 = vsel %vm4925_vm12, %v4922_v58, %v4928_v3 }
0x11e2   : > { %v4933_v23 = vmul.f32 %v4930_v15, %v11626_v11  ;;  %v4934_v26 = vmul.f32 %v4931_v16, %v11622_v9 }
0x11e4   : > { %4939 = vrot.lane.b32.xlu1 %v4934_v26, %s11454_s18  ;;  %v11389_v27 = vpack.i.bf16 %v4933_v23, %v4932_v22  ;;  %v11394_v30 = vpack.i.bf16 %v4934_v26, %v4933_v23 }
0x11e6   : > { %11390 = vrot.lane.b32.xlu0 %v11389_v27, %s11454_s18 }
0x11e8   : > { %4950 = vrot.lane.b32.xlu1 %v4932_v22, %s11455_s19 }
0x11ea   : > { %11395 = vrot.lane.b32.xlu0 %v11394_v30, %s11455_s19 }
0x1256   : > { %v4940_v31 = vpop.permute.xlu1 %4939 }
0x1258   : > { %v11391_v38 = vpop.permute.xlu0 %11390 }
0x1259   : > { %v11393_v40 = vunpack.i.h.bf16 %v11391_v38  ;;  %v11392_v41 = vunpack.i.l.bf16 %v11391_v38 }
0x125a   : > { %v4951_v20 = vpop.permute.xlu1 %4950 }
0x125b   : > { %v4941_v44 = vsel %vm186_vm1, %v11393_v40, %v4940_v31  ;;  %v4943_v45 = vsel %vm186_vm1, %v4940_v31, %v11392_v41  ;;  %v4942_v13 = vsel %vm186_vm1, %v11392_v41, %v11393_v40 }
0x125c   : > { %v12774_v1 = vpack.c.bf16 %v4941_v44, %v12636_v62  ;;  %v12777_v52 = vpack.c.bf16 %v4943_v45, %v12632_v4  ;;  %v11396_v54 = vpop.permute.xlu0 %11395  ;;  %v12780_v56 = vpack.c.bf16 %v4942_v13, %v12622_v49 }
0x125d   : > { %v11398_v14 = vunpack.i.h.bf16 %v11396_v54  ;;  %v11397_v19 = vunpack.i.l.bf16 %v11396_v54 }
0x125e   : > { %10655 = vmatprep.subr.bf16.mxu0 %v12780_v56  ;;  %10682 = vmatpush3.bf16.msra.mxu1 %v12774_v1 }
0x125f   : > { %v4958_v42 = vsel %vm202_vm2, %v11398_v14, %v4951_v20  ;;  %v4957_v62 = vsel %vm202_vm2, %v4951_v20, %v11397_v19  ;;  %10657 = vmatpush1.bf16.msra.mxu0 %v12777_v52  ;;  %10683 = vmatprep.subr.bf16.mxu1 %v11453_v0  ;;  %v4956_v49 = vsel %vm202_vm2, %v11397_v19, %v11398_v14 }
0x1260   : > { %v12792_v4 = vpack.c.bf16 %v4958_v42, %v4934_v26  ;;  %v12794_v39 = vpack.c.bf16 %v4957_v62, %v4932_v22  ;;  %v12796_v59 = vpack.c.bf16 %v4956_v49, %v4933_v23 }
0x1262   : > { %10659 = vmatprep.subr.bf16.mxu0 %v12796_v59  ;;  %10685 = vmatpush3.bf16.msra.mxu1 %v12792_v4 }
0x1263   : > { %10661 = vmatpush1.bf16.msra.mxu0 %v12794_v39  ;;  %10718 = vmatprep.subr.bf16.mxu1 %v11453_v0 }
0x1264   : > { %10687 = vmatprep.subr.bf16.mxu0 %v12234_v24 }
0x1265   : > { %9373 = vmatmul.mubr.f32.vlgmr.msra.gmra.mrb[54].mxu1 %v5010_v60 }
0x1266   : > { %5076 = vmatmul.mubr.f32.vlgmr.msra.gmra.mrb[54].mxu0 %v5010_v60  ;;  %10720 = vmatpush3.bf16.msra.mxu1 %v12231_v21 }
0x1267   : > { %10689 = vmatpush1.bf16.msra.mxu0 %v12237_v25  ;;  %10721 = vmatprep.subr.bf16.mxu1 %v11453_v0 }
0x1268   : > { %10691 = vmatprep.subr.bf16.mxu0 %v12253_v43  ;;  %5217 = vmatprep.mubr.f32.mxu0 %v11456_v6 }
0x1269   : > { %9407 = vmatprep.mubr.msk.f32.mxu1 %vm11457_vm0, %v11456_v6 }
0x126a   : > { %10723 = vmatpush3.bf16.msra.mxu1 %v12250_v51 }
0x126b   : > { %10693 = vmatpush1.bf16.msra.mxu0 %v12256_v57  ;;  %10724 = vmatprep.subr.bf16.mxu1 %v11453_v0 }
0x126c   : > { %10695 = vmatprep.subr.bf16.mxu0 %v12344_v7 }
0x126e   : > { %10726 = vmatpush3.bf16.msra.mxu1 %v12342_v5 }
0x126f   : > { %10697 = vmatpush1.bf16.msra.mxu0 %v12346_v61  ;;  %10727 = vmatprep.subr.bf16.mxu1 %v11453_v0 }
0x1270   : > { %10699 = vmatprep.subr.bf16.mxu0 %v12471_v33 }
0x1272   : > { %10729 = vmatpush3.bf16.msra.mxu1 %v12468_v32 }
0x1273   : > { %10701 = vmatpush1.bf16.msra.mxu0 %v12474_v37  ;;  %10730 = vmatprep.subr.bf16.mxu1 %v11453_v0 }
0x1274   : > { %10703 = vmatprep.subr.bf16.mxu0 %v12488_v46 }
0x1276   : > { %10732 = vmatpush3.bf16.msra.mxu1 %v12486_v12 }
0x1277   : > { %10705 = vmatpush1.bf16.msra.mxu0 %v12490_v47  ;;  %10733 = vmatprep.subr.bf16.mxu1 %v11453_v0 }
0x1278   : > { %10707 = vmatprep.subr.bf16.mxu0 %v12614_v29 }
0x127a   : > { %10735 = vmatpush3.bf16.msra.mxu1 %v12612_v28 }
0x127b   : > { %10709 = vmatpush1.bf16.msra.mxu0 %v12616_v34  ;;  %10736 = vmatprep.subr.bf16.mxu1 %v11453_v0 }
0x127c   : > { %10711 = vmatprep.subr.bf16.mxu0 %v12780_v56 }
0x127e   : > { %10738 = vmatpush3.bf16.msra.mxu1 %v12774_v1 }
0x127f   : > { %10713 = vmatpush1.bf16.msra.mxu0 %v12777_v52  ;;  %10739 = vmatprep.subr.bf16.mxu1 %v11453_v0 }
0x1280   : > { %10715 = vmatprep.subr.bf16.mxu0 %v12796_v59 }
0x1282   : > { %10741 = vmatpush3.bf16.msra.mxu1 %v12792_v4 }
0x1283   : > { %10717 = vmatpush1.bf16.msra.mxu0 %v12794_v39  ;;  %10774 = vmatprep.subr.bf16.mxu1 %v11453_v0 }
0x1284   : > { %10743 = vmatprep.subr.bf16.mxu0 %v12234_v24 }
0x1285   : > { %9408 = vmatmul.mubr.f32.vlgmr.msra.gmra.mrb[56].mxu1 %v5152_v18 }
0x1286   : > { %5218 = vmatmul.mubr.f32.vlgmr.msra.gmra.mrb[56].mxu0 %v5152_v18  ;;  %10776 = vmatpush3.bf16.msra.mxu1 %v12231_v21  ;;  %v5294_v21 = vld [vmem:[%s13616_s1 + $0xe8] sm:$0xff] }
0x1287   : > { %10745 = vmatpush1.bf16.msra.mxu0 %v12237_v25  ;;  %10777 = vmatprep.subr.bf16.mxu1 %v11453_v0 }
0x1288   : > { %10747 = vmatprep.subr.bf16.mxu0 %v12253_v43  ;;  %5359 = vmatprep.mubr.f32.mxu0 %v11456_v6 }
0x1289   : > { %9442 = vmatprep.mubr.msk.f32.mxu1 %vm11457_vm0, %v11456_v6 }
0x128a   : > { %10779 = vmatpush3.bf16.msra.mxu1 %v12250_v51 }
0x128b   : > { %10749 = vmatpush1.bf16.msra.mxu0 %v12256_v57  ;;  %10780 = vmatprep.subr.bf16.mxu1 %v11453_v0 }
0x128c   : > { %10751 = vmatprep.subr.bf16.mxu0 %v12344_v7 }
0x128e   : > { %10782 = vmatpush3.bf16.msra.mxu1 %v12342_v5 }
0x128f   : > { %10753 = vmatpush1.bf16.msra.mxu0 %v12346_v61  ;;  %10783 = vmatprep.subr.bf16.mxu1 %v11453_v0 }
0x1290   : > { %10755 = vmatprep.subr.bf16.mxu0 %v12471_v33 }
0x1292   : > { %10785 = vmatpush3.bf16.msra.mxu1 %v12468_v32 }
0x1293   : > { %10757 = vmatpush1.bf16.msra.mxu0 %v12474_v37  ;;  %10786 = vmatprep.subr.bf16.mxu1 %v11453_v0 }
0x1294   : > { %10759 = vmatprep.subr.bf16.mxu0 %v12488_v46 }
0x1296   : > { %10788 = vmatpush3.bf16.msra.mxu1 %v12486_v12 }
0x1297   : > { %10761 = vmatpush1.bf16.msra.mxu0 %v12490_v47  ;;  %10789 = vmatprep.subr.bf16.mxu1 %v11453_v0 }
0x1298   : > { %10763 = vmatprep.subr.bf16.mxu0 %v12614_v29 }
0x129a   : > { %10791 = vmatpush3.bf16.msra.mxu1 %v12612_v28 }
0x129b   : > { %10765 = vmatpush1.bf16.msra.mxu0 %v12616_v34  ;;  %10792 = vmatprep.subr.bf16.mxu1 %v11453_v0 }
0x129c   : > { %10767 = vmatprep.subr.bf16.mxu0 %v12780_v56 }
0x129e   : > { %10794 = vmatpush3.bf16.msra.mxu1 %v12774_v1 }
0x129f   : > { %10769 = vmatpush1.bf16.msra.mxu0 %v12777_v52  ;;  %10795 = vmatprep.subr.bf16.mxu1 %v11453_v0 }
0x12a0   : > { %10771 = vmatprep.subr.bf16.mxu0 %v12796_v59 }
0x12a2   : > { %10797 = vmatpush3.bf16.msra.mxu1 %v12792_v4 }
0x12a3   : > { %10773 = vmatpush1.bf16.msra.mxu0 %v12794_v39  ;;  %10806 = vmatprep.subr.bf16.mxu1 %v11453_v0 }
0x12a5   : > { %9443 = vmatmul.mubr.f32.vlgmr.msra.gmra.mrb[58].mxu1 %v5294_v21 }
0x12a6   : > { %5360 = vmatmul.mubr.f32.vlgmr.msra.gmra.mrb[58].mxu0 %v5294_v21  ;;  %9453 = vmatprep.mubr.msk.f32.mxu1 %vm11457_vm0, %v11456_v6 }
0x12a7   : > { %5585 = vmatprep.mubr.f32.mxu0 %v11456_v6 }
0x1338   : > { %v5148_v24 = vpop.f32.mrb[54].mxu1 }
0x1339   : > { %5440 = vrot.lane.b32.xlu0 %v5148_v24, %s11459_s26  ;;  %v5077_v25 = vpop.f32.mrb[54].mxu0  ;;  %v9374_v51 = vpop.f32.mrb[55].mxu1 }
0x133a   : > { %v5079_v43 = vpop.f32.mrb[55].mxu0 }
0x133b   : > { %5438 = vrot.lane.b32.xlu1 %v5079_v43, %s11459_s26 }
0x133d   : > { %5436 = vrot.lane.b32.xlu0 %v5077_v25, %s11459_s26 }
0x1358   : > { %v5290_v57 = vpop.f32.mrb[56].mxu1 }
0x1359   : > { %v5219_v5 = vpop.f32.mrb[56].mxu0  ;;  %v9409_v7 = vpop.f32.mrb[57].mxu1 }
0x135a   : > { %v5221_v61 = vpop.f32.mrb[57].mxu0 }
0x1378   : > { %v5432_v32 = vpop.f32.mrb[58].mxu1 }
0x1379   : > { %v5361_v33 = vpop.f32.mrb[58].mxu0  ;;  %v9444_v37 = vpop.f32.mrb[59].mxu1 }
0x137a   : > { %5448 = vrot.lane.b32.xlu1 %v5361_v33, %s11460_s27  ;;  %v5363_v12 = vpop.f32.mrb[59].mxu0  ;;  %v5517_v33 = vld [vmem:[%s13616_s1 + $0xf0] sm:$0xff]  ;;  %v5662_v37 = vld [vmem:[%s13616_s1 + $0xf8] sm:$0xff] }
0x137b   : > { %5450 = vrot.lane.b32.xlu0 %v5363_v12, %s11460_s27  ;;  %v5807_v12 = vld [vmem:[%s13616_s1 + $0x100] sm:$0xff] }
0x137e   : > { %5452 = vrot.lane.b32.xlu1 %v5432_v32, %s11460_s27 }
0x13ab   : > { %v5441_v46 = vpop.permute.xlu0 %5440 }
0x13ad   : > { %v5439_v28 = vpop.permute.xlu1 %5438 }
0x13ae   : > { %v5442_v35 = vsel %vm663_vm4, %v5439_v28, %v5441_v46 }
0x13af   : > { %v5437_v47 = vpop.permute.xlu0 %5436  ;;  %v5447_v3 = vadd.f32 %v5442_v35, %v5290_v57 }
0x13b0   : > { %v5444_v29 = vsel %vm663_vm4, %v5441_v46, %v5437_v47  ;;  %v5443_v36 = vsel %vm663_vm4, %v5437_v47, %v5439_v28 }
0x13b1   : > { %v5445_v50 = vadd.f32 %v5444_v29, %v5219_v5  ;;  %v5446_v15 = vadd.f32 %v5443_v36, %v5221_v61 }
0x13ec   : > { %v5449_v34 = vpop.permute.xlu1 %5448 }
0x13ed   : > { %v5451_v58 = vpop.permute.xlu0 %5450 }
0x13ee   : > { %v5455_v63 = vsel %vm676_vm5, %v5449_v34, %v5451_v58 }
0x13ef   : > { %v5457_v2 = vadd.f32 %v5455_v63, %v5445_v50 }
0x13f0   : > { %v5453_v16 = vpop.permute.xlu1 %5452 }
0x13f1   : > { %vm5460_vm14 = vcmp.ge.f32.partialorder %v5457_v2, 0.0  ;;  %v5463_v22 = vmul.f32 0.2, %v5457_v2  ;;  %v5454_v23 = vsel %vm676_vm5, %v5451_v58, %v5453_v16  ;;  %v5456_v26 = vsel %vm676_vm5, %v5453_v16, %v5449_v34 }
0x13f2   : > { %v5458_v27 = vadd.f32 %v5454_v23, %v5446_v15  ;;  %v5459_v30 = vadd.f32 %v5456_v26, %v5447_v3 }
0x13f3   : > { %v5466_v31 = vsel %vm5460_vm14, %v5457_v2, %v5463_v22 }
0x13f4   : > { %v5469_v38 = vmul.f32 %v5466_v31, %v11624_v10  ;;  %vm5461_vm15 = vcmp.ge.f32.partialorder %v5458_v27, 0.0  ;;  %vm5462_vm6 = vcmp.ge.f32.partialorder %v5459_v30, 0.0  ;;  %v5464_v40 = vmul.f32 0.2, %v5458_v27 }
0x13f5   : > { %v5465_v41 = vmul.f32 0.2, %v5459_v30 }
0x13f6   : > { %v5467_v44 = vsel %vm5461_vm15, %v5458_v27, %v5464_v40  ;;  %v5472_v45 = vmul.f32 0.2, %v5469_v38 }
0x13f7   : > { %v5468_v13 = vsel %vm5462_vm6, %v5459_v30, %v5465_v41  ;;  %v5470_v1 = vmul.f32 %v5467_v44, %v11626_v11 }
0x13f8   : > { %v5471_v52 = vmul.f32 %v5468_v13, %v11622_v9  ;;  %v12906_v14 = vadd.f32 %v5472_v45, %v12206_v48 }
0x13f9   : > { %v5473_v54 = vmul.f32 0.2, %v5470_v1 }
0x13fa   : > { %v5474_v56 = vmul.f32 0.2, %v5471_v52 }
0x13fb   : > { %v12909_v19 = vadd.f32 %v5473_v54, %v12209_v53 }
0x13fc   : > { %v12912_v20 = vadd.f32 %v5474_v56, %v12212_v55 }
0x13fd   : > { %v11399_v42 = vpack.i.bf16 %v12909_v19, %v12906_v14 }
0x13fe   : > { %5482 = vrot.lane.b32.xlu1 %v12912_v20, %s11454_s18  ;;  %v11404_v62 = vpack.i.bf16 %v12912_v20, %v12909_v19 }
0x13ff   : > { %11400 = vrot.lane.b32.xlu0 %v11399_v42, %s11454_s18 }
0x1402   : > { %5493 = vrot.lane.b32.xlu1 %v12906_v14, %s11455_s19 }
0x1403   : > { %11405 = vrot.lane.b32.xlu0 %v11404_v62, %s11455_s19 }
0x1470   : > { %v5483_v48 = vpop.permute.xlu1 %5482 }
0x1471   : > { %v11401_v53 = vpop.permute.xlu0 %11400 }
0x1472   : > { %v11403_v55 = vunpack.i.h.bf16 %v11401_v53  ;;  %v11402_v49 = vunpack.i.l.bf16 %v11401_v53 }
0x1474   : > { %v5484_v4 = vsel %vm186_vm1, %v11403_v55, %v5483_v48  ;;  %v5485_v39 = vsel %vm186_vm1, %v11402_v49, %v11403_v55  ;;  %v5486_v59 = vsel %vm186_vm1, %v5483_v48, %v11402_v49  ;;  %v5494_v43 = vpop.permute.xlu1 %5493 }
0x1475   : > { %v12931_v60 = vpack.c.bf16 %v5484_v4, %v11458_v17  ;;  %v12934_v18 = vpack.c.bf16 %v5485_v39, %v11458_v17  ;;  %v12937_v21 = vpack.c.bf16 %v5486_v59, %v11458_v17  ;;  %v11406_v24 = vpop.permute.xlu0 %11405 }
0x1476   : > { %v11408_v25 = vunpack.i.h.bf16 %v11406_v24  ;;  %v11407_v51 = vunpack.i.l.bf16 %v11406_v24 }
0x1477   : > { %10799 = vmatprep.subr.bf16.mxu0 %v12934_v18  ;;  %10808 = vmatpush3.bf16.msra.mxu1 %v12931_v60 }
0x1478   : > { %v5501_v57 = vsel %vm202_vm2, %v11408_v25, %v5494_v43  ;;  %v5499_v5 = vsel %vm202_vm2, %v11407_v51, %v11408_v25  ;;  %v5500_v7 = vsel %vm202_vm2, %v5494_v43, %v11407_v51  ;;  %10801 = vmatpush1.bf16.msra.mxu0 %v12937_v21  ;;  %10809 = vmatprep.subr.bf16.mxu1 %v11453_v0 }
0x1479   : > { %v12950_v17 = vpack.c.bf16 %v5501_v57, %v12912_v20  ;;  %v12953_v61 = vpack.c.bf16 %v5499_v5, %v12909_v19  ;;  %v12956_v32 = vpack.c.bf16 %v5500_v7, %v12906_v14 }
0x147b   : > { %10803 = vmatprep.subr.bf16.mxu0 %v12953_v61  ;;  %10811 = vmatpush3.bf16.msra.mxu1 %v12950_v17 }
0x147c   : > { %10805 = vmatpush1.bf16.msra.mxu0 %v12956_v32  ;;  %10820 = vmatprep.subr.bf16.mxu1 %v11453_v0 }
0x147d   : > { %10813 = vmatprep.subr.bf16.mxu0 %v12934_v18 }
0x147e   : > { %9454 = vmatmul.mubr.msk.f32.vlgmr.msra.gmra.mrb[60].mxu1 %vm222_vm3, %v5517_v33 }
0x147f   : > { %8234 = vmatmul.mubr.msk.f32.vlgmr.msra.gmra.mrb[60].mxu0 %vm222_vm3, %v5517_v33  ;;  %10822 = vmatpush3.bf16.msra.mxu1 %v12931_v60 }
0x1480   : > { %10815 = vmatpush1.bf16.msra.mxu0 %v12937_v21  ;;  %10823 = vmatprep.subr.bf16.mxu1 %v11453_v0 }
0x1481   : > { %10817 = vmatprep.subr.bf16.mxu0 %v12953_v61  ;;  %5730 = vmatprep.mubr.f32.mxu0 %v11456_v6 }
0x1482   : > { %9464 = vmatprep.mubr.msk.f32.mxu1 %vm11457_vm0, %v11456_v6 }
0x1483   : > { %10825 = vmatpush3.bf16.msra.mxu1 %v12950_v17 }
0x1484   : > { %10819 = vmatpush1.bf16.msra.mxu0 %v12956_v32  ;;  %10834 = vmatprep.subr.bf16.mxu1 %v11453_v0 }
0x1485   : > { %10827 = vmatprep.subr.bf16.mxu0 %v12934_v18 }
0x1486   : > { %9465 = vmatmul.mubr.msk.f32.vlgmr.msra.gmra.mrb[62].mxu1 %vm222_vm3, %v5662_v37 }
0x1487   : > { %8236 = vmatmul.mubr.msk.f32.vlgmr.msra.gmra.mrb[62].mxu0 %vm222_vm3, %v5662_v37  ;;  %10836 = vmatpush3.bf16.msra.mxu1 %v12931_v60 }
0x1488   : > { %10829 = vmatpush1.bf16.msra.mxu0 %v12937_v21  ;;  %10837 = vmatprep.subr.bf16.mxu1 %v11453_v0 }
0x1489   : > { %10831 = vmatprep.subr.bf16.mxu0 %v12953_v61  ;;  %5875 = vmatprep.mubr.f32.mxu0 %v11456_v6 }
0x148a   : > { %9475 = vmatprep.mubr.msk.f32.mxu1 %vm11457_vm0, %v11456_v6 }
0x148b   : > { %10839 = vmatpush3.bf16.msra.mxu1 %v12950_v17 }
0x148c   : > { %10833 = vmatpush1.bf16.msra.mxu0 %v12956_v32  ;;  %10852 = vmatprep.subr.bf16.mxu1 %v11453_v0 }
0x148d   : > { %10841 = vmatprep.subr.bf16.mxu0 %v12934_v18 }
0x148e   : > { %9476 = vmatmul.mubr.msk.f32.vlgmr.msra.gmra.mrb[64].mxu1 %vm222_vm3, %v5807_v12 }
0x148f   : > { %8238 = vmatmul.mubr.msk.f32.vlgmr.msra.gmra.mrb[64].mxu0 %vm222_vm3, %v5807_v12  ;;  %10854 = vmatpush3.bf16.msra.mxu1 %v12931_v60 }
0x1490   : > { %10843 = vmatpush1.bf16.msra.mxu0 %v12937_v21  ;;  %10855 = vmatprep.subr.bf16.mxu1 %v11453_v0 }
0x1491   : > { %10845 = vmatprep.subr.bf16.mxu0 %v12953_v61  ;;  %9492 = vmatprep.mubr.msk.f32.mxu1 %vm11457_vm0, %v11456_v6 }
0x1492   : > { %6104 = vmatprep.mubr.f32.mxu0 %v11456_v6 }
0x1493   : > { %10857 = vmatpush3.bf16.msra.mxu1 %v12950_v17 }
0x1494   : > { %10847 = vmatpush1.bf16.msra.mxu0 %v12956_v32  ;;  %10858 = vmatprep.subr.bf16.mxu1 %v11453_v0 }
0x1551   : > { %v5658_v46 = vpop.f32.mrb[60].mxu1 }
0x1552   : > { %5956 = vrot.lane.b32.xlu0 %v5658_v46, %s11459_s26  ;;  %v5587_v47 = vpop.f32.mrb[60].mxu0  ;;  %v9455_v28 = vpop.f32.mrb[61].mxu1 }
0x1553   : > { %v5589_v29 = vpop.f32.mrb[61].mxu0 }
0x1554   : > { %5954 = vrot.lane.b32.xlu1 %v5589_v29, %s11459_s26 }
0x1556   : > { %5952 = vrot.lane.b32.xlu0 %v5587_v47, %s11459_s26 }
0x1559   : > { %v5803_v34 = vpop.f32.mrb[62].mxu1 }
0x155a   : > { %v5732_v35 = vpop.f32.mrb[62].mxu0  ;;  %v9466_v36 = vpop.f32.mrb[63].mxu1 }
0x155b   : > { %v5734_v50 = vpop.f32.mrb[63].mxu0 }
0x1561   : > { %v5948_v58 = vpop.f32.mrb[64].mxu1 }
0x1562   : > { %v5877_v63 = vpop.f32.mrb[64].mxu0  ;;  %v9477_v2 = vpop.f32.mrb[65].mxu1 }
0x1563   : > { %5964 = vrot.lane.b32.xlu1 %v5877_v63, %s11460_s27  ;;  %v5879_v3 = vpop.f32.mrb[65].mxu0  ;;  %v6326_v63 = vld [vmem:[%s13616_s1 + $0x118] sm:$0xff] }
0x1564   : > { %5966 = vrot.lane.b32.xlu0 %v5879_v3, %s11460_s27 }
0x1567   : > { %5968 = vrot.lane.b32.xlu1 %v5948_v58, %s11460_s27  ;;  %v6181_v58 = vld [vmem:[%s13616_s1 + $0x110] sm:$0xff] }
0x15c4   : > { %v5957_v15 = vpop.permute.xlu0 %5956 }
0x15c6   : > { %v5955_v22 = vpop.permute.xlu1 %5954 }
0x15c7   : > { %v5958_v27 = vsel %vm663_vm4, %v5955_v22, %v5957_v15 }
0x15c8   : > { %v5953_v16 = vpop.permute.xlu0 %5952  ;;  %v5963_v44 = vadd.f32 %v5958_v27, %v5803_v34 }
0x15c9   : > { %v5960_v23 = vsel %vm663_vm4, %v5957_v15, %v5953_v16  ;;  %v5959_v30 = vsel %vm663_vm4, %v5953_v16, %v5955_v22 }
0x15ca   : > { %v5961_v31 = vadd.f32 %v5960_v23, %v5732_v35  ;;  %v5962_v45 = vadd.f32 %v5959_v30, %v5734_v50  ;;  %v6036_v35 = vld [vmem:[%s13616_s1 + $0x108] sm:$0xff] }
0x15d5   : > { %v5965_v26 = vpop.permute.xlu1 %5964 }
0x15d6   : > { %v5967_v38 = vpop.permute.xlu0 %5966 }
0x15d7   : > { %v5971_v40 = vsel %vm676_vm5, %v5965_v26, %v5967_v38 }
0x15d8   : > { %v5973_v41 = vadd.f32 %v5971_v40, %v5961_v31 }
0x15d9   : > { %v5969_v13 = vpop.permute.xlu1 %5968 }
0x15da   : > { %vm5976_vm3 = vcmp.ge.f32.partialorder %v5973_v41, 0.0  ;;  %v5979_v1 = vmul.f32 0.2, %v5973_v41  ;;  %v5970_v52 = vsel %vm676_vm5, %v5967_v38, %v5969_v13  ;;  %v5972_v54 = vsel %vm676_vm5, %v5969_v13, %v5965_v26 }
0x15db   : > { %v5974_v56 = vadd.f32 %v5970_v52, %v5962_v45  ;;  %v5975_v42 = vadd.f32 %v5972_v54, %v5963_v44 }
0x15dc   : > { %v5982_v62 = vsel %vm5976_vm3, %v5973_v41, %v5979_v1 }
0x15dd   : > { %vm5977_vm8 = vcmp.ge.f32.partialorder %v5974_v56, 0.0  ;;  %vm5978_vm10 = vcmp.ge.f32.partialorder %v5975_v42, 0.0  ;;  %v5980_v48 = vmul.f32 0.2, %v5974_v56  ;;  %v5981_v53 = vmul.f32 0.2, %v5975_v42 }
0x15de   : > { %v5985_v49 = vmul.f32 %v5982_v62, %v11624_v10 }
0x15df   : > { %v5983_v55 = vsel %vm5977_vm8, %v5974_v56, %v5980_v48  ;;  %v5984_v4 = vsel %vm5978_vm10, %v5975_v42, %v5981_v53 }
0x15e0   : > { %v5986_v39 = vmul.f32 %v5983_v55, %v11626_v11  ;;  %v5987_v59 = vmul.f32 %v5984_v4, %v11622_v9 }
0x15e2   : > { %v11409_v24 = vpack.i.bf16 %v5986_v39, %v5985_v49  ;;  %5992 = vrot.lane.b32.xlu1 %v5987_v59, %s11454_s18 }
0x15e4   : > { %11410 = vrot.lane.b32.xlu0 %v11409_v24, %s11454_s18 }
0x15e6   : > { %6007 = vrot.lane.b32.xlu1 %v5987_v59, %s11455_s19 }
0x15e8   : > { %6005 = vrot.lane.b32.xlu0 %v5986_v39, %s11455_s19 }
0x15ec   : > { %6003 = vrot.lane.b32.xlu0 %v5985_v49, %s11455_s19 }
0x1654   : > { %v5993_v25 = vpop.permute.xlu1 %5992 }
0x1656   : > { %v11411_v51 = vpop.permute.xlu0 %11410 }
0x1657   : > { %v11413_v43 = vunpack.i.h.bf16 %v11411_v51  ;;  %v11412_v57 = vunpack.i.l.bf16 %v11411_v51 }
0x1658   : > { %v6008_v28 = vpop.permute.xlu1 %6007 }
0x1659   : > { %v5994_v5 = vsel %vm186_vm1, %v11413_v43, %v5993_v25  ;;  %v5995_v7 = vsel %vm186_vm1, %v11412_v57, %v11413_v43  ;;  %v5996_v33 = vsel %vm186_vm1, %v5993_v25, %v11412_v57 }
0x165a   : > { %v13042_v37 = vpack.c.bf16 %v5987_v59, %v5994_v5  ;;  %v13044_v12 = vpack.c.bf16 %v5986_v39, %v5995_v7  ;;  %v13046_v46 = vpack.c.bf16 %v5985_v49, %v5996_v33  ;;  %v6006_v47 = vpop.permute.xlu0 %6005 }
0x165b   : > { %v13052_v29 = vsel %vm202_vm2, %v6006_v47, %v6008_v28 }
0x165c   : > { %10849 = vmatprep.subr.bf16.mxu0 %v13044_v12  ;;  %10860 = vmatpush3.bf16.msra.mxu1 %v13042_v37 }
0x165d   : > { %10851 = vmatpush1.bf16.msra.mxu0 %v13046_v46  ;;  %9490 = vmatprep.subr.mxu1 %v11456_v6 }
0x165e   : > { %v6004_v34 = vpop.permute.xlu0 %6003  ;;  %6052 = vmatprep.subr.mxu0 %v13052_v29 }
0x165f   : > { %v13062_v36 = vsel %vm202_vm2, %v6004_v34, %v6006_v47  ;;  %v13066_v50 = vsel %vm202_vm2, %v6008_v28, %v6004_v34 }
0x1660   : > { %9491 = vmatpush3.msra.mxu1 %v13066_v50 }
0x1661   : > { %6053 = vmatpush1.msra.mxu0 %v13062_v36  ;;  %9493 = vmatmul.mubr.msk.f32.vlgmr.msra.gmra.mrb[66].mxu1 %vm760_vm9, %v6036_v35 }
0x1662   : > { %10873 = vmatprep.subr.bf16.mxu1 %v11453_v0  ;;  %8240 = vmatmul.mubr.msk.f32.vlgmr.msra.gmra.mrb[66].mxu0 %vm760_vm9, %v6036_v35 }
0x1663   : > { %10862 = vmatprep.subr.bf16.mxu0 %v12934_v18  ;;  %10875 = vmatpush3.bf16.msra.mxu1 %v12931_v60 }
0x1664   : > { %10864 = vmatpush1.bf16.msra.mxu0 %v12937_v21  ;;  %10876 = vmatprep.subr.bf16.mxu1 %v11453_v0 }
0x1665   : > { %10866 = vmatprep.subr.bf16.mxu0 %v12953_v61  ;;  %6249 = vmatprep.mubr.f32.mxu0 %v11456_v6 }
0x1666   : > { %9509 = vmatprep.mubr.msk.f32.mxu1 %vm11457_vm0, %v11456_v6 }
0x1667   : > { %10878 = vmatpush3.bf16.msra.mxu1 %v12950_v17 }
0x1668   : > { %10868 = vmatpush1.bf16.msra.mxu0 %v12956_v32  ;;  %10879 = vmatprep.subr.bf16.mxu1 %v11453_v0 }
0x1669   : > { %10870 = vmatprep.subr.bf16.mxu0 %v13044_v12 }
0x166b   : > { %10881 = vmatpush3.bf16.msra.mxu1 %v13042_v37 }
0x166c   : > { %10872 = vmatpush1.bf16.msra.mxu0 %v13046_v46  ;;  %9507 = vmatprep.subr.mxu1 %v11456_v6 }
0x166d   : > { %6197 = vmatprep.subr.mxu0 %v13052_v29 }
0x166f   : > { %9508 = vmatpush3.msra.mxu1 %v13066_v50 }
0x1670   : > { %6198 = vmatpush1.msra.mxu0 %v13062_v36  ;;  %10894 = vmatprep.subr.bf16.mxu1 %v11453_v0 }
0x1671   : > { %8242 = vmatmul.mubr.msk.f32.vlgmr.msra.gmra.mrb[68].mxu0 %vm760_vm9, %v6181_v58  ;;  %9510 = vmatmul.mubr.msk.f32.vlgmr.msra.gmra.mrb[68].mxu1 %vm760_vm9, %v6181_v58 }
0x1672   : > { %10883 = vmatprep.subr.bf16.mxu0 %v12934_v18  ;;  %10896 = vmatpush3.bf16.msra.mxu1 %v12931_v60 }
0x1673   : > { %10885 = vmatpush1.bf16.msra.mxu0 %v12937_v21  ;;  %10897 = vmatprep.subr.bf16.mxu1 %v11453_v0 }
0x1674   : > { %10887 = vmatprep.subr.bf16.mxu0 %v12953_v61  ;;  %6394 = vmatprep.mubr.f32.mxu0 %v11456_v6 }
0x1675   : > { %9526 = vmatprep.mubr.msk.f32.mxu1 %vm11457_vm0, %v11456_v6 }
0x1676   : > { %10899 = vmatpush3.bf16.msra.mxu1 %v12950_v17 }
0x1677   : > { %10889 = vmatpush1.bf16.msra.mxu0 %v12956_v32  ;;  %10900 = vmatprep.subr.bf16.mxu1 %v11453_v0 }
0x1678   : > { %10891 = vmatprep.subr.bf16.mxu0 %v13044_v12 }
0x167a   : > { %10902 = vmatpush3.bf16.msra.mxu1 %v13042_v37 }
0x167b   : > { %10893 = vmatpush1.bf16.msra.mxu0 %v13046_v46  ;;  %9524 = vmatprep.subr.mxu1 %v11456_v6 }
0x167c   : > { %6342 = vmatprep.subr.mxu0 %v13052_v29 }
0x167e   : > { %9525 = vmatpush3.msra.mxu1 %v13066_v50 }
0x167f   : > { %6343 = vmatpush1.msra.mxu0 %v13062_v36  ;;  %10923 = vmatprep.subr.bf16.mxu1 %v11453_v0 }
0x1680   : > { %8244 = vmatmul.mubr.msk.f32.vlgmr.msra.gmra.mrb[70].mxu0 %vm760_vm9, %v6326_v63  ;;  %9527 = vmatmul.mubr.msk.f32.vlgmr.msra.gmra.mrb[70].mxu1 %vm760_vm9, %v6326_v63 }
0x1681   : > { %10904 = vmatprep.subr.bf16.mxu0 %v12934_v18  ;;  %10925 = vmatpush3.bf16.msra.mxu1 %v12931_v60 }
0x1682   : > { %10906 = vmatpush1.bf16.msra.mxu0 %v12937_v21  ;;  %10926 = vmatprep.subr.bf16.mxu1 %v11453_v0 }
0x1683   : > { %10908 = vmatprep.subr.bf16.mxu0 %v12953_v61  ;;  %9549 = vmatprep.mubr.msk.f32.mxu1 %vm11457_vm0, %v11456_v6 }
0x1684   : > { %6632 = vmatprep.mubr.f32.mxu0 %v11456_v6 }
0x1685   : > { %10928 = vmatpush3.bf16.msra.mxu1 %v12950_v17 }
0x1686   : > { %10910 = vmatpush1.bf16.msra.mxu0 %v12956_v32  ;;  %10929 = vmatprep.subr.bf16.mxu1 %v11453_v0 }
0x1687   : > { %10912 = vmatprep.subr.bf16.mxu0 %v13044_v12 }
0x1689   : > { %10931 = vmatpush3.bf16.msra.mxu1 %v13042_v37 }
0x168a   : > { %10914 = vmatpush1.bf16.msra.mxu0 %v13046_v46  ;;  %10932 = vmatprep.subr.bf16.mxu1 %v11453_v0 }
0x1734   : > { %v6177_v2 = vpop.f32.mrb[66].mxu1 }
0x1735   : > { %6475 = vrot.lane.b32.xlu1 %v6177_v2, %s11459_s26  ;;  %v6106_v3 = vpop.f32.mrb[66].mxu0  ;;  %v9494_v15 = vpop.f32.mrb[67].mxu1 }
0x1736   : > { %v6108_v16 = vpop.f32.mrb[67].mxu0 }
0x1737   : > { %6473 = vrot.lane.b32.xlu0 %v6108_v16, %s11459_s26 }
0x1739   : > { %6471 = vrot.lane.b32.xlu1 %v6106_v3, %s11459_s26 }
0x1744   : > { %v6251_v22 = vpop.f32.mrb[68].mxu0  ;;  %v6322_v23 = vpop.f32.mrb[68].mxu1 }
0x1745   : > { %v6253_v26 = vpop.f32.mrb[69].mxu0  ;;  %v9511_v27 = vpop.f32.mrb[69].mxu1 }
0x1753   : > { %v6396_v30 = vpop.f32.mrb[70].mxu0  ;;  %v6467_v31 = vpop.f32.mrb[70].mxu1 }
0x1754   : > { %6483 = vrot.lane.b32.xlu0 %v6396_v30, %s11460_s27  ;;  %v6398_v38 = vpop.f32.mrb[71].mxu0  ;;  %v9528_v40 = vpop.f32.mrb[71].mxu1 }
0x1755   : > { %6485 = vrot.lane.b32.xlu1 %v6398_v38, %s11460_s27 }
0x1758   : > { %6487 = vrot.lane.b32.xlu0 %v6467_v31, %s11460_s27 }
0x17a7   : > { %v6476_v41 = vpop.permute.xlu1 %6475 }
0x17a9   : > { %v6474_v45 = vpop.permute.xlu0 %6473 }
0x17aa   : > { %v6477_v52 = vsel %vm663_vm4, %v6474_v45, %v6476_v41 }
0x17ab   : > { %v6472_v44 = vpop.permute.xlu1 %6471  ;;  %v6482_v53 = vadd.f32 %v6477_v52, %v6322_v23  ;;  %v6854_v52 = vld [vmem:[%s13616_s1 + $0x130] sm:$0xff] }
0x17ac   : > { %v6479_v13 = vsel %vm663_vm4, %v6476_v41, %v6472_v44  ;;  %v6478_v54 = vsel %vm663_vm4, %v6472_v44, %v6474_v45 }
0x17ad   : > { %v6480_v56 = vadd.f32 %v6479_v13, %v6251_v22  ;;  %v6481_v55 = vadd.f32 %v6478_v54, %v6253_v26  ;;  %v6564_v13 = vld [vmem:[%s13616_s1 + $0x120] sm:$0xff] }
0x17c6   : > { %v6484_v1 = vpop.permute.xlu0 %6483 }
0x17c7   : > { %v6486_v42 = vpop.permute.xlu1 %6485 }
0x17c8   : > { %v6490_v62 = vsel %vm676_vm5, %v6484_v1, %v6486_v42 }
0x17c9   : > { %v6492_v48 = vadd.f32 %v6490_v62, %v6480_v56 }
0x17ca   : > { %v6488_v49 = vpop.permute.xlu0 %6487 }
0x17cb   : > { %vm6495_vm9 = vcmp.ge.f32.partialorder %v6492_v48, 0.0  ;;  %v6498_v4 = vmul.f32 0.2, %v6492_v48  ;;  %v6489_v39 = vsel %vm676_vm5, %v6486_v42, %v6488_v49  ;;  %v6491_v59 = vsel %vm676_vm5, %v6488_v49, %v6484_v1  ;;  %v6709_v1 = vld [vmem:[%s13616_s1 + $0x128] sm:$0xff] }
0x17cc   : > { %v6493_v24 = vadd.f32 %v6489_v39, %v6481_v55  ;;  %v6494_v25 = vadd.f32 %v6491_v59, %v6482_v53 }
0x17cd   : > { %v6501_v51 = vsel %vm6495_vm9, %v6492_v48, %v6498_v4 }
0x17ce   : > { %vm6496_vm11 = vcmp.ge.f32.partialorder %v6493_v24, 0.0  ;;  %vm6497_vm12 = vcmp.ge.f32.partialorder %v6494_v25, 0.0  ;;  %v6499_v43 = vmul.f32 0.2, %v6493_v24  ;;  %v6500_v57 = vmul.f32 0.2, %v6494_v25 }
0x17cf   : > { %v6504_v7 = vmul.f32 %v6501_v51, %v11624_v10 }
0x17d0   : > { %v6502_v5 = vsel %vm6496_vm11, %v6493_v24, %v6499_v43  ;;  %v6503_v33 = vsel %vm6497_vm12, %v6494_v25, %v6500_v57 }
0x17d1   : > { %v6505_v47 = vmul.f32 %v6502_v5, %v11626_v11  ;;  %v6506_v28 = vmul.f32 %v6503_v33, %v11622_v9 }
0x17d3   : > { %v11414_v34 = vpack.i.bf16 %v6505_v47, %v6504_v7  ;;  %6511 = vrot.lane.b32.xlu0 %v6506_v28, %s11454_s18  ;;  %v11419_v35 = vpack.i.bf16 %v6506_v28, %v6505_v47 }
0x17d5   : > { %11415 = vrot.lane.b32.xlu1 %v11414_v34, %s11454_s18 }
0x17d7   : > { %6522 = vrot.lane.b32.xlu0 %v6504_v7, %s11455_s19 }
0x17d9   : > { %11420 = vrot.lane.b32.xlu1 %v11419_v35, %s11455_s19 }
0x1845   : > { %v6512_v58 = vpop.permute.xlu0 %6511 }
0x1847   : > { %v11416_v63 = vpop.permute.xlu1 %11415 }
0x1848   : > { %v11418_v2 = vunpack.i.h.bf16 %v11416_v63  ;;  %v11417_v3 = vunpack.i.l.bf16 %v11416_v63 }
0x1849   : > { %v6523_v40 = vpop.permute.xlu0 %6522 }
0x184a   : > { %v6513_v15 = vsel %vm186_vm1, %v11418_v2, %v6512_v58  ;;  %v6514_v16 = vsel %vm186_vm1, %v11417_v3, %v11418_v2  ;;  %v6515_v22 = vsel %vm186_vm1, %v6512_v58, %v11417_v3 }
0x184b   : > { %v13168_v23 = vpack.c.bf16 %v6513_v15, %v13066_v50  ;;  %v13171_v26 = vpack.c.bf16 %v6514_v16, %v13052_v29  ;;  %v13174_v27 = vpack.c.bf16 %v6515_v22, %v13062_v36  ;;  %v11421_v30 = vpop.permute.xlu1 %11420 }
0x184c   : > { %v11423_v31 = vunpack.i.h.bf16 %v11421_v30  ;;  %v11422_v38 = vunpack.i.l.bf16 %v11421_v30 }
0x184d   : > { %10916 = vmatprep.subr.bf16.mxu0 %v13171_v26  ;;  %10934 = vmatpush3.bf16.msra.mxu1 %v13168_v23 }
0x184e   : > { %v6530_v41 = vsel %vm202_vm2, %v11423_v31, %v6523_v40  ;;  %v6528_v50 = vsel %vm202_vm2, %v11422_v38, %v11423_v31  ;;  %v6529_v29 = vsel %vm202_vm2, %v6523_v40, %v11422_v38  ;;  %10918 = vmatpush1.bf16.msra.mxu0 %v13174_v27  ;;  %10935 = vmatprep.subr.bf16.mxu1 %v11453_v0 }
0x184f   : > { %v13186_v36 = vpack.c.bf16 %v6530_v41, %v6506_v28  ;;  %v13188_v44 = vpack.c.bf16 %v6528_v50, %v6505_v47  ;;  %v13190_v45 = vpack.c.bf16 %v6529_v29, %v6504_v7 }
0x1851   : > { %10920 = vmatprep.subr.bf16.mxu0 %v13188_v44  ;;  %10937 = vmatpush3.bf16.msra.mxu1 %v13186_v36 }
0x1852   : > { %10922 = vmatpush1.bf16.msra.mxu0 %v13190_v45  ;;  %10958 = vmatprep.subr.bf16.mxu1 %v11453_v0 }
0x1853   : > { %10939 = vmatprep.subr.bf16.mxu0 %v12934_v18 }
0x1854   : > { %9550 = vmatmul.mubr.msk.f32.vlgmr.msra.gmra.mrb[72].mxu1 %vm1289_vm13, %v6564_v13 }
0x1855   : > { %8246 = vmatmul.mubr.msk.f32.vlgmr.msra.gmra.mrb[72].mxu0 %vm1289_vm13, %v6564_v13  ;;  %10960 = vmatpush3.bf16.msra.mxu1 %v12931_v60 }
0x1856   : > { %10941 = vmatpush1.bf16.msra.mxu0 %v12937_v21  ;;  %10961 = vmatprep.subr.bf16.mxu1 %v11453_v0 }
0x1857   : > { %10943 = vmatprep.subr.bf16.mxu0 %v12953_v61  ;;  %6777 = vmatprep.mubr.f32.mxu0 %v11456_v6 }
0x1858   : > { %9572 = vmatprep.mubr.msk.f32.mxu1 %vm11457_vm0, %v11456_v6 }
0x1859   : > { %10963 = vmatpush3.bf16.msra.mxu1 %v12950_v17 }
0x185a   : > { %10945 = vmatpush1.bf16.msra.mxu0 %v12956_v32  ;;  %10964 = vmatprep.subr.bf16.mxu1 %v11453_v0 }
0x185b   : > { %10947 = vmatprep.subr.bf16.mxu0 %v13044_v12 }
0x185d   : > { %10966 = vmatpush3.bf16.msra.mxu1 %v13042_v37 }
0x185e   : > { %10949 = vmatpush1.bf16.msra.mxu0 %v13046_v46  ;;  %10967 = vmatprep.subr.bf16.mxu1 %v11453_v0 }
0x185f   : > { %10951 = vmatprep.subr.bf16.mxu0 %v13171_v26 }
0x1861   : > { %10969 = vmatpush3.bf16.msra.mxu1 %v13168_v23 }
0x1862   : > { %10953 = vmatpush1.bf16.msra.mxu0 %v13174_v27  ;;  %10970 = vmatprep.subr.bf16.mxu1 %v11453_v0 }
0x1863   : > { %10955 = vmatprep.subr.bf16.mxu0 %v13188_v44 }
0x1865   : > { %10972 = vmatpush3.bf16.msra.mxu1 %v13186_v36 }
0x1866   : > { %10957 = vmatpush1.bf16.msra.mxu0 %v13190_v45  ;;  %10993 = vmatprep.subr.bf16.mxu1 %v11453_v0 }
0x1867   : > { %10974 = vmatprep.subr.bf16.mxu0 %v12934_v18 }
0x1868   : > { %9573 = vmatmul.mubr.msk.f32.vlgmr.msra.gmra.mrb[74].mxu1 %vm1289_vm13, %v6709_v1 }
0x1869   : > { %8248 = vmatmul.mubr.msk.f32.vlgmr.msra.gmra.mrb[74].mxu0 %vm1289_vm13, %v6709_v1  ;;  %10995 = vmatpush3.bf16.msra.mxu1 %v12931_v60 }
0x186a   : > { %10976 = vmatpush1.bf16.msra.mxu0 %v12937_v21  ;;  %10996 = vmatprep.subr.bf16.mxu1 %v11453_v0 }
0x186b   : > { %10978 = vmatprep.subr.bf16.mxu0 %v12953_v61  ;;  %6922 = vmatprep.mubr.f32.mxu0 %v11456_v6 }
0x186c   : > { %9595 = vmatprep.mubr.msk.f32.mxu1 %vm11457_vm0, %v11456_v6 }
0x186d   : > { %10998 = vmatpush3.bf16.msra.mxu1 %v12950_v17 }
0x186e   : > { %10980 = vmatpush1.bf16.msra.mxu0 %v12956_v32  ;;  %10999 = vmatprep.subr.bf16.mxu1 %v11453_v0 }
0x186f   : > { %10982 = vmatprep.subr.bf16.mxu0 %v13044_v12 }
0x1871   : > { %11001 = vmatpush3.bf16.msra.mxu1 %v13042_v37 }
0x1872   : > { %10984 = vmatpush1.bf16.msra.mxu0 %v13046_v46  ;;  %11002 = vmatprep.subr.bf16.mxu1 %v11453_v0 }
0x1873   : > { %10986 = vmatprep.subr.bf16.mxu0 %v13171_v26 }
0x1875   : > { %11004 = vmatpush3.bf16.msra.mxu1 %v13168_v23 }
0x1876   : > { %10988 = vmatpush1.bf16.msra.mxu0 %v13174_v27  ;;  %11005 = vmatprep.subr.bf16.mxu1 %v11453_v0 }
0x1877   : > { %10990 = vmatprep.subr.bf16.mxu0 %v13188_v44 }
0x1879   : > { %11007 = vmatpush3.bf16.msra.mxu1 %v13186_v36 }
0x187a   : > { %10992 = vmatpush1.bf16.msra.mxu0 %v13190_v45  ;;  %11032 = vmatprep.subr.bf16.mxu1 %v11453_v0 }
0x187b   : > { %11009 = vmatprep.subr.bf16.mxu0 %v12934_v18 }
0x187c   : > { %9596 = vmatmul.mubr.msk.f32.vlgmr.msra.gmra.mrb[76].mxu1 %vm1289_vm13, %v6854_v52 }
0x187d   : > { %8250 = vmatmul.mubr.msk.f32.vlgmr.msra.gmra.mrb[76].mxu0 %vm1289_vm13, %v6854_v52  ;;  %11034 = vmatpush3.bf16.msra.mxu1 %v12931_v60 }
0x187e   : > { %11011 = vmatpush1.bf16.msra.mxu0 %v12937_v21  ;;  %11035 = vmatprep.subr.bf16.mxu1 %v11453_v0 }
0x187f   : > { %11013 = vmatprep.subr.bf16.mxu0 %v12953_v61  ;;  %9624 = vmatprep.mubr.msk.f32.mxu1 %vm11457_vm0, %v11456_v6 }
0x1880   : > { %7169 = vmatprep.mubr.f32.mxu0 %v11456_v6 }
0x1881   : > { %11037 = vmatpush3.bf16.msra.mxu1 %v12950_v17 }
0x1882   : > { %11015 = vmatpush1.bf16.msra.mxu0 %v12956_v32  ;;  %11038 = vmatprep.subr.bf16.mxu1 %v11453_v0 }
0x1883   : > { %11017 = vmatprep.subr.bf16.mxu0 %v13044_v12 }
0x1885   : > { %11040 = vmatpush3.bf16.msra.mxu1 %v13042_v37 }
0x1886   : > { %11019 = vmatpush1.bf16.msra.mxu0 %v13046_v46  ;;  %11041 = vmatprep.subr.bf16.mxu1 %v11453_v0 }
0x1887   : > { %11021 = vmatprep.subr.bf16.mxu0 %v13171_v26 }
0x1889   : > { %11043 = vmatpush3.bf16.msra.mxu1 %v13168_v23 }
0x188a   : > { %11023 = vmatpush1.bf16.msra.mxu0 %v13174_v27  ;;  %11044 = vmatprep.subr.bf16.mxu1 %v11453_v0 }
0x188b   : > { %11025 = vmatprep.subr.bf16.mxu0 %v13188_v44 }
0x188d   : > { %11046 = vmatpush3.bf16.msra.mxu1 %v13186_v36 }
0x188e   : > { %11027 = vmatpush1.bf16.msra.mxu0 %v13190_v45  ;;  %11047 = vmatprep.subr.bf16.mxu1 %v11453_v0 }
0x1927   : > { %v6705_v54 = vpop.f32.mrb[72].mxu1 }
0x1928   : > { %7003 = vrot.lane.b32.xlu1 %v6705_v54, %s11459_s26  ;;  %v6634_v56 = vpop.f32.mrb[72].mxu0  ;;  %v9551_v42 = vpop.f32.mrb[73].mxu1 }
0x1929   : > { %v6636_v62 = vpop.f32.mrb[73].mxu0 }
0x192a   : > { %7001 = vrot.lane.b32.xlu0 %v6636_v62, %s11459_s26 }
0x192c   : > { %6999 = vrot.lane.b32.xlu1 %v6634_v56, %s11459_s26 }
0x193b   : > { %v6850_v48 = vpop.f32.mrb[74].mxu1 }
0x193c   : > { %v6779_v53 = vpop.f32.mrb[74].mxu0  ;;  %v9574_v55 = vpop.f32.mrb[75].mxu1 }
0x193d   : > { %v6781_v49 = vpop.f32.mrb[75].mxu0 }
0x194f   : > { %v6995_v4 = vpop.f32.mrb[76].mxu1 }
0x1950   : > { %v6924_v39 = vpop.f32.mrb[76].mxu0  ;;  %v9597_v59 = vpop.f32.mrb[77].mxu1 }
0x1951   : > { %7011 = vrot.lane.b32.xlu0 %v6924_v39, %s11460_s27  ;;  %v6926_v24 = vpop.f32.mrb[77].mxu0 }
0x1952   : > { %7013 = vrot.lane.b32.xlu1 %v6926_v24, %s11460_s27 }
0x1955   : > { %7015 = vrot.lane.b32.xlu0 %v6995_v4, %s11460_s27 }
0x199a   : > { %v7004_v25 = vpop.permute.xlu1 %7003 }
0x199c   : > { %v7002_v43 = vpop.permute.xlu0 %7001 }
0x199d   : > { %v7005_v7 = vsel %vm663_vm4, %v7002_v43, %v7004_v25 }
0x199e   : > { %v7000_v51 = vpop.permute.xlu1 %6999  ;;  %v7010_v58 = vadd.f32 %v7005_v7, %v6850_v48  ;;  %v7246_v7 = vld [vmem:[%s13616_s1 + $0x140] sm:$0xff] }
0x199f   : > { %v7007_v57 = vsel %vm663_vm4, %v7004_v25, %v7000_v51  ;;  %v7006_v33 = vsel %vm663_vm4, %v7000_v51, %v7002_v43  ;;  %v7101_v43 = vld [vmem:[%s13616_s1 + $0x138] sm:$0xff] }
0x19a0   : > { %v7008_v47 = vadd.f32 %v7007_v57, %v6779_v53  ;;  %v7009_v63 = vadd.f32 %v7006_v33, %v6781_v49  ;;  %v7391_v33 = vld [vmem:[%s13616_s1 + $0x148] sm:$0xff] }
0x19c3   : > { %v7012_v5 = vpop.permute.xlu0 %7011 }
0x19c4   : > { %v7014_v28 = vpop.permute.xlu1 %7013 }
0x19c5   : > { %v7018_v34 = vsel %vm676_vm5, %v7012_v5, %v7014_v28 }
0x19c6   : > { %v7020_v35 = vadd.f32 %v7018_v34, %v7008_v47 }
0x19c7   : > { %v7016_v2 = vpop.permute.xlu0 %7015 }
0x19c8   : > { %vm7023_vm13 = vcmp.ge.f32.partialorder %v7020_v35, 0.0  ;;  %v7026_v3 = vmul.f32 0.2, %v7020_v35  ;;  %v7017_v15 = vsel %vm676_vm5, %v7014_v28, %v7016_v2  ;;  %v7019_v16 = vsel %vm676_vm5, %v7016_v2, %v7012_v5 }
0x19c9   : > { %v7021_v22 = vadd.f32 %v7017_v15, %v7009_v63  ;;  %v7022_v30 = vadd.f32 %v7019_v16, %v7010_v58 }
0x19ca   : > { %v7029_v31 = vsel %vm7023_vm13, %v7020_v35, %v7026_v3 }
0x19cb   : > { %vm7024_vm14 = vcmp.ge.f32.partialorder %v7021_v22, 0.0  ;;  %vm7025_vm15 = vcmp.ge.f32.partialorder %v7022_v30, 0.0  ;;  %v7027_v38 = vmul.f32 0.2, %v7021_v22  ;;  %v7028_v40 = vmul.f32 0.2, %v7022_v30 }
0x19cc   : > { %v7032_v50 = vmul.f32 %v7029_v31, %v11624_v10 }
0x19cd   : > { %v7030_v41 = vsel %vm7024_vm14, %v7021_v22, %v7027_v38  ;;  %v7031_v29 = vsel %vm7025_vm15, %v7022_v30, %v7028_v40 }
0x19ce   : > { %v7033_v13 = vmul.f32 %v7030_v41, %v11626_v11  ;;  %v7034_v1 = vmul.f32 %v7031_v29, %v11622_v9 }
0x19d0   : > { %v11424_v52 = vpack.i.bf16 %v7033_v13, %v7032_v50  ;;  %7039 = vrot.lane.b32.xlu0 %v7034_v1, %s11454_s18 }
0x19d2   : > { %11425 = vrot.lane.b32.xlu1 %v11424_v52, %s11454_s18 }
0x19d4   : > { %7054 = vrot.lane.b32.xlu0 %v7034_v1, %s11455_s19 }
0x19d6   : > { %7052 = vrot.lane.b32.xlu1 %v7033_v13, %s11455_s19 }
0x19da   : > { %7050 = vrot.lane.b32.xlu1 %v7032_v50, %s11455_s19 }
0x1a42   : > { %v7040_v54 = vpop.permute.xlu0 %7039 }
0x1a44   : > { %v11426_v56 = vpop.permute.xlu1 %11425 }
0x1a45   : > { %v11428_v42 = vunpack.i.h.bf16 %v11426_v56  ;;  %v11427_v62 = vunpack.i.l.bf16 %v11426_v56 }
0x1a46   : > { %v7055_v24 = vpop.permute.xlu0 %7054 }
0x1a47   : > { %v7041_v48 = vsel %vm186_vm1, %v11428_v42, %v7040_v54  ;;  %v7042_v53 = vsel %vm186_vm1, %v11427_v62, %v11428_v42  ;;  %v7043_v55 = vsel %vm186_vm1, %v7040_v54, %v11427_v62 }
0x1a48   : > { %v13312_v49 = vpack.c.bf16 %v7034_v1, %v7041_v48  ;;  %v13314_v4 = vpack.c.bf16 %v7033_v13, %v7042_v53  ;;  %v13316_v39 = vpack.c.bf16 %v7032_v50, %v7043_v55  ;;  %v7053_v59 = vpop.permute.xlu1 %7052 }
0x1a49   : > { %v13322_v25 = vsel %vm202_vm2, %v7053_v59, %v7055_v24 }
0x1a4a   : > { %11029 = vmatprep.subr.bf16.mxu0 %v13314_v4  ;;  %11049 = vmatpush3.bf16.msra.mxu1 %v13312_v49 }
0x1a4b   : > { %11031 = vmatpush1.bf16.msra.mxu0 %v13316_v39  ;;  %9622 = vmatprep.subr.mxu1 %v11456_v6 }
0x1a4c   : > { %v7051_v51 = vpop.permute.xlu1 %7050  ;;  %7129 = vmatprep.subr.mxu0 %v13322_v25 }
0x1a4d   : > { %v13332_v57 = vsel %vm202_vm2, %v7051_v51, %v7053_v59  ;;  %v13336_v5 = vsel %vm202_vm2, %v7055_v24, %v7051_v51 }
0x1a4e   : > { %9623 = vmatpush3.msra.mxu1 %v13336_v5 }
0x1a4f   : > { %7130 = vmatpush1.msra.mxu0 %v13332_v57  ;;  %9625 = vmatmul.mubr.msk.f32.vlgmr.msra.gmra.mrb[78].mxu1 %vm1827_vm7, %v7101_v43 }
0x1a50   : > { %11074 = vmatprep.subr.bf16.mxu1 %v11453_v0  ;;  %8252 = vmatmul.mubr.msk.f32.vlgmr.msra.gmra.mrb[78].mxu0 %vm1827_vm7, %v7101_v43 }
0x1a51   : > { %11051 = vmatprep.subr.bf16.mxu0 %v12934_v18  ;;  %11076 = vmatpush3.bf16.msra.mxu1 %v12931_v60 }
0x1a52   : > { %11053 = vmatpush1.bf16.msra.mxu0 %v12937_v21  ;;  %11077 = vmatprep.subr.bf16.mxu1 %v11453_v0 }
0x1a53   : > { %11055 = vmatprep.subr.bf16.mxu0 %v12953_v61  ;;  %7314 = vmatprep.mubr.f32.mxu0 %v11456_v6 }
0x1a54   : > { %9653 = vmatprep.mubr.msk.f32.mxu1 %vm11457_vm0, %v11456_v6 }
0x1a55   : > { %11079 = vmatpush3.bf16.msra.mxu1 %v12950_v17 }
0x1a56   : > { %11057 = vmatpush1.bf16.msra.mxu0 %v12956_v32  ;;  %11080 = vmatprep.subr.bf16.mxu1 %v11453_v0 }
0x1a57   : > { %11059 = vmatprep.subr.bf16.mxu0 %v13044_v12 }
0x1a59   : > { %11082 = vmatpush3.bf16.msra.mxu1 %v13042_v37 }
0x1a5a   : > { %11061 = vmatpush1.bf16.msra.mxu0 %v13046_v46  ;;  %11083 = vmatprep.subr.bf16.mxu1 %v11453_v0 }
0x1a5b   : > { %11063 = vmatprep.subr.bf16.mxu0 %v13171_v26 }
0x1a5d   : > { %11085 = vmatpush3.bf16.msra.mxu1 %v13168_v23 }
0x1a5e   : > { %11065 = vmatpush1.bf16.msra.mxu0 %v13174_v27  ;;  %11086 = vmatprep.subr.bf16.mxu1 %v11453_v0 }
0x1a5f   : > { %11067 = vmatprep.subr.bf16.mxu0 %v13188_v44 }
0x1a61   : > { %11088 = vmatpush3.bf16.msra.mxu1 %v13186_v36 }
0x1a62   : > { %11069 = vmatpush1.bf16.msra.mxu0 %v13190_v45  ;;  %11089 = vmatprep.subr.bf16.mxu1 %v11453_v0 }
0x1a63   : > { %11071 = vmatprep.subr.bf16.mxu0 %v13314_v4 }
0x1a65   : > { %11091 = vmatpush3.bf16.msra.mxu1 %v13312_v49 }
0x1a66   : > { %11073 = vmatpush1.bf16.msra.mxu0 %v13316_v39  ;;  %9651 = vmatprep.subr.mxu1 %v11456_v6 }
0x1a67   : > { %7274 = vmatprep.subr.mxu0 %v13322_v25 }
0x1a69   : > { %9652 = vmatpush3.msra.mxu1 %v13336_v5 }
0x1a6a   : > { %7275 = vmatpush1.msra.mxu0 %v13332_v57  ;;  %11116 = vmatprep.subr.bf16.mxu1 %v11453_v0 }
0x1a6b   : > { %8254 = vmatmul.mubr.msk.f32.vlgmr.msra.gmra.mrb[80].mxu0 %vm1827_vm7, %v7246_v7  ;;  %9654 = vmatmul.mubr.msk.f32.vlgmr.msra.gmra.mrb[80].mxu1 %vm1827_vm7, %v7246_v7 }
0x1a6c   : > { %11093 = vmatprep.subr.bf16.mxu0 %v12934_v18  ;;  %11118 = vmatpush3.bf16.msra.mxu1 %v12931_v60 }
0x1a6d   : > { %11095 = vmatpush1.bf16.msra.mxu0 %v12937_v21  ;;  %11119 = vmatprep.subr.bf16.mxu1 %v11453_v0 }
0x1a6e   : > { %11097 = vmatprep.subr.bf16.mxu0 %v12953_v61  ;;  %7459 = vmatprep.mubr.f32.mxu0 %v11456_v6 }
0x1a6f   : > { %9682 = vmatprep.mubr.msk.f32.mxu1 %vm11457_vm0, %v11456_v6 }
0x1a70   : > { %11121 = vmatpush3.bf16.msra.mxu1 %v12950_v17 }
0x1a71   : > { %11099 = vmatpush1.bf16.msra.mxu0 %v12956_v32  ;;  %11122 = vmatprep.subr.bf16.mxu1 %v11453_v0 }
0x1a72   : > { %11101 = vmatprep.subr.bf16.mxu0 %v13044_v12 }
0x1a74   : > { %11124 = vmatpush3.bf16.msra.mxu1 %v13042_v37 }
0x1a75   : > { %11103 = vmatpush1.bf16.msra.mxu0 %v13046_v46  ;;  %11125 = vmatprep.subr.bf16.mxu1 %v11453_v0 }
0x1a76   : > { %11105 = vmatprep.subr.bf16.mxu0 %v13171_v26 }
0x1a78   : > { %11127 = vmatpush3.bf16.msra.mxu1 %v13168_v23 }
0x1a79   : > { %11107 = vmatpush1.bf16.msra.mxu0 %v13174_v27  ;;  %11128 = vmatprep.subr.bf16.mxu1 %v11453_v0 }
0x1a7a   : > { %11109 = vmatprep.subr.bf16.mxu0 %v13188_v44 }
0x1a7c   : > { %11130 = vmatpush3.bf16.msra.mxu1 %v13186_v36 }
0x1a7d   : > { %11111 = vmatpush1.bf16.msra.mxu0 %v13190_v45  ;;  %11131 = vmatprep.subr.bf16.mxu1 %v11453_v0 }
0x1a7e   : > { %11113 = vmatprep.subr.bf16.mxu0 %v13314_v4 }
0x1a80   : > { %11133 = vmatpush3.bf16.msra.mxu1 %v13312_v49 }
0x1a81   : > { %11115 = vmatpush1.bf16.msra.mxu0 %v13316_v39  ;;  %9680 = vmatprep.subr.mxu1 %v11456_v6 }
0x1a82   : > { %7419 = vmatprep.subr.mxu0 %v13322_v25 }
0x1a84   : > { %9681 = vmatpush3.msra.mxu1 %v13336_v5 }
0x1a85   : > { %7420 = vmatpush1.msra.mxu0 %v13332_v57  ;;  %11166 = vmatprep.subr.bf16.mxu1 %v11453_v0 }
0x1a86   : > { %8256 = vmatmul.mubr.msk.f32.vlgmr.msra.gmra.mrb[82].mxu0 %vm1827_vm7, %v7391_v33  ;;  %9683 = vmatmul.mubr.msk.f32.vlgmr.msra.gmra.mrb[82].mxu1 %vm1827_vm7, %v7391_v33 }
0x1a87   : > { %11135 = vmatprep.subr.bf16.mxu0 %v12934_v18  ;;  %11168 = vmatpush3.bf16.msra.mxu1 %v12931_v60 }
0x1a88   : > { %11137 = vmatpush1.bf16.msra.mxu0 %v12937_v21  ;;  %11169 = vmatprep.subr.bf16.mxu1 %v11453_v0 }
0x1a89   : > { %11139 = vmatprep.subr.bf16.mxu0 %v12953_v61  ;;  %9717 = vmatprep.mubr.msk.f32.mxu1 %vm11457_vm0, %v11456_v6 }
0x1a8a   : > { %7712 = vmatprep.mubr.f32.mxu0 %v11456_v6 }
0x1a8b   : > { %11171 = vmatpush3.bf16.msra.mxu1 %v12950_v17 }
0x1a8c   : > { %11141 = vmatpush1.bf16.msra.mxu0 %v12956_v32  ;;  %11172 = vmatprep.subr.bf16.mxu1 %v11453_v0 }
0x1a8d   : > { %11143 = vmatprep.subr.bf16.mxu0 %v13044_v12 }
0x1a8f   : > { %11174 = vmatpush3.bf16.msra.mxu1 %v13042_v37 }
0x1a90   : > { %11145 = vmatpush1.bf16.msra.mxu0 %v13046_v46  ;;  %11175 = vmatprep.subr.bf16.mxu1 %v11453_v0 }
0x1a91   : > { %11147 = vmatprep.subr.bf16.mxu0 %v13171_v26 }
0x1a93   : > { %11177 = vmatpush3.bf16.msra.mxu1 %v13168_v23 }
0x1a94   : > { %11149 = vmatpush1.bf16.msra.mxu0 %v13174_v27  ;;  %11178 = vmatprep.subr.bf16.mxu1 %v11453_v0 }
0x1a95   : > { %11151 = vmatprep.subr.bf16.mxu0 %v13188_v44 }
0x1a97   : > { %11180 = vmatpush3.bf16.msra.mxu1 %v13186_v36 }
0x1a98   : > { %11153 = vmatpush1.bf16.msra.mxu0 %v13190_v45  ;;  %11181 = vmatprep.subr.bf16.mxu1 %v11453_v0 }
0x1a99   : > { %11155 = vmatprep.subr.bf16.mxu0 %v13314_v4 }
0x1a9b   : > { %11183 = vmatpush3.bf16.msra.mxu1 %v13312_v49 }
0x1a9c   : > { %11157 = vmatpush1.bf16.msra.mxu0 %v13316_v39  ;;  %11184 = vmatprep.subr.bf16.mxu1 %v11453_v0 }
0x1b22   : > { %v7242_v47 = vpop.f32.mrb[78].mxu1 }
0x1b23   : > { %7540 = vrot.lane.b32.xlu0 %v7242_v47, %s11459_s26  ;;  %v7171_v28 = vpop.f32.mrb[78].mxu0  ;;  %v9626_v34 = vpop.f32.mrb[79].mxu1 }
0x1b24   : > { %v7173_v35 = vpop.f32.mrb[79].mxu0 }
0x1b25   : > { %7538 = vrot.lane.b32.xlu1 %v7173_v35, %s11459_s26 }
0x1b27   : > { %7536 = vrot.lane.b32.xlu0 %v7171_v28, %s11459_s26 }
0x1b3e   : > { %v7316_v58 = vpop.f32.mrb[80].mxu0  ;;  %v7387_v63 = vpop.f32.mrb[80].mxu1 }
0x1b3f   : > { %v7318_v2 = vpop.f32.mrb[81].mxu0  ;;  %v9655_v3 = vpop.f32.mrb[81].mxu1 }
0x1b59   : > { %v7461_v15 = vpop.f32.mrb[82].mxu0  ;;  %v7532_v16 = vpop.f32.mrb[82].mxu1 }
0x1b5a   : > { %7548 = vrot.lane.b32.xlu1 %v7461_v15, %s11460_s27  ;;  %v7463_v22 = vpop.f32.mrb[83].mxu0  ;;  %v9684_v30 = vpop.f32.mrb[83].mxu1 }
0x1b5b   : > { %7550 = vrot.lane.b32.xlu0 %v7463_v22, %s11460_s27 }
0x1b5e   : > { %7552 = vrot.lane.b32.xlu1 %v7532_v16, %s11460_s27 }
0x1b95   : > { %v7541_v31 = vpop.permute.xlu0 %7540 }
0x1b97   : > { %v7539_v40 = vpop.permute.xlu1 %7538 }
0x1b98   : > { %v7542_v29 = vsel %vm663_vm4, %v7539_v40, %v7541_v31 }
0x1b99   : > { %v7537_v38 = vpop.permute.xlu0 %7536  ;;  %v7547_v42 = vadd.f32 %v7542_v29, %v7387_v63 }
0x1b9a   : > { %v7544_v41 = vsel %vm663_vm4, %v7541_v31, %v7537_v38  ;;  %v7543_v13 = vsel %vm663_vm4, %v7537_v38, %v7539_v40 }
0x1b9b   : > { %v7545_v1 = vadd.f32 %v7544_v41, %v7316_v58  ;;  %v7546_v62 = vadd.f32 %v7543_v13, %v7318_v2 }
0x1bcc   : > { %v7549_v50 = vpop.permute.xlu1 %7548 }
0x1bcd   : > { %v7551_v52 = vpop.permute.xlu0 %7550 }
0x1bce   : > { %v7555_v54 = vsel %vm676_vm5, %v7549_v50, %v7551_v52 }
0x1bcf   : > { %v7557_v56 = vadd.f32 %v7555_v54, %v7545_v1 }
0x1bd0   : > { %v7553_v48 = vpop.permute.xlu1 %7552 }
0x1bd1   : > { %vm7560_vm7 = vcmp.ge.f32.partialorder %v7557_v56, 0.0  ;;  %v7563_v53 = vmul.f32 0.2, %v7557_v56  ;;  %v7554_v55 = vsel %vm676_vm5, %v7551_v52, %v7553_v48  ;;  %v7556_v59 = vsel %vm676_vm5, %v7553_v48, %v7549_v50  ;;  %v7789_v48 = vld [vmem:[%s13616_s1 + $0x158] sm:$0xff] }
0x1bd2   : > { %v7558_v24 = vadd.f32 %v7554_v55, %v7546_v62  ;;  %v7559_v51 = vadd.f32 %v7556_v59, %v7547_v42  ;;  %v7647_v62 = vld [vmem:[%s13616_s1 + $0x150] sm:$0xff] }
0x1bd3   : > { %v7566_v43 = vsel %vm7560_vm7, %v7557_v56, %v7563_v53 }
0x1bd4   : > { %vm7561_vm6 = vcmp.ge.f32.partialorder %v7558_v24, 0.0  ;;  %vm7562_vm3 = vcmp.ge.f32.partialorder %v7559_v51, 0.0  ;;  %v7564_v7 = vmul.f32 0.2, %v7558_v24  ;;  %v7565_v33 = vmul.f32 0.2, %v7559_v51 }
0x1bd5   : > { %v7569_v28 = vmul.f32 %v7566_v43, %v11624_v10 }
0x1bd6   : > { %v7567_v47 = vsel %vm7561_vm6, %v7558_v24, %v7564_v7  ;;  %v7568_v34 = vsel %vm7562_vm3, %v7559_v51, %v7565_v33 }
0x1bd7   : > { %v7570_v35 = vmul.f32 %v7567_v47, %v11626_v11  ;;  %v7571_v58 = vmul.f32 %v7568_v34, %v11622_v9 }
0x1bd9   : > { %v11429_v63 = vpack.i.bf16 %v7570_v35, %v7569_v28  ;;  %7576 = vrot.lane.b32.xlu1 %v7571_v58, %s11454_s18  ;;  %v11434_v2 = vpack.i.bf16 %v7571_v58, %v7570_v35 }
0x1bdb   : > { %11430 = vrot.lane.b32.xlu0 %v11429_v63, %s11454_s18 }
0x1bdd   : > { %7587 = vrot.lane.b32.xlu1 %v7569_v28, %s11455_s19 }
0x1bdf   : > { %11435 = vrot.lane.b32.xlu0 %v11434_v2, %s11455_s19 }
0x1c4b   : > { %v7577_v3 = vpop.permute.xlu1 %7576 }
0x1c4d   : > { %v11431_v15 = vpop.permute.xlu0 %11430 }
0x1c4e   : > { %v11433_v16 = vunpack.i.h.bf16 %v11431_v15  ;;  %v11432_v22 = vunpack.i.l.bf16 %v11431_v15 }
0x1c4f   : > { %v7588_v52 = vpop.permute.xlu1 %7587 }
0x1c50   : > { %v7578_v30 = vsel %vm186_vm1, %v11433_v16, %v7577_v3  ;;  %v7580_v31 = vsel %vm186_vm1, %v7577_v3, %v11432_v22  ;;  %v7579_v38 = vsel %vm186_vm1, %v11432_v22, %v11433_v16 }
0x1c51   : > { %v13474_v40 = vpack.c.bf16 %v7578_v30, %v13336_v5  ;;  %v13477_v41 = vpack.c.bf16 %v7580_v31, %v13332_v57  ;;  %v11436_v50 = vpop.permute.xlu0 %11435  ;;  %v13480_v29 = vpack.c.bf16 %v7579_v38, %v13322_v25 }
0x1c52   : > { %v11438_v13 = vunpack.i.h.bf16 %v11436_v50  ;;  %v11437_v1 = vunpack.i.l.bf16 %v11436_v50  ;;  %v11442_v50 = vld [vmem:[%s11498_s17] sm:$0xff] }
0x1c53   : > { %11159 = vmatprep.subr.bf16.mxu0 %v13480_v29  ;;  %11186 = vmatpush3.bf16.msra.mxu1 %v13474_v40 }
0x1c54   : > { %v7595_v54 = vsel %vm202_vm2, %v11438_v13, %v7588_v52  ;;  %v7594_v5 = vsel %vm202_vm2, %v7588_v52, %v11437_v1  ;;  %11161 = vmatpush1.bf16.msra.mxu0 %v13477_v41  ;;  %11187 = vmatprep.subr.bf16.mxu1 %v11453_v0  ;;  %v7593_v25 = vsel %vm202_vm2, %v11437_v1, %v11438_v13 }
0x1c55   : > { %v13492_v57 = vpack.c.bf16 %v7595_v54, %v7571_v58  ;;  %v13494_v56 = vpack.c.bf16 %v7594_v5, %v7569_v28  ;;  %v13496_v42 = vpack.c.bf16 %v7593_v25, %v7570_v35 }
0x1c57   : > { %11163 = vmatprep.subr.bf16.mxu0 %v13496_v42  ;;  %11189 = vmatpush3.bf16.msra.mxu1 %v13492_v57 }
0x1c58   : > { %11165 = vmatpush1.bf16.msra.mxu0 %v13494_v56  ;;  %11222 = vmatprep.subr.bf16.mxu1 %v11453_v0 }
0x1c59   : > { %11191 = vmatprep.subr.bf16.mxu0 %v12934_v18 }
0x1c5a   : > { %9718 = vmatmul.mubr.f32.vlgmr.msra.gmra.mrb[84].mxu1 %v7647_v62 }
0x1c5b   : > { %7713 = vmatmul.mubr.f32.vlgmr.msra.gmra.mrb[84].mxu0 %v7647_v62  ;;  %11224 = vmatpush3.bf16.msra.mxu1 %v12931_v60 }
0x1c5c   : > { %11193 = vmatpush1.bf16.msra.mxu0 %v12937_v21  ;;  %11225 = vmatprep.subr.bf16.mxu1 %v11453_v0 }
0x1c5d   : > { %11195 = vmatprep.subr.bf16.mxu0 %v12953_v61  ;;  %7854 = vmatprep.mubr.f32.mxu0 %v11456_v6 }
0x1c5e   : > { %9752 = vmatprep.mubr.msk.f32.mxu1 %vm11457_vm0, %v11456_v6 }
0x1c5f   : > { %11227 = vmatpush3.bf16.msra.mxu1 %v12950_v17 }
0x1c60   : > { %11197 = vmatpush1.bf16.msra.mxu0 %v12956_v32  ;;  %11228 = vmatprep.subr.bf16.mxu1 %v11453_v0 }
0x1c61   : > { %11199 = vmatprep.subr.bf16.mxu0 %v13044_v12 }
0x1c63   : > { %11230 = vmatpush3.bf16.msra.mxu1 %v13042_v37 }
0x1c64   : > { %11201 = vmatpush1.bf16.msra.mxu0 %v13046_v46  ;;  %11231 = vmatprep.subr.bf16.mxu1 %v11453_v0 }
0x1c65   : > { %11203 = vmatprep.subr.bf16.mxu0 %v13171_v26 }
0x1c67   : > { %11233 = vmatpush3.bf16.msra.mxu1 %v13168_v23 }
0x1c68   : > { %11205 = vmatpush1.bf16.msra.mxu0 %v13174_v27  ;;  %11234 = vmatprep.subr.bf16.mxu1 %v11453_v0 }
0x1c69   : > { %11207 = vmatprep.subr.bf16.mxu0 %v13188_v44 }
0x1c6b   : > { %11236 = vmatpush3.bf16.msra.mxu1 %v13186_v36 }
0x1c6c   : > { %11209 = vmatpush1.bf16.msra.mxu0 %v13190_v45  ;;  %11237 = vmatprep.subr.bf16.mxu1 %v11453_v0 }
0x1c6d   : > { %11211 = vmatprep.subr.bf16.mxu0 %v13314_v4 }
0x1c6f   : > { %11239 = vmatpush3.bf16.msra.mxu1 %v13312_v49 }
0x1c70   : > { %11213 = vmatpush1.bf16.msra.mxu0 %v13316_v39  ;;  %11240 = vmatprep.subr.bf16.mxu1 %v11453_v0 }
0x1c71   : > { %11215 = vmatprep.subr.bf16.mxu0 %v13480_v29 }
0x1c73   : > { %11242 = vmatpush3.bf16.msra.mxu1 %v13474_v40 }
0x1c74   : > { %11217 = vmatpush1.bf16.msra.mxu0 %v13477_v41  ;;  %11243 = vmatprep.subr.bf16.mxu1 %v11453_v0 }
0x1c75   : > { %11219 = vmatprep.subr.bf16.mxu0 %v13496_v42 }
0x1c77   : > { %11245 = vmatpush3.bf16.msra.mxu1 %v13492_v57 }
0x1c78   : > { %11221 = vmatpush1.bf16.msra.mxu0 %v13494_v56  ;;  %11278 = vmatprep.subr.bf16.mxu1 %v11453_v0 }
0x1c79   : > { %11247 = vmatprep.subr.bf16.mxu0 %v12934_v18 }
0x1c7a   : > { %9753 = vmatmul.mubr.f32.vlgmr.msra.gmra.mrb[86].mxu1 %v7789_v48 }
0x1c7b   : > { %7855 = vmatmul.mubr.f32.vlgmr.msra.gmra.mrb[86].mxu0 %v7789_v48  ;;  %11280 = vmatpush3.bf16.msra.mxu1 %v12931_v60 }
0x1c7c   : > { %11249 = vmatpush1.bf16.msra.mxu0 %v12937_v21  ;;  %11281 = vmatprep.subr.bf16.mxu1 %v11453_v0 }
0x1c7d   : > { %11251 = vmatprep.subr.bf16.mxu0 %v12953_v61  ;;  %7996 = vmatprep.mubr.f32.mxu0 %v11456_v6 }
0x1c7e   : > { %9787 = vmatprep.mubr.msk.f32.mxu1 %vm11457_vm0, %v11456_v6  ;;  %v7931_v6 = vld [vmem:[%s13616_s1 + $0x160] sm:$0xff] }
0x1c7f   : > { %11283 = vmatpush3.bf16.msra.mxu1 %v12950_v17 }
0x1c80   : > { %11253 = vmatpush1.bf16.msra.mxu0 %v12956_v32  ;;  %11284 = vmatprep.subr.bf16.mxu1 %v11453_v0 }
0x1c81   : > { %11255 = vmatprep.subr.bf16.mxu0 %v13044_v12 }
0x1c83   : > { %11286 = vmatpush3.bf16.msra.mxu1 %v13042_v37 }
0x1c84   : > { %11257 = vmatpush1.bf16.msra.mxu0 %v13046_v46  ;;  %11287 = vmatprep.subr.bf16.mxu1 %v11453_v0 }
0x1c85   : > { %11259 = vmatprep.subr.bf16.mxu0 %v13171_v26 }
0x1c87   : > { %11289 = vmatpush3.bf16.msra.mxu1 %v13168_v23 }
0x1c88   : > { %11261 = vmatpush1.bf16.msra.mxu0 %v13174_v27  ;;  %11290 = vmatprep.subr.bf16.mxu1 %v11453_v0 }
0x1c89   : > { %11263 = vmatprep.subr.bf16.mxu0 %v13188_v44 }
0x1c8b   : > { %11292 = vmatpush3.bf16.msra.mxu1 %v13186_v36 }
0x1c8c   : > { %11265 = vmatpush1.bf16.msra.mxu0 %v13190_v45  ;;  %11293 = vmatprep.subr.bf16.mxu1 %v11453_v0 }
0x1c8d   : > { %11267 = vmatprep.subr.bf16.mxu0 %v13314_v4 }
0x1c8f   : > { %11295 = vmatpush3.bf16.msra.mxu1 %v13312_v49 }
0x1c90   : > { %11269 = vmatpush1.bf16.msra.mxu0 %v13316_v39  ;;  %11296 = vmatprep.subr.bf16.mxu1 %v11453_v0 }
0x1c91   : > { %11271 = vmatprep.subr.bf16.mxu0 %v13480_v29 }
0x1c93   : > { %11298 = vmatpush3.bf16.msra.mxu1 %v13474_v40 }
0x1c94   : > { %11273 = vmatpush1.bf16.msra.mxu0 %v13477_v41  ;;  %11299 = vmatprep.subr.bf16.mxu1 %v11453_v0 }
0x1c95   : > { %11275 = vmatprep.subr.bf16.mxu0 %v13496_v42 }
0x1c97   : > { %11301 = vmatpush3.bf16.msra.mxu1 %v13492_v57 }
0x1c98   : > { %11277 = vmatpush1.bf16.msra.mxu0 %v13494_v56 }
0x1c9a   : > { %9788 = vmatmul.mubr.f32.vlgmr.msra.gmra.mrb[88].mxu1 %v7931_v6 }
0x1c9b   : > { %7997 = vmatmul.mubr.f32.vlgmr.msra.gmra.mrb[88].mxu0 %v7931_v6 }
0x1d2d   : > { %v7785_v60 = vpop.f32.mrb[84].mxu1 }
0x1d2e   : > { %8077 = vrot.lane.b32.xlu0 %v7785_v60, %s11459_s26  ;;  %v7714_v18 = vpop.f32.mrb[84].mxu0  ;;  %v9719_v21 = vpop.f32.mrb[85].mxu1 }
0x1d2f   : > { %v7716_v17 = vpop.f32.mrb[85].mxu0 }
0x1d30   : > { %8075 = vrot.lane.b32.xlu1 %v7716_v17, %s11459_s26 }
0x1d32   : > { %8073 = vrot.lane.b32.xlu0 %v7714_v18, %s11459_s26 }
0x1d4d   : > { %v7927_v0 = vpop.f32.mrb[86].mxu1 }
0x1d4e   : > { %v7856_v61 = vpop.f32.mrb[86].mxu0  ;;  %v9754_v32 = vpop.f32.mrb[87].mxu1 }
0x1d4f   : > { %v7858_v37 = vpop.f32.mrb[87].mxu0 }
0x1d6d   : > { %v8069_v12 = vpop.f32.mrb[88].mxu1 }
0x1d6e   : > { %v7998_v46 = vpop.f32.mrb[88].mxu0  ;;  %v9789_v23 = vpop.f32.mrb[89].mxu1 }
0x1d6f   : > { %8085 = vrot.lane.b32.xlu1 %v7998_v46, %s11460_s27  ;;  %v8000_v26 = vpop.f32.mrb[89].mxu0 }
0x1d70   : > { %8087 = vrot.lane.b32.xlu0 %v8000_v26, %s11460_s27 }
0x1d73   : > { %8089 = vrot.lane.b32.xlu1 %v8069_v12, %s11460_s27 }
0x1da0   : > { %v8078_v27 = vpop.permute.xlu0 %8077 }
0x1da2   : > { %v8076_v44 = vpop.permute.xlu1 %8075 }
0x1da3   : > { %v8079_v4 = vsel %vm663_vm4, %v8076_v44, %v8078_v27 }
0x1da4   : > { %v8074_v36 = vpop.permute.xlu0 %8073  ;;  %v8084_v51 = vadd.f32 %v8079_v4, %v7927_v0 }
0x1da5   : > { %v8081_v45 = vsel %vm663_vm4, %v8078_v27, %v8074_v36  ;;  %v8080_v39 = vsel %vm663_vm4, %v8074_v36, %v8076_v44 }
0x1da6   : > { %v8082_v53 = vadd.f32 %v8081_v45, %v7856_v61  ;;  %v8083_v43 = vadd.f32 %v8080_v39, %v7858_v37 }
0x1de1   : > { %v8086_v49 = vpop.permute.xlu1 %8085 }
0x1de2   : > { %v8088_v55 = vpop.permute.xlu0 %8087 }
0x1de3   : > { %v8092_v59 = vsel %vm676_vm5, %v8086_v49, %v8088_v55 }
0x1de4   : > { %v8094_v24 = vadd.f32 %v8092_v59, %v8082_v53 }
0x1de5   : > { %v8090_v7 = vpop.permute.xlu1 %8089 }
0x1de6   : > { %vm8097_vm0 = vcmp.ge.f32.partialorder %v8094_v24, 0.0  ;;  %v8100_v33 = vmul.f32 0.2, %v8094_v24  ;;  %v8091_v47 = vsel %vm676_vm5, %v8088_v55, %v8090_v7  ;;  %v8093_v28 = vsel %vm676_vm5, %v8090_v7, %v8086_v49 }
0x1de7   : > { %v8095_v34 = vadd.f32 %v8091_v47, %v8083_v43  ;;  %v8096_v35 = vadd.f32 %v8093_v28, %v8084_v51 }
0x1de8   : > { %v8103_v58 = vsel %vm8097_vm0, %v8094_v24, %v8100_v33 }
0x1de9   : > { %v8106_v63 = vmul.f32 %v8103_v58, %v11624_v10  ;;  %vm8098_vm1 = vcmp.ge.f32.partialorder %v8095_v34, 0.0  ;;  %vm8099_vm2 = vcmp.ge.f32.partialorder %v8096_v35, 0.0  ;;  %v8101_v2 = vmul.f32 0.2, %v8095_v34 }
0x1dea   : > { %v8102_v3 = vmul.f32 0.2, %v8096_v35 }
0x1deb   : > { %v8109_v15 = vmul.f32 0.2, %v8106_v63  ;;  %v8104_v16 = vsel %vm8098_vm1, %v8095_v34, %v8101_v2 }
0x1dec   : > { %v8105_v22 = vsel %vm8099_vm2, %v8096_v35, %v8102_v3  ;;  %v8107_v30 = vmul.f32 %v8104_v16, %v11626_v11 }
0x1ded   : > { %v8112_v8 = vadd.f32 %v8109_v15, %v12906_v14  ;;  %v8108_v31 = vmul.f32 %v8105_v22, %v11622_v9  ;;  %v11443_v14 = vld [vmem:[%s11498_s17 + $0x8] sm:$0xff]  ;;  %v11444_v9 = vld [vmem:[%s11498_s17 + $0x10] sm:$0xff] }
0x1dee   : > { %v8110_v38 = vmul.f32 0.2, %v8107_v30 }
0x1def   : > { %v8115_v40 = vmul.f32 0.2, %v8112_v8  ;;  %v8111_v41 = vmul.f32 0.2, %v8108_v31 }
0x1df0   : > { %v8113_v10 = vadd.f32 %v8110_v38, %v12909_v19 }
0x1df1   : > { %v8118_v29 = vadd.f32 %v11442_v50, %v8115_v40  ;;  %v8114_v13 = vadd.f32 %v8111_v41, %v12912_v20 }
0x1df2   : > { %v8116_v11 = vmul.f32 0.2, %v8113_v10 }
0x1df3   : > { %8121 = vst [vmem:[%s170_s9] sm:$0xff] %v8118_v29  ;;  %v8117_v1 = vmul.f32 0.2, %v8114_v13 }
0x1df4   : > { %v8119_v52 = vadd.f32 %v11443_v14, %v8116_v11 }
0x1df5   : > { %v8120_v54 = vadd.f32 %v11444_v9, %v8117_v1 }
0x1df6   : > { %8122 = vst [vmem:[%s170_s9 + $0x8] sm:$0xff] %v8119_v52 }
0x1df7   : > { %8123 = vst [vmem:[%s170_s9 + $0x10] sm:$0xff] %v8120_v54 }
0x1df8 PF: > { %s13_s12 = sadd.s32 1, %s11451_s12  }
0x1df9   : > { %p10_p4 = scmp.ge.s32.totalorder %s13_s12, 4  }
0x1dfb   :  { %12 = sbr.rel (!%p10_p4) target bundleno = 1 (0x1), region = 62 }

</bundles_post_ra>
